<compile_context>
chip_gen: v6e
topology: v6e:2x2x1
jax: 0.10.0
libtpu: 0.0.40
codegen_flags: <defaults>
</compile_context>

<pallas_src>
import math
import jax
import jax.numpy as jnp
from jax import lax
from jax.experimental import pallas as pl
from jax.experimental.pallas import tpu as pltpu

NUM_ATOM_TYPE = 8
NUM_CHIRALITY_TAG = 3
BN_EPS = 1e-5
NEG_SLOPE = 0.01


def _vmem_spec():
    return pl.BlockSpec(memory_space=pltpu.MemorySpace.VMEM)


# ----------------------------------------------------------------------------
# The single fused kernel
# ----------------------------------------------------------------------------
def fused_kernel(x0_ref, src_ref, dst_ref, batch_ref, etype_ref, inv_cnt_ref,
                 edge_tab_ref, w1s_ref, b1s_ref, w2s_ref, b2s_ref,
                 wt1_ref, bt1_ref, wt2_ref, bt2_ref,
                 wm1_ref, bm1_ref, wm2_ref, bm2_ref,
                 wm3_ref, bm3_ref, wm4_ref, bm4_ref,
                 out_ref):
    N2, D = x0_ref.shape                 # 2*N nodes (graphA ++ graphB), emb dim
    E2 = src_ref.shape[0]                # 2*(E + N) edges incl. self loops
    B2 = inv_cnt_ref.shape[0]            # 2*num_graphs pooled rows
    N = N2 // 2
    B = B2 // 2
    L = w1s_ref.shape[0]                 # static number of GraphProcessor layers
    NT = edge_tab_ref.shape[1]           # edge-type vocabulary (8)

    # Build the 0/1 gather / scatter / pool / edge-type matrices in-register from
    # the int32 index vectors (exact in bf16; no [E,N]/[N,E]/[B,N] HBM traffic).
    src_oh = (lax.broadcasted_iota(jnp.int32, (E2, N2), 1)
              == src_ref[...]).astype(jnp.bfloat16)                  # [2E, 2N]
    dstT_oh = (lax.broadcasted_iota(jnp.int32, (N2, E2), 0)
               == dst_ref[...]).astype(jnp.bfloat16)                 # [2N, 2E]
    pool_oh = (lax.broadcasted_iota(jnp.int32, (B2, N2), 0)
               == batch_ref[...]).astype(jnp.bfloat16)               # [2B, 2N]
    etype_oh = (lax.broadcasted_iota(jnp.int32, (E2, NT), 1)
                == etype_ref[...]).astype(jnp.bfloat16)              # [2E, 8]

    x = x0_ref[...]                                                   # [2N, D] f32

    # Layer loop, statically unrolled (L is small & static; all Ref indices static).
    # TODO(synk): switch to lax.fori_loop with dynamic w1s_ref[l] indexing if L > ~4.
    for l in range(L):
        # edge embedding gather: [2E,8] @ [8,D]
        edge_emb = jnp.dot(etype_oh, edge_tab_ref[l],
                           preferred_element_type=jnp.float32)
        # gather source node features: [2E,2N] @ [2N,D]
        x_src = jnp.dot(src_oh, x.astype(jnp.bfloat16),
                        preferred_element_type=jnp.float32)
        msg = jnp.maximum(x_src + edge_emb, 0.0)                      # relu(x_j + e)
        # scatter-add onto destination nodes: [2N,2E] @ [2E,D]
        aggr = jnp.dot(dstT_oh, msg.astype(jnp.bfloat16),
                       preferred_element_type=jnp.float32)
        # node_mlp: Linear -> ReLU -> Linear  (bf16 operands, f32 accumulation)
        h = jnp.maximum(
            jnp.dot(aggr.astype(jnp.bfloat16), w1s_ref[l],
                    preferred_element_type=jnp.float32) + b1s_ref[l], 0.0)
        y = jnp.dot(h.astype(jnp.bfloat16), w2s_ref[l],
                    preferred_element_type=jnp.float32) + b2s_ref[l]
        # BatchNorm1d, training mode (batch stats, biased var), gamma=1 / beta=0.
        # Stats are PER GRAPH (rows [0:N] = graphA, [N:2N] = graphB) to keep the
        # PyTorch semantics despite the combined-graph batching.
        yA, yB = y[:N], y[N:]
        mA = jnp.mean(yA, axis=0, keepdims=True)
        vA = jnp.mean((yA - mA) ** 2, axis=0, keepdims=True)
        mB = jnp.mean(yB, axis=0, keepdims=True)
        vB = jnp.mean((yB - mB) ** 2, axis=0, keepdims=True)
        yA = (yA - mA) * lax.rsqrt(vA + BN_EPS)
        yB = (yB - mB) * lax.rsqrt(vB + BN_EPS)
        x = jnp.maximum(jnp.concatenate([yA, yB], axis=0), 0.0)       # use_relu=True

    # global_mean_pool: [2B,2N] (0/1) @ [2N,D] -> [2B,D], scaled by 1/count (f32)
    pooled = jnp.dot(pool_oh, x.astype(jnp.bfloat16),
                     preferred_element_type=jnp.float32) * inv_cnt_ref[...]
    # output_transformation: Linear -> ReLU -> (Dropout p=0) -> Linear
    h = jnp.maximum(
        jnp.dot(pooled.astype(jnp.bfloat16), wt1_ref[...],
                preferred_element_type=jnp.float32) + bt1_ref[...], 0.0)
    t = jnp.dot(h.astype(jnp.bfloat16), wt2_ref[...],
                preferred_element_type=jnp.float32) + bt2_ref[...]     # [2B, Fh]

    # concat(graphA, graphB) along the feature axis -> [B, 2*Fh]
    x_head = jnp.concatenate([t[:B], t[B:]], axis=1)

    def leaky(v):
        return jnp.where(v > 0, v, NEG_SLOPE * v)

    def lin(v, w_ref, b_ref):
        return jnp.dot(v.astype(jnp.bfloat16), w_ref[...],
                       preferred_element_type=jnp.float32) + b_ref[...]

    # final head MLP: 3x (Linear -> LeakyReLU) -> Linear(.., 1)
    hh = leaky(lin(x_head, wm1_ref, bm1_ref))
    hh = leaky(lin(hh, wm2_ref, bm2_ref))
    hh = leaky(lin(hh, wm3_ref, bm3_ref))
    out_ref[...] = lin(hh, wm4_ref, bm4_ref)


# ----------------------------------------------------------------------------
# Parameter init (deterministic, shapes follow the PyTorch __init__)
# ----------------------------------------------------------------------------
def _xavier_uniform(key, shape):
    fan_in, fan_out = shape
    a = math.sqrt(6.0 / (fan_in + fan_out))
    return jax.random.uniform(key, shape, jnp.float32, -a, a)


def _linear(key, in_dim, out_dim):
    kw, kb = jax.random.split(key)
    bound = 1.0 / math.sqrt(in_dim)
    w = jax.random.uniform(kw, (in_dim, out_dim), jnp.float32, -bound, bound)
    b = jax.random.uniform(kb, (1, out_dim), jnp.float32, -1.0, 0.0)
    return w, b


def init_params(key, emb_dim, feature_dim, mlp_hidden_dims, num_layers):
    params = {}
    key, k1, k2 = jax.random.split(key, 3)
    params["x_embedding1"] = _xavier_uniform(k1, (NUM_ATOM_TYPE, emb_dim))
    params["x_embedding2"] = _xavier_uniform(k2, (NUM_CHIRALITY_TAG, emb_dim))

    layers = []
    for _ in range(num_layers):
        key, ka, kb_, kc = jax.random.split(key, 4)
        w1, b1 = _linear(ka, emb_dim, 2 * emb_dim)
        w2, b2 = _linear(kb_, 2 * emb_dim, emb_dim)
        layers.append(dict(
            w1=w1, b1=b1, w2=w2, b2=b2,
            edge_embed_type=_xavier_uniform(kc, (NUM_ATOM_TYPE, emb_dim)),
            # edge_embed_dir is initialized in the PyTorch module but unused in forward.
        ))
    params["graph_layers"] = layers

    key, kt1, kt2 = jax.random.split(key, 3)
    wt1, bt1 = _linear(kt1, emb_dim, feature_dim)
    wt2, bt2 = _linear(kt2, feature_dim, feature_dim // 2)
    params["out_transform"] = dict(w1=wt1, b1=bt1, w2=wt2, b2=bt2)

    dims = [emb_dim + feature_dim // 2] + list(mlp_hidden_dims) + [1]
    mlp_p = {}
    for i in range(4):
        key, km = jax.random.split(key)
        w, b = _linear(km, dims[i], dims[i + 1])
        mlp_p[f"w{i+1}"] = w
        mlp_p[f"b{i+1}"] = b
    params["mlp"] = mlp_p
    return params


def prepare_kernel_params(params):
    """Stack per-layer weights and precast MXU operands to bf16 ONCE."""
    gl = params["graph_layers"]
    ot = params["out_transform"]
    m = params["mlp"]
    kp = dict(
        x_embedding1=params["x_embedding1"],
        x_embedding2=params["x_embedding2"],
        edge_tab=jnp.stack([p["edge_embed_type"] for p in gl]).astype(jnp.bfloat16),
        w1s=jnp.stack([p["w1"] for p in gl]).astype(jnp.bfloat16),     # [L, D, 2D]
        b1s=jnp.stack([p["b1"] for p in gl]),                          # [L, 1, 2D] f32
        w2s=jnp.stack([p["w2"] for p in gl]).astype(jnp.bfloat16),     # [L, 2D, D]
        b2s=jnp.stack([p["b2"] for p in gl]),                          # [L, 1, D]  f32
        wt1=ot["w1"].astype(jnp.bfloat16), bt1=ot["b1"],
        wt2=ot["w2"].astype(jnp.bfloat16), bt2=ot["b2"],
    )
    for i in range(1, 5):
        kp[f"wm{i}"] = m[f"w{i}"].astype(jnp.bfloat16)
        kp[f"bm{i}"] = m[f"b{i}"]
    return kp


# ----------------------------------------------------------------------------
# Forward pass (1 pallas_call; host glue = embedding gathers + index packing)
# ----------------------------------------------------------------------------
def _add_self_loops(g):
    n = g["x"].shape[0]
    arange = jnp.arange(n, dtype=jnp.int32)
    src = jnp.concatenate([g["edge_index"][0], arange]).astype(jnp.int32)
    dst = jnp.concatenate([g["edge_index"][1], arange]).astype(jnp.int32)
    etype = jnp.concatenate(
        [g["edge_attr"][:, 0],
         jnp.full((n,), 4, dtype=g["edge_attr"].dtype)]).astype(jnp.int32)
    return src, dst, etype


def based_model_forward(kp, graphA, graphB):
    # Combined-graph batching requires both graphs to share node/edge/batch counts.
    assert graphA["x"].shape == graphB["x"].shape, "graphA/graphB node count mismatch"
    assert graphA["edge_index"].shape == graphB["edge_index"].shape, "edge count mismatch"
    assert graphA["num_graphs"] == graphB["num_graphs"], "num_graphs mismatch"

    n = graphA["x"].shape[0]
    b = graphA["num_graphs"]

    def embed(g):
        return kp["x_embedding1"][g["x"][:, 0]] + kp["x_embedding2"][g["x"][:, 1]]

    x0 = jnp.concatenate([embed(graphA), embed(graphB)], axis=0)          # [2N, D] f32

    sA, dA, tA = _add_self_loops(graphA)
    sB, dB, tB = _add_self_loops(graphB)
    src = jnp.concatenate([sA, sB + n])                                    # [2E]
    dst = jnp.concatenate([dA, dB + n])
    etype = jnp.concatenate([tA, tB])
    batch = jnp.concatenate(
        [graphA["batch"], graphB["batch"] + b]).astype(jnp.int32)          # [2N]

    counts = jax.ops.segment_sum(jnp.ones((2 * n,), jnp.float32), batch,
                                 num_segments=2 * b)
    inv_cnt = (1.0 / jnp.maximum(counts, 1.0))[:, None]                    # [2B, 1]

    args = (x0,
            src[:, None], dst[None, :], batch[None, :], etype[:, None],
            inv_cnt,
            kp["edge_tab"], kp["w1s"], kp["b1s"], kp["w2s"], kp["b2s"],
            kp["wt1"], kp["bt1"], kp["wt2"], kp["bt2"],
            kp["wm1"], kp["bm1"], kp["wm2"], kp["bm2"],
            kp["wm3"], kp["bm3"], kp["wm4"], kp["bm4"])

    D = x0.shape[1]
    E2, N2, B2 = src.shape[0], 2 * n, 2 * b
    L = kp["w1s"].shape[0]
    F, Fh = kp["wt1"].shape[1], kp["wt2"].shape[1]
    H1, H2, H3 = kp["wm1"].shape[1], kp["wm2"].shape[1], kp["wm3"].shape[1]
    assert kp["wm1"].shape[0] == 2 * Fh, "head MLP input dim must equal 2*(feature_dim//2)"

    flops = (L * (2 * E2 * NUM_ATOM_TYPE * D + 4 * E2 * N2 * D + 8 * N2 * D * D)
             + 2 * B2 * N2 * D + 2 * B2 * D * F + 2 * B2 * F * Fh
             + 2 * b * (2 * Fh * H1 + H1 * H2 + H2 * H3 + H3))
    bytes_accessed = sum(int(a.size) * a.dtype.itemsize for a in args) + b * 4

    # TODO(synk): for graphs where 2E*2N one-hots no longer fit in vregs/VMEM, add an
    # edge-tiled "arbitrary" grid axis with a VMEM aggr accumulator + pl.when finalize.
    return pl.pallas_call(
        fused_kernel,
        out_shape=jax.ShapeDtypeStruct((b, 1), jnp.float32),
        in_specs=[_vmem_spec() for _ in args],
        out_specs=_vmem_spec(),
        compiler_params=pltpu.CompilerParams(
            # Budget under v7x's 64 MiB physical VMEM; raises the smaller scoped
            # defaults on v5e/v6e so larger graphs still compile without spilling.
            vmem_limit_bytes=48 * 1024 * 1024),
        cost_estimate=pl.CostEstimate(
            flops=flops, transcendentals=2 * L * D,
            bytes_accessed=bytes_accessed),
    )(*args)


# ----------------------------------------------------------------------------
# Pure-JAX reference for verification (f32, PyTorch semantics, per graph)
# ----------------------------------------------------------------------------
def ref_run_graph(params, g):
    x = params["x_embedding1"][g["x"][:, 0]] + params["x_embedding2"][g["x"][:, 1]]
    n = x.shape[0]
    src, dst, etype = _add_self_loops(g)
    for p in params["graph_layers"]:
        emb = p["edge_embed_type"][etype]
        msg = jnp.maximum(x[src] + emb, 0.0)
        aggr = jax.ops.segment_sum(msg, dst, num_segments=n)
        h = jnp.maximum(aggr @ p["w1"] + p["b1"], 0.0)
        y = h @ p["w2"] + p["b2"]
        mean = y.mean(0, keepdims=True)
        var = ((y - mean) ** 2).mean(0, keepdims=True)
        x = jnp.maximum((y - mean) / jnp.sqrt(var + BN_EPS), 0.0)
    counts = jnp.maximum(
        jax.ops.segment_sum(jnp.ones((n,), jnp.float32), g["batch"],
                            num_segments=g["num_graphs"]), 1.0)
    pooled = jax.ops.segment_sum(x, g["batch"],
                                 num_segments=g["num_graphs"]) / counts[:, None]
    op = params["out_transform"]
    h = jnp.maximum(pooled @ op["w1"] + op["b1"], 0.0)
    return h @ op["w2"] + op["b2"]


def ref_forward(params, graphA, graphB):
    with jax.default_matmul_precision("highest"):
        hA = ref_run_graph(params, graphA)
        hB = ref_run_graph(params, graphB)
        x = jnp.concatenate([hA, hB], axis=1)
        m = params["mlp"]

        def leaky(v):
            return jnp.where(v > 0, v, NEG_SLOPE * v)

        h = leaky(x @ m["w1"] + m["b1"])
        h = leaky(h @ m["w2"] + m["b2"])
        h = leaky(h @ m["w3"] + m["b3"])
        return h @ m["w4"] + m["b4"]


# ----------------------------------------------------------------------------
def make_graph(key, n_nodes, n_edges, n_graphs):
    k1, k2, k3, k4 = jax.random.split(key, 4)
    x = jnp.stack([
        jax.random.randint(k1, (n_nodes,), 0, NUM_ATOM_TYPE),
        jax.random.randint(k2, (n_nodes,), 0, NUM_CHIRALITY_TAG)], axis=1).astype(jnp.int32)
    edge_index = jax.random.randint(k3, (2, n_edges), 0, n_nodes).astype(jnp.int32)
    edge_attr = jnp.stack([
        jax.random.randint(k4, (n_edges,), 0, 4),
        jnp.zeros((n_edges,), dtype=jnp.int32)], axis=1).astype(jnp.int32)
    batch = jnp.repeat(jnp.arange(n_graphs, dtype=jnp.int32), n_nodes // n_graphs)
    return dict(x=x, edge_index=edge_index, edge_attr=edge_attr,
                batch=batch, num_graphs=n_graphs)


if __name__ == "__main__":
    # Lane-dense hyperparameters (emb_dim == feature_dim // 2 == 128, see NOTE above).
    emb_dim = 128
    feature_dim = 256
    mlp_hidden_dims = [256, 128, 128]
    num_layers = 2          # inject_layer=1 -> 1 basic + 1 ptcl layer (same op)

    key = jax.random.PRNGKey(0)
    kA, kB, kP = jax.random.split(key, 3)
    graphA = make_graph(kA, n_nodes=32, n_edges=48, n_graphs=4)
    graphB = make_graph(kB, n_nodes=32, n_edges=48, n_graphs=4)
    params = init_params(kP, emb_dim, feature_dim, mlp_hidden_dims, num_layers)
    kparams = prepare_kernel_params(params)   # stack + bf16-cast weights ONCE

    out = based_model_forward(kparams, graphA, graphB)
    out = jax.block_until_ready(out)

    ref = jax.block_until_ready(ref_forward(params, graphA, graphB))
    assert out.shape == (4, 1), out.shape
    assert bool(jnp.all(jnp.isfinite(out)))
    # bf16 MXU operands (f32 accumulation) vs an f32 "highest"-precision reference.
    assert jnp.allclose(out, ref, atol=5e-2, rtol=5e-2), (out, ref)

    print("KERNEL_OK")
</pallas_src>

<mosaic_0001>
module attributes {stable_mosaic.version = 11 : i64} {
  func.func @fused_kernel(%arg0: memref<64x128xf32, #tpu.memory_space<vmem>>, %arg1: memref<160x1xi32, #tpu.memory_space<vmem>>, %arg2: memref<1x160xi32, #tpu.memory_space<vmem>>, %arg3: memref<1x64xi32, #tpu.memory_space<vmem>>, %arg4: memref<160x1xi32, #tpu.memory_space<vmem>>, %arg5: memref<8x1xf32, #tpu.memory_space<vmem>>, %arg6: memref<2x8x128xbf16, #tpu.memory_space<vmem>>, %arg7: memref<2x128x256xbf16, #tpu.memory_space<vmem>>, %arg8: memref<2x1x256xf32, #tpu.memory_space<vmem>>, %arg9: memref<2x256x128xbf16, #tpu.memory_space<vmem>>, %arg10: memref<2x1x128xf32, #tpu.memory_space<vmem>>, %arg11: memref<128x256xbf16, #tpu.memory_space<vmem>>, %arg12: memref<1x256xf32, #tpu.memory_space<vmem>>, %arg13: memref<256x128xbf16, #tpu.memory_space<vmem>>, %arg14: memref<1x128xf32, #tpu.memory_space<vmem>>, %arg15: memref<256x256xbf16, #tpu.memory_space<vmem>>, %arg16: memref<1x256xf32, #tpu.memory_space<vmem>>, %arg17: memref<256x128xbf16, #tpu.memory_space<vmem>>, %arg18: memref<1x128xf32, #tpu.memory_space<vmem>>, %arg19: memref<128x128xbf16, #tpu.memory_space<vmem>>, %arg20: memref<1x128xf32, #tpu.memory_space<vmem>>, %arg21: memref<128x1xbf16, #tpu.memory_space<vmem>>, %arg22: memref<1x1xf32, #tpu.memory_space<vmem>>, %arg23: memref<4x1xf32, #tpu.memory_space<vmem>>) attributes {dimension_semantics = [], scalar_prefetch = 0 : i64, scratch_operands = 0 : i64, tpu.core_type = #tpu.core_type<tc>} {
    %0 = tpu.iota {dimensions = array<i32: 1>} : vector<160x64xi32>
    %c0 = arith.constant 0 : index
    %c0_0 = arith.constant 0 : index
    %1 = vector.load %arg1[%c0, %c0_0] : memref<160x1xi32, #tpu.memory_space<vmem>>, vector<160x1xi32>
    %2 = vector.broadcast %1 : vector<160x1xi32> to vector<160x64xi32>
    %3 = arith.cmpi eq, %0, %2 : vector<160x64xi32>
    %4 = arith.extui %3 : vector<160x64xi1> to vector<160x64xi32>
    %5 = arith.sitofp %4 : vector<160x64xi32> to vector<160x64xf32>
    %6 = arith.truncf %5 : vector<160x64xf32> to vector<160x64xbf16>
    %7 = tpu.iota {dimensions = array<i32: 0>} : vector<64x160xi32>
    %c0_1 = arith.constant 0 : index
    %c0_2 = arith.constant 0 : index
    %8 = vector.load %arg2[%c0_1, %c0_2] : memref<1x160xi32, #tpu.memory_space<vmem>>, vector<1x160xi32>
    %9 = vector.broadcast %8 : vector<1x160xi32> to vector<64x160xi32>
    %10 = arith.cmpi eq, %7, %9 : vector<64x160xi32>
    %11 = arith.extui %10 : vector<64x160xi1> to vector<64x160xi32>
    %12 = arith.sitofp %11 : vector<64x160xi32> to vector<64x160xf32>
    %13 = arith.truncf %12 : vector<64x160xf32> to vector<64x160xbf16>
    %14 = tpu.iota {dimensions = array<i32: 0>} : vector<8x64xi32>
    %c0_3 = arith.constant 0 : index
    %c0_4 = arith.constant 0 : index
    %15 = vector.load %arg3[%c0_3, %c0_4] : memref<1x64xi32, #tpu.memory_space<vmem>>, vector<1x64xi32>
    %16 = vector.broadcast %15 : vector<1x64xi32> to vector<8x64xi32>
    %17 = arith.cmpi eq, %14, %16 : vector<8x64xi32>
    %18 = arith.extui %17 : vector<8x64xi1> to vector<8x64xi32>
    %19 = arith.sitofp %18 : vector<8x64xi32> to vector<8x64xf32>
    %20 = arith.truncf %19 : vector<8x64xf32> to vector<8x64xbf16>
    %21 = tpu.iota {dimensions = array<i32: 1>} : vector<160x8xi32>
    %c0_5 = arith.constant 0 : index
    %c0_6 = arith.constant 0 : index
    %22 = vector.load %arg4[%c0_5, %c0_6] : memref<160x1xi32, #tpu.memory_space<vmem>>, vector<160x1xi32>
    %23 = vector.broadcast %22 : vector<160x1xi32> to vector<160x8xi32>
    %24 = arith.cmpi eq, %21, %23 : vector<160x8xi32>
    %25 = arith.extui %24 : vector<160x8xi1> to vector<160x8xi32>
    %26 = arith.sitofp %25 : vector<160x8xi32> to vector<160x8xf32>
    %27 = arith.truncf %26 : vector<160x8xf32> to vector<160x8xbf16>
    %c0_7 = arith.constant 0 : index
    %c0_8 = arith.constant 0 : index
    %28 = vector.load %arg0[%c0_7, %c0_8] : memref<64x128xf32, #tpu.memory_space<vmem>>, vector<64x128xf32>
    %c0_9 = arith.constant 0 : index
    %c0_10 = arith.constant 0 : index
    %c0_11 = arith.constant 0 : index
    %29 = vector.load %arg6[%c0_9, %c0_10, %c0_11] : memref<2x8x128xbf16, #tpu.memory_space<vmem>>, vector<1x8x128xbf16>
    %30 = vector.shape_cast %29 : vector<1x8x128xbf16> to vector<8x128xbf16>
    %cst = arith.constant dense<0.000000e+00> : vector<160x128xf32>
    %31 = tpu.matmul %27, %30, %cst {dimension_numbers = #tpu.dot_dimension_numbers<[1], [0], [0], [1], [0, 0, 1, 1], [], []>} : vector<160x8xbf16>, vector<8x128xbf16>, vector<160x128xf32> -> vector<160x128xf32>
    %32 = arith.truncf %28 : vector<64x128xf32> to vector<64x128xbf16>
    %cst_12 = arith.constant dense<0.000000e+00> : vector<160x128xf32>
    %33 = tpu.matmul %6, %32, %cst_12 {dimension_numbers = #tpu.dot_dimension_numbers<[1], [0], [0], [1], [0, 0, 1, 1], [], []>} : vector<160x64xbf16>, vector<64x128xbf16>, vector<160x128xf32> -> vector<160x128xf32>
    %34 = arith.addf %33, %31 : vector<160x128xf32>
    %cst_13 = arith.constant 0.000000e+00 : f32
    %35 = vector.broadcast %cst_13 : f32 to vector<160x128xf32>
    %36 = arith.maximumf %34, %35 : vector<160x128xf32>
    %37 = arith.truncf %36 : vector<160x128xf32> to vector<160x128xbf16>
    %cst_14 = arith.constant dense<0.000000e+00> : vector<64x128xf32>
    %38 = tpu.matmul %13, %37, %cst_14 {dimension_numbers = #tpu.dot_dimension_numbers<[1], [0], [0], [1], [0, 0, 1, 1], [], []>} : vector<64x160xbf16>, vector<160x128xbf16>, vector<64x128xf32> -> vector<64x128xf32>
    %39 = arith.truncf %38 : vector<64x128xf32> to vector<64x128xbf16>
    %c0_15 = arith.constant 0 : index
    %c0_16 = arith.constant 0 : index
    %c0_17 = arith.constant 0 : index
    %40 = vector.load %arg7[%c0_15, %c0_16, %c0_17] : memref<2x128x256xbf16, #tpu.memory_space<vmem>>, vector<1x128x256xbf16>
    %41 = vector.shape_cast %40 : vector<1x128x256xbf16> to vector<128x256xbf16>
    %cst_18 = arith.constant dense<0.000000e+00> : vector<64x256xf32>
    %42 = tpu.matmul %39, %41, %cst_18 {dimension_numbers = #tpu.dot_dimension_numbers<[1], [0], [0], [1], [0, 0, 1, 1], [], []>} : vector<64x128xbf16>, vector<128x256xbf16>, vector<64x256xf32> -> vector<64x256xf32>
    %c0_19 = arith.constant 0 : index
    %c0_20 = arith.constant 0 : index
    %c0_21 = arith.constant 0 : index
    %43 = vector.load %arg8[%c0_19, %c0_20, %c0_21] : memref<2x1x256xf32, #tpu.memory_space<vmem>>, vector<1x1x256xf32>
    %44 = vector.shape_cast %43 : vector<1x1x256xf32> to vector<1x256xf32>
    %45 = vector.broadcast %44 : vector<1x256xf32> to vector<64x256xf32>
    %46 = arith.addf %42, %45 : vector<64x256xf32>
    %cst_22 = arith.constant 0.000000e+00 : f32
    %47 = vector.broadcast %cst_22 : f32 to vector<64x256xf32>
    %48 = arith.maximumf %46, %47 : vector<64x256xf32>
    %49 = arith.truncf %48 : vector<64x256xf32> to vector<64x256xbf16>
    %c0_23 = arith.constant 0 : index
    %c0_24 = arith.constant 0 : index
    %c0_25 = arith.constant 0 : index
    %50 = vector.load %arg9[%c0_23, %c0_24, %c0_25] : memref<2x256x128xbf16, #tpu.memory_space<vmem>>, vector<1x256x128xbf16>
    %51 = vector.shape_cast %50 : vector<1x256x128xbf16> to vector<256x128xbf16>
    %cst_26 = arith.constant dense<0.000000e+00> : vector<64x128xf32>
    %52 = tpu.matmul %49, %51, %cst_26 {dimension_numbers = #tpu.dot_dimension_numbers<[1], [0], [0], [1], [0, 0, 1, 1], [], []>} : vector<64x256xbf16>, vector<256x128xbf16>, vector<64x128xf32> -> vector<64x128xf32>
    %c0_27 = arith.constant 0 : index
    %c0_28 = arith.constant 0 : index
    %c0_29 = arith.constant 0 : index
    %53 = vector.load %arg10[%c0_27, %c0_28, %c0_29] : memref<2x1x128xf32, #tpu.memory_space<vmem>>, vector<1x1x128xf32>
    %54 = vector.shape_cast %53 : vector<1x1x128xf32> to vector<1x128xf32>
    %55 = vector.broadcast %54 : vector<1x128xf32> to vector<64x128xf32>
    %56 = arith.addf %52, %55 : vector<64x128xf32>
    %57 = vector.extract_strided_slice %56 {offsets = [0, 0], sizes = [32, 128], strides = [1, 1]} : vector<64x128xf32> to vector<32x128xf32>
    %58 = vector.extract_strided_slice %56 {offsets = [32, 0], sizes = [32, 128], strides = [1, 1]} : vector<64x128xf32> to vector<32x128xf32>
    %cst_30 = arith.constant dense<0.000000e+00> : vector<128xf32>
    %59 = vector.multi_reduction <add>, %57, %cst_30 [0] : vector<32x128xf32> to vector<128xf32>
    %60 = vector.shape_cast %59 : vector<128xf32> to vector<1x128xf32>
    %cst_31 = arith.constant 3.200000e+01 : f32
    %61 = vector.broadcast %cst_31 : f32 to vector<1x128xf32>
    %62 = arith.divf %60, %61 : vector<1x128xf32>
    %63 = vector.broadcast %62 : vector<1x128xf32> to vector<32x128xf32>
    %64 = arith.subf %57, %63 : vector<32x128xf32>
    %65 = arith.mulf %64, %64 : vector<32x128xf32>
    %cst_32 = arith.constant dense<0.000000e+00> : vector<128xf32>
    %66 = vector.multi_reduction <add>, %65, %cst_32 [0] : vector<32x128xf32> to vector<128xf32>
    %67 = vector.shape_cast %66 : vector<128xf32> to vector<1x128xf32>
    %cst_33 = arith.constant 3.200000e+01 : f32
    %68 = vector.broadcast %cst_33 : f32 to vector<1x128xf32>
    %69 = arith.divf %67, %68 : vector<1x128xf32>
    %cst_34 = arith.constant dense<0.000000e+00> : vector<128xf32>
    %70 = vector.multi_reduction <add>, %58, %cst_34 [0] : vector<32x128xf32> to vector<128xf32>
    %71 = vector.shape_cast %70 : vector<128xf32> to vector<1x128xf32>
    %cst_35 = arith.constant 3.200000e+01 : f32
    %72 = vector.broadcast %cst_35 : f32 to vector<1x128xf32>
    %73 = arith.divf %71, %72 : vector<1x128xf32>
    %74 = vector.broadcast %73 : vector<1x128xf32> to vector<32x128xf32>
    %75 = arith.subf %58, %74 : vector<32x128xf32>
    %76 = arith.mulf %75, %75 : vector<32x128xf32>
    %cst_36 = arith.constant dense<0.000000e+00> : vector<128xf32>
    %77 = vector.multi_reduction <add>, %76, %cst_36 [0] : vector<32x128xf32> to vector<128xf32>
    %78 = vector.shape_cast %77 : vector<128xf32> to vector<1x128xf32>
    %cst_37 = arith.constant 3.200000e+01 : f32
    %79 = vector.broadcast %cst_37 : f32 to vector<1x128xf32>
    %80 = arith.divf %78, %79 : vector<1x128xf32>
    %81 = vector.broadcast %62 : vector<1x128xf32> to vector<32x128xf32>
    %82 = arith.subf %57, %81 : vector<32x128xf32>
    %cst_38 = arith.constant 9.99999974E-6 : f32
    %83 = vector.broadcast %cst_38 : f32 to vector<1x128xf32>
    %84 = arith.addf %69, %83 : vector<1x128xf32>
    %85 = math.rsqrt %84 : vector<1x128xf32>
    %86 = vector.broadcast %85 : vector<1x128xf32> to vector<32x128xf32>
    %87 = arith.mulf %82, %86 : vector<32x128xf32>
    %88 = vector.broadcast %73 : vector<1x128xf32> to vector<32x128xf32>
    %89 = arith.subf %58, %88 : vector<32x128xf32>
    %cst_39 = arith.constant 9.99999974E-6 : f32
    %90 = vector.broadcast %cst_39 : f32 to vector<1x128xf32>
    %91 = arith.addf %80, %90 : vector<1x128xf32>
    %92 = math.rsqrt %91 : vector<1x128xf32>
    %93 = vector.broadcast %92 : vector<1x128xf32> to vector<32x128xf32>
    %94 = arith.mulf %89, %93 : vector<32x128xf32>
    %95 = tpu.concatenate %87, %94 in 0 : vector<32x128xf32>, vector<32x128xf32> -> vector<64x128xf32>
    %cst_40 = arith.constant 0.000000e+00 : f32
    %96 = vector.broadcast %cst_40 : f32 to vector<64x128xf32>
    %97 = arith.maximumf %95, %96 : vector<64x128xf32>
    %c1 = arith.constant 1 : index
    %c0_41 = arith.constant 0 : index
    %c0_42 = arith.constant 0 : index
    %98 = vector.load %arg6[%c1, %c0_41, %c0_42] : memref<2x8x128xbf16, #tpu.memory_space<vmem>>, vector<1x8x128xbf16>
    %99 = vector.shape_cast %98 : vector<1x8x128xbf16> to vector<8x128xbf16>
    %cst_43 = arith.constant dense<0.000000e+00> : vector<160x128xf32>
    %100 = tpu.matmul %27, %99, %cst_43 {dimension_numbers = #tpu.dot_dimension_numbers<[1], [0], [0], [1], [0, 0, 1, 1], [], []>} : vector<160x8xbf16>, vector<8x128xbf16>, vector<160x128xf32> -> vector<160x128xf32>
    %101 = arith.truncf %97 : vector<64x128xf32> to vector<64x128xbf16>
    %cst_44 = arith.constant dense<0.000000e+00> : vector<160x128xf32>
    %102 = tpu.matmul %6, %101, %cst_44 {dimension_numbers = #tpu.dot_dimension_numbers<[1], [0], [0], [1], [0, 0, 1, 1], [], []>} : vector<160x64xbf16>, vector<64x128xbf16>, vector<160x128xf32> -> vector<160x128xf32>
    %103 = arith.addf %102, %100 : vector<160x128xf32>
    %cst_45 = arith.constant 0.000000e+00 : f32
    %104 = vector.broadcast %cst_45 : f32 to vector<160x128xf32>
    %105 = arith.maximumf %103, %104 : vector<160x128xf32>
    %106 = arith.truncf %105 : vector<160x128xf32> to vector<160x128xbf16>
    %cst_46 = arith.constant dense<0.000000e+00> : vector<64x128xf32>
    %107 = tpu.matmul %13, %106, %cst_46 {dimension_numbers = #tpu.dot_dimension_numbers<[1], [0], [0], [1], [0, 0, 1, 1], [], []>} : vector<64x160xbf16>, vector<160x128xbf16>, vector<64x128xf32> -> vector<64x128xf32>
    %108 = arith.truncf %107 : vector<64x128xf32> to vector<64x128xbf16>
    %c1_47 = arith.constant 1 : index
    %c0_48 = arith.constant 0 : index
    %c0_49 = arith.constant 0 : index
    %109 = vector.load %arg7[%c1_47, %c0_48, %c0_49] : memref<2x128x256xbf16, #tpu.memory_space<vmem>>, vector<1x128x256xbf16>
    %110 = vector.shape_cast %109 : vector<1x128x256xbf16> to vector<128x256xbf16>
    %cst_50 = arith.constant dense<0.000000e+00> : vector<64x256xf32>
    %111 = tpu.matmul %108, %110, %cst_50 {dimension_numbers = #tpu.dot_dimension_numbers<[1], [0], [0], [1], [0, 0, 1, 1], [], []>} : vector<64x128xbf16>, vector<128x256xbf16>, vector<64x256xf32> -> vector<64x256xf32>
    %c1_51 = arith.constant 1 : index
    %c0_52 = arith.constant 0 : index
    %c0_53 = arith.constant 0 : index
    %112 = vector.load %arg8[%c1_51, %c0_52, %c0_53] : memref<2x1x256xf32, #tpu.memory_space<vmem>>, vector<1x1x256xf32>
    %113 = vector.shape_cast %112 : vector<1x1x256xf32> to vector<1x256xf32>
    %114 = vector.broadcast %113 : vector<1x256xf32> to vector<64x256xf32>
    %115 = arith.addf %111, %114 : vector<64x256xf32>
    %cst_54 = arith.constant 0.000000e+00 : f32
    %116 = vector.broadcast %cst_54 : f32 to vector<64x256xf32>
    %117 = arith.maximumf %115, %116 : vector<64x256xf32>
    %118 = arith.truncf %117 : vector<64x256xf32> to vector<64x256xbf16>
    %c1_55 = arith.constant 1 : index
    %c0_56 = arith.constant 0 : index
    %c0_57 = arith.constant 0 : index
    %119 = vector.load %arg9[%c1_55, %c0_56, %c0_57] : memref<2x256x128xbf16, #tpu.memory_space<vmem>>, vector<1x256x128xbf16>
    %120 = vector.shape_cast %119 : vector<1x256x128xbf16> to vector<256x128xbf16>
    %cst_58 = arith.constant dense<0.000000e+00> : vector<64x128xf32>
    %121 = tpu.matmul %118, %120, %cst_58 {dimension_numbers = #tpu.dot_dimension_numbers<[1], [0], [0], [1], [0, 0, 1, 1], [], []>} : vector<64x256xbf16>, vector<256x128xbf16>, vector<64x128xf32> -> vector<64x128xf32>
    %c1_59 = arith.constant 1 : index
    %c0_60 = arith.constant 0 : index
    %c0_61 = arith.constant 0 : index
    %122 = vector.load %arg10[%c1_59, %c0_60, %c0_61] : memref<2x1x128xf32, #tpu.memory_space<vmem>>, vector<1x1x128xf32>
    %123 = vector.shape_cast %122 : vector<1x1x128xf32> to vector<1x128xf32>
    %124 = vector.broadcast %123 : vector<1x128xf32> to vector<64x128xf32>
    %125 = arith.addf %121, %124 : vector<64x128xf32>
    %126 = vector.extract_strided_slice %125 {offsets = [0, 0], sizes = [32, 128], strides = [1, 1]} : vector<64x128xf32> to vector<32x128xf32>
    %127 = vector.extract_strided_slice %125 {offsets = [32, 0], sizes = [32, 128], strides = [1, 1]} : vector<64x128xf32> to vector<32x128xf32>
    %cst_62 = arith.constant dense<0.000000e+00> : vector<128xf32>
    %128 = vector.multi_reduction <add>, %126, %cst_62 [0] : vector<32x128xf32> to vector<128xf32>
    %129 = vector.shape_cast %128 : vector<128xf32> to vector<1x128xf32>
    %cst_63 = arith.constant 3.200000e+01 : f32
    %130 = vector.broadcast %cst_63 : f32 to vector<1x128xf32>
    %131 = arith.divf %129, %130 : vector<1x128xf32>
    %132 = vector.broadcast %131 : vector<1x128xf32> to vector<32x128xf32>
    %133 = arith.subf %126, %132 : vector<32x128xf32>
    %134 = arith.mulf %133, %133 : vector<32x128xf32>
    %cst_64 = arith.constant dense<0.000000e+00> : vector<128xf32>
    %135 = vector.multi_reduction <add>, %134, %cst_64 [0] : vector<32x128xf32> to vector<128xf32>
    %136 = vector.shape_cast %135 : vector<128xf32> to vector<1x128xf32>
    %cst_65 = arith.constant 3.200000e+01 : f32
    %137 = vector.broadcast %cst_65 : f32 to vector<1x128xf32>
    %138 = arith.divf %136, %137 : vector<1x128xf32>
    %cst_66 = arith.constant dense<0.000000e+00> : vector<128xf32>
    %139 = vector.multi_reduction <add>, %127, %cst_66 [0] : vector<32x128xf32> to vector<128xf32>
    %140 = vector.shape_cast %139 : vector<128xf32> to vector<1x128xf32>
    %cst_67 = arith.constant 3.200000e+01 : f32
    %141 = vector.broadcast %cst_67 : f32 to vector<1x128xf32>
    %142 = arith.divf %140, %141 : vector<1x128xf32>
    %143 = vector.broadcast %142 : vector<1x128xf32> to vector<32x128xf32>
    %144 = arith.subf %127, %143 : vector<32x128xf32>
    %145 = arith.mulf %144, %144 : vector<32x128xf32>
    %cst_68 = arith.constant dense<0.000000e+00> : vector<128xf32>
    %146 = vector.multi_reduction <add>, %145, %cst_68 [0] : vector<32x128xf32> to vector<128xf32>
    %147 = vector.shape_cast %146 : vector<128xf32> to vector<1x128xf32>
    %cst_69 = arith.constant 3.200000e+01 : f32
    %148 = vector.broadcast %cst_69 : f32 to vector<1x128xf32>
    %149 = arith.divf %147, %148 : vector<1x128xf32>
    %150 = vector.broadcast %131 : vector<1x128xf32> to vector<32x128xf32>
    %151 = arith.subf %126, %150 : vector<32x128xf32>
    %cst_70 = arith.constant 9.99999974E-6 : f32
    %152 = vector.broadcast %cst_70 : f32 to vector<1x128xf32>
    %153 = arith.addf %138, %152 : vector<1x128xf32>
    %154 = math.rsqrt %153 : vector<1x128xf32>
    %155 = vector.broadcast %154 : vector<1x128xf32> to vector<32x128xf32>
    %156 = arith.mulf %151, %155 : vector<32x128xf32>
    %157 = vector.broadcast %142 : vector<1x128xf32> to vector<32x128xf32>
    %158 = arith.subf %127, %157 : vector<32x128xf32>
    %cst_71 = arith.constant 9.99999974E-6 : f32
    %159 = vector.broadcast %cst_71 : f32 to vector<1x128xf32>
    %160 = arith.addf %149, %159 : vector<1x128xf32>
    %161 = math.rsqrt %160 : vector<1x128xf32>
    %162 = vector.broadcast %161 : vector<1x128xf32> to vector<32x128xf32>
    %163 = arith.mulf %158, %162 : vector<32x128xf32>
    %164 = tpu.concatenate %156, %163 in 0 : vector<32x128xf32>, vector<32x128xf32> -> vector<64x128xf32>
    %cst_72 = arith.constant 0.000000e+00 : f32
    %165 = vector.broadcast %cst_72 : f32 to vector<64x128xf32>
    %166 = arith.maximumf %164, %165 : vector<64x128xf32>
    %167 = arith.truncf %166 : vector<64x128xf32> to vector<64x128xbf16>
    %cst_73 = arith.constant dense<0.000000e+00> : vector<8x128xf32>
    %168 = tpu.matmul %20, %167, %cst_73 {dimension_numbers = #tpu.dot_dimension_numbers<[1], [0], [0], [1], [0, 0, 1, 1], [], []>} : vector<8x64xbf16>, vector<64x128xbf16>, vector<8x128xf32> -> vector<8x128xf32>
    %c0_74 = arith.constant 0 : index
    %c0_75 = arith.constant 0 : index
    %169 = vector.load %arg5[%c0_74, %c0_75] : memref<8x1xf32, #tpu.memory_space<vmem>>, vector<8x1xf32>
    %170 = vector.broadcast %169 : vector<8x1xf32> to vector<8x128xf32>
    %171 = arith.mulf %168, %170 : vector<8x128xf32>
    %172 = arith.truncf %171 : vector<8x128xf32> to vector<8x128xbf16>
    %c0_76 = arith.constant 0 : index
    %c0_77 = arith.constant 0 : index
    %173 = vector.load %arg11[%c0_76, %c0_77] : memref<128x256xbf16, #tpu.memory_space<vmem>>, vector<128x256xbf16>
    %cst_78 = arith.constant dense<0.000000e+00> : vector<8x256xf32>
    %174 = tpu.matmul %172, %173, %cst_78 {dimension_numbers = #tpu.dot_dimension_numbers<[1], [0], [0], [1], [0, 0, 1, 1], [], []>} : vector<8x128xbf16>, vector<128x256xbf16>, vector<8x256xf32> -> vector<8x256xf32>
    %c0_79 = arith.constant 0 : index
    %c0_80 = arith.constant 0 : index
    %175 = vector.load %arg12[%c0_79, %c0_80] : memref<1x256xf32, #tpu.memory_space<vmem>>, vector<1x256xf32>
    %176 = vector.broadcast %175 : vector<1x256xf32> to vector<8x256xf32>
    %177 = arith.addf %174, %176 : vector<8x256xf32>
    %cst_81 = arith.constant 0.000000e+00 : f32
    %178 = vector.broadcast %cst_81 : f32 to vector<8x256xf32>
    %179 = arith.maximumf %177, %178 : vector<8x256xf32>
    %180 = arith.truncf %179 : vector<8x256xf32> to vector<8x256xbf16>
    %c0_82 = arith.constant 0 : index
    %c0_83 = arith.constant 0 : index
    %181 = vector.load %arg13[%c0_82, %c0_83] : memref<256x128xbf16, #tpu.memory_space<vmem>>, vector<256x128xbf16>
    %cst_84 = arith.constant dense<0.000000e+00> : vector<8x128xf32>
    %182 = tpu.matmul %180, %181, %cst_84 {dimension_numbers = #tpu.dot_dimension_numbers<[1], [0], [0], [1], [0, 0, 1, 1], [], []>} : vector<8x256xbf16>, vector<256x128xbf16>, vector<8x128xf32> -> vector<8x128xf32>
    %c0_85 = arith.constant 0 : index
    %c0_86 = arith.constant 0 : index
    %183 = vector.load %arg14[%c0_85, %c0_86] : memref<1x128xf32, #tpu.memory_space<vmem>>, vector<1x128xf32>
    %184 = vector.broadcast %183 : vector<1x128xf32> to vector<8x128xf32>
    %185 = arith.addf %182, %184 : vector<8x128xf32>
    %186 = vector.extract_strided_slice %185 {offsets = [0, 0], sizes = [4, 128], strides = [1, 1]} : vector<8x128xf32> to vector<4x128xf32>
    %187 = vector.extract_strided_slice %185 {offsets = [4, 0], sizes = [4, 128], strides = [1, 1]} : vector<8x128xf32> to vector<4x128xf32>
    %188 = tpu.concatenate %186, %187 in 1 : vector<4x128xf32>, vector<4x128xf32> -> vector<4x256xf32>
    %189 = arith.truncf %188 : vector<4x256xf32> to vector<4x256xbf16>
    %c0_87 = arith.constant 0 : index
    %c0_88 = arith.constant 0 : index
    %190 = vector.load %arg15[%c0_87, %c0_88] : memref<256x256xbf16, #tpu.memory_space<vmem>>, vector<256x256xbf16>
    %cst_89 = arith.constant dense<0.000000e+00> : vector<4x256xf32>
    %191 = tpu.matmul %189, %190, %cst_89 {dimension_numbers = #tpu.dot_dimension_numbers<[1], [0], [0], [1], [0, 0, 1, 1], [], []>} : vector<4x256xbf16>, vector<256x256xbf16>, vector<4x256xf32> -> vector<4x256xf32>
    %c0_90 = arith.constant 0 : index
    %c0_91 = arith.constant 0 : index
    %192 = vector.load %arg16[%c0_90, %c0_91] : memref<1x256xf32, #tpu.memory_space<vmem>>, vector<1x256xf32>
    %193 = vector.broadcast %192 : vector<1x256xf32> to vector<4x256xf32>
    %194 = arith.addf %191, %193 : vector<4x256xf32>
    %cst_92 = arith.constant 0.000000e+00 : f32
    %195 = vector.broadcast %cst_92 : f32 to vector<4x256xf32>
    %196 = arith.cmpf ogt, %194, %195 : vector<4x256xf32>
    %cst_93 = arith.constant 0.00999999977 : f32
    %197 = vector.broadcast %cst_93 : f32 to vector<4x256xf32>
    %198 = arith.mulf %197, %194 : vector<4x256xf32>
    %199 = arith.select %196, %194, %198 : vector<4x256xi1>, vector<4x256xf32>
    %200 = arith.truncf %199 : vector<4x256xf32> to vector<4x256xbf16>
    %c0_94 = arith.constant 0 : index
    %c0_95 = arith.constant 0 : index
    %201 = vector.load %arg17[%c0_94, %c0_95] : memref<256x128xbf16, #tpu.memory_space<vmem>>, vector<256x128xbf16>
    %cst_96 = arith.constant dense<0.000000e+00> : vector<4x128xf32>
    %202 = tpu.matmul %200, %201, %cst_96 {dimension_numbers = #tpu.dot_dimension_numbers<[1], [0], [0], [1], [0, 0, 1, 1], [], []>} : vector<4x256xbf16>, vector<256x128xbf16>, vector<4x128xf32> -> vector<4x128xf32>
    %c0_97 = arith.constant 0 : index
    %c0_98 = arith.constant 0 : index
    %203 = vector.load %arg18[%c0_97, %c0_98] : memref<1x128xf32, #tpu.memory_space<vmem>>, vector<1x128xf32>
    %204 = vector.broadcast %203 : vector<1x128xf32> to vector<4x128xf32>
    %205 = arith.addf %202, %204 : vector<4x128xf32>
    %cst_99 = arith.constant 0.000000e+00 : f32
    %206 = vector.broadcast %cst_99 : f32 to vector<4x128xf32>
    %207 = arith.cmpf ogt, %205, %206 : vector<4x128xf32>
    %cst_100 = arith.constant 0.00999999977 : f32
    %208 = vector.broadcast %cst_100 : f32 to vector<4x128xf32>
    %209 = arith.mulf %208, %205 : vector<4x128xf32>
    %210 = arith.select %207, %205, %209 : vector<4x128xi1>, vector<4x128xf32>
    %211 = arith.truncf %210 : vector<4x128xf32> to vector<4x128xbf16>
    %c0_101 = arith.constant 0 : index
    %c0_102 = arith.constant 0 : index
    %212 = vector.load %arg19[%c0_101, %c0_102] : memref<128x128xbf16, #tpu.memory_space<vmem>>, vector<128x128xbf16>
    %cst_103 = arith.constant dense<0.000000e+00> : vector<4x128xf32>
    %213 = tpu.matmul %211, %212, %cst_103 {dimension_numbers = #tpu.dot_dimension_numbers<[1], [0], [0], [1], [0, 0, 1, 1], [], []>} : vector<4x128xbf16>, vector<128x128xbf16>, vector<4x128xf32> -> vector<4x128xf32>
    %c0_104 = arith.constant 0 : index
    %c0_105 = arith.constant 0 : index
    %214 = vector.load %arg20[%c0_104, %c0_105] : memref<1x128xf32, #tpu.memory_space<vmem>>, vector<1x128xf32>
    %215 = vector.broadcast %214 : vector<1x128xf32> to vector<4x128xf32>
    %216 = arith.addf %213, %215 : vector<4x128xf32>
    %cst_106 = arith.constant 0.000000e+00 : f32
    %217 = vector.broadcast %cst_106 : f32 to vector<4x128xf32>
    %218 = arith.cmpf ogt, %216, %217 : vector<4x128xf32>
    %cst_107 = arith.constant 0.00999999977 : f32
    %219 = vector.broadcast %cst_107 : f32 to vector<4x128xf32>
    %220 = arith.mulf %219, %216 : vector<4x128xf32>
    %221 = arith.select %218, %216, %220 : vector<4x128xi1>, vector<4x128xf32>
    %222 = arith.truncf %221 : vector<4x128xf32> to vector<4x128xbf16>
    %c0_108 = arith.constant 0 : index
    %c0_109 = arith.constant 0 : index
    %223 = vector.load %arg21[%c0_108, %c0_109] : memref<128x1xbf16, #tpu.memory_space<vmem>>, vector<128x1xbf16>
    %cst_110 = arith.constant dense<0.000000e+00> : vector<4x1xf32>
    %224 = tpu.matmul %222, %223, %cst_110 {dimension_numbers = #tpu.dot_dimension_numbers<[1], [0], [0], [1], [0, 0, 1, 1], [], []>} : vector<4x128xbf16>, vector<128x1xbf16>, vector<4x1xf32> -> vector<4x1xf32>
    %c0_111 = arith.constant 0 : index
    %c0_112 = arith.constant 0 : index
    %225 = vector.load %arg22[%c0_111, %c0_112] : memref<1x1xf32, #tpu.memory_space<vmem>>, vector<1x1xf32>
    %226 = vector.broadcast %225 : vector<1x1xf32> to vector<4x1xf32>
    %227 = arith.addf %224, %226 : vector<4x1xf32>
    %c0_113 = arith.constant 0 : index
    %c0_114 = arith.constant 0 : index
    %228 = vector.load %arg23[%c0_113, %c0_114] : memref<4x1xf32, #tpu.memory_space<vmem>>, vector<4x1xf32>
    tpu.vector_store %arg23[%c0_113, %c0_114], %227 {strides = array<i32>} : memref<4x1xf32, #tpu.memory_space<vmem>>, vector<4x1xf32>,
    return
  }
}

</mosaic_0001>

<bundles_post_ra>
// kernel: tpu_custom_call.1
= control target key start
LH: loop header
LB: loop body
LE: loop exit
PB: predicated region body
PF: predicated region fallthrough
CT: control target
= control target key end

     0   :  { %s5279_s0 = inlined_call_operand.hbm [shape: f32[64,128], index: 0, kind: input, shape index: {}]   ;;  %s5280_s1 = inlined_call_operand.vmem [shape: s32[160,1], index: 1, kind: input, shape index: {}]   ;;  %s5281_s2 = inlined_call_operand.vmem [shape: s32[1,160], index: 2, kind: input, shape index: {}]   ;;  %s5282_s3 = inlined_call_operand.vmem [shape: s32[1,64], index: 3, kind: input, shape index: {}]   ;;  %s5283_s4 = inlined_call_operand.vmem [shape: s32[160,1], index: 4, kind: input, shape index: {}]   ;;  %s5284_s5 = inlined_call_operand.vmem [shape: f32[8,1], index: 5, kind: input, shape index: {}]   ;;  %s5285_s6 = inlined_call_operand.vmem [shape: bf16[2,8,128], index: 6, kind: input, shape index: {}]   ;;  %s5286_s7 = inlined_call_operand.vmem [shape: bf16[2,128,256], index: 7, kind: input, shape index: {}]   ;;  %s5287_s8 = inlined_call_operand.vmem [shape: f32[2,1,256], index: 8, kind: input, shape index: {}]   ;;  %s5288_s9 = inlined_call_operand.hbm [shape: bf16[2,256,128], index: 9, kind: input, shape index: {}]   ;;  %s5289_s10 = inlined_call_operand.vmem [shape: f32[2,1,128], index: 10, kind: input, shape index: {}]   ;;  %s5290_s11 = inlined_call_operand.vmem [shape: bf16[128,256], index: 11, kind: input, shape index: {}]   ;;  %s5291_s12 = inlined_call_operand.vmem [shape: f32[1,256], index: 12, kind: input, shape index: {}]   ;;  %s5292_s13 = inlined_call_operand.hbm [shape: bf16[256,128], index: 13, kind: input, shape index: {}]   ;;  %s5293_s14 = inlined_call_operand.vmem [shape: f32[1,128], index: 14, kind: input, shape index: {}]   ;;  %s5294_s15 = inlined_call_operand.hbm [shape: bf16[256,256], index: 15, kind: input, shape index: {}]   ;;  %s5295_s16 = inlined_call_operand.vmem [shape: f32[1,256], index: 16, kind: input, shape index: {}]   ;;  %s5296_s17 = inlined_call_operand.hbm [shape: bf16[256,128], index: 17, kind: input, shape index: {}]   ;;  %s5297_s18 = inlined_call_operand.vmem [shape: f32[1,128], index: 18, kind: input, shape index: {}]   ;;  %s5298_s19 = inlined_call_operand.hbm [shape: bf16[128,128], index: 19, kind: input, shape index: {}]   ;;  %s5299_s20 = inlined_call_operand.vmem [shape: f32[1,128], index: 20, kind: input, shape index: {}]   ;;  %s5300_s21 = inlined_call_operand.vmem [shape: bf16[128,1], index: 21, kind: input, shape index: {}]   ;;  %s5301_s22 = inlined_call_operand.<no memory space> [shape: f32[1,1], index: 22, kind: input, shape index: {}]   ;;  %s5302_s23 = inlined_call_operand.vmem [shape: f32[4,1], index: 23, kind: output, shape index: {}]  }
   0x1   :  { %5321 = sst [smem:[#allocation27_spill]] %s5279_s0  ;;  %v28_v0 = vstv %s5301_s22 }
   0x2   :  { %5322 = sst [smem:[#allocation28_spill]] %s5280_s1  ;;  %29 = vst [vmem:[#allocation2] sm:$0x1] %v28_v0 }
   0x3   :  { %5323 = sst [smem:[#allocation29_spill]] %s5281_s2 }
   0x4   :  { %5324 = sst [smem:[#allocation30_spill]] %s5282_s3 }
   0x5   :  { %5325 = sst [smem:[#allocation31_spill]] %s5283_s4 }
   0x6   :  { %5326 = sst [smem:[#allocation32_spill]] %s5284_s5 }
   0x7   :  { %5327 = sst [smem:[#allocation33_spill]] %s5285_s6 }
   0x8   :  { %5328 = sst [smem:[#allocation34_spill]] %s5286_s7 }
   0x9   :  { %30 = vsyncpa [#allocation4], 0 }
   0xa   :  { %31 = vsyncpa [#allocation6], 0 }
   0xb   :  { %32 = vsyncpa [#allocation9], 0 }
   0xc   :  { %33 = vsyncpa [#allocation12], 0  ;;  %s4329_s24 = smov [#allocation5]  }
   0xd   :  { %s67_s25 = sshll.u32 %s4329_s24, 4  ;;  %s68_s25 = int_to_ptr.vmem [resolvable:$true] %s67_s25 }
   0xe   :  { %s4209_s5 = scalar_lea.vmem %s68_s25, 4096  ;;  %p4214_p1 = scmp.lt.s32.totalorder %s68_s25, %s68_s25 }
   0xf   :  { %p4210_p0 = scmp.ne.s32.totalorder %s68_s25, %s4209_s5  ;;  %p4215_p2 = scmp.lt.s32.totalorder %s4209_s5, %s4209_s5 }
  0x11   :  { %p4216_p3 = por %p4215_p2, %p4214_p1 }
  0x13   :  { %p4217_p4 = pnand %p4216_p3, %p4210_p0 }
  0x15   :  { %4220 = shalt.err (!%p4217_p4)
}
  0x16   :  { %s4330_s1 = smov 64   ;;  %s4331_s26 = smov 4  }
  0x17   :  { %73 = dma.hbm_to_vmem [thread:$0]  %s5288_s9, 4096, %s68_s25, [#allocation6], %s4330_s1, %s4330_s1, %s4331_s26  }
  0x18   :  { %s4332_s6 = smov [#allocation8]   ;;  %s4333_s7 = smov [#allocation3]  }
  0x19   :  { %s99_s27 = sshll.u32 %s4332_s6, 4  ;;  %s39_s28 = sshll.u32 %s4333_s7, 4  ;;  %s100_s27 = int_to_ptr.vmem [resolvable:$true] %s99_s27  ;;  %s40_s28 = int_to_ptr.vmem [resolvable:$true] %s39_s28 }
  0x1a   :  { %s4229_s29 = scalar_lea.vmem %s100_s27, 4096  ;;  %p4234_p6 = scmp.lt.s32.totalorder %s100_s27, %s100_s27 }
  0x1b   :  { %p4230_p5 = scmp.ne.s32.totalorder %s100_s27, %s4229_s29  ;;  %p4235_p7 = scmp.lt.s32.totalorder %s4229_s29, %s4229_s29 }
  0x1d   :  { %p4236_p8 = por %p4235_p7, %p4234_p6 }
  0x1f   :  { %p4237_p9 = pnand %p4236_p8, %p4230_p5 }
  0x21   :  { %4240 = shalt.err (!%p4237_p9)
}
  0x22   :  { %s4334_s3 = smov 128   ;;  %s4335_s0 = smov 8  }
  0x23   :  { %105 = dma.hbm_to_vmem [thread:$0]  %s5294_s15, 4096, %s100_s27, [#allocation9], %s4334_s3, %s4334_s3, %s4335_s0  }
  0x24   :  { %s4249_s9 = scalar_lea.vmem %s40_s28, 1024  ;;  %p4254_p11 = scmp.lt.s32.totalorder %s40_s28, %s40_s28 }
  0x25   :  { %p4250_p10 = scmp.ne.s32.totalorder %s40_s28, %s4249_s9  ;;  %p4255_p12 = scmp.lt.s32.totalorder %s4249_s9, %s4249_s9 }
  0x27   :  { %p4256_p13 = por %p4255_p12, %p4254_p11 }
  0x29   :  { %p4257_p0 = pnand %p4256_p13, %p4250_p10 }
  0x2b   :  { %4260 = shalt.err (!%p4257_p0)
}
  0x2c   :  { %s5329_s5 = sld [smem:[#allocation27_spill]]  ;;  %s4336_s22 = smov [#allocation7]  }
  0x2d   :  { %s85_s2 = sshll.u32 %s4336_s22, 4  ;;  %s4337_s6 = smov [#allocation10]   ;;  %s86_s2 = int_to_ptr.vmem [resolvable:$true] %s85_s2 }
  0x2e   :  { %s113_s7 = sshll.u32 %s4337_s6, 4  ;;  %s4269_s29 = scalar_lea.vmem %s86_s2, 2048  ;;  %s114_s7 = int_to_ptr.vmem [resolvable:$true] %s113_s7 }
  0x2f   :  { %p4270_p1 = scmp.ne.s32.totalorder %s86_s2, %s4269_s29  ;;  %p4274_p2 = scmp.lt.s32.totalorder %s86_s2, %s86_s2 }
  0x30   :  { %p4275_p3 = scmp.lt.s32.totalorder %s4269_s29, %s4269_s29 }
  0x32   :  { %45 = dma.hbm_to_vmem [thread:$0]  %s5329_s5, 1024, %s40_s28, [#allocation4], %s4334_s3, %s4334_s3, %s4335_s0  }
  0x33   :  { %p4276_p4 = por %p4275_p3, %p4274_p2 }
  0x35   :  { %p4277_p5 = pnand %p4276_p4, %p4270_p1 }
  0x37   :  { %4280 = shalt.err (!%p4277_p5)
}
  0x38   :  { %91 = dma.hbm_to_vmem [thread:$0]  %s5292_s13, 2048, %s86_s2, [#allocation6], %s4330_s1, %s4330_s1, %s4331_s26  }
  0x39   :  { %s4289_s28 = scalar_lea.vmem %s114_s7, 2048  ;;  %p4294_p7 = scmp.lt.s32.totalorder %s114_s7, %s114_s7 }
  0x3a   :  { %p4290_p6 = scmp.ne.s32.totalorder %s114_s7, %s4289_s28  ;;  %p4295_p8 = scmp.lt.s32.totalorder %s4289_s28, %s4289_s28 }
  0x3c   :  { %p4296_p9 = por %p4295_p8, %p4294_p7 }
  0x3e   :  { %p4297_p10 = pnand %p4296_p9, %p4290_p6 }
  0x40   :  { %4300 = shalt.err (!%p4297_p10)
}
  0x41   :  { %119 = dma.hbm_to_vmem [thread:$0]  %s5296_s17, 2048, %s114_s7, [#allocation9], %s4330_s1, %s4330_s1, %s4331_s26  }
  0x42   :  { %s4338_s4 = smov [#allocation11]  }
  0x43   :  { %s127_s30 = sshll.u32 %s4338_s4, 4  ;;  %s128_s30 = int_to_ptr.vmem [resolvable:$true] %s127_s30 }
  0x44   :  { %s4309_s9 = scalar_lea.vmem %s128_s30, 1024  ;;  %p4314_p12 = scmp.lt.s32.totalorder %s128_s30, %s128_s30 }
  0x45   :  { %p4310_p11 = scmp.ne.s32.totalorder %s128_s30, %s4309_s9  ;;  %p4315_p13 = scmp.lt.s32.totalorder %s4309_s9, %s4309_s9 }
  0x47   :  { %p4316_p0 = por %p4315_p13, %p4314_p12 }
  0x49   :  { %p4317_p1 = pnand %p4316_p0, %p4310_p11 }
  0x4b   :  { %4320 = shalt.err (!%p4317_p1)
}
  0x4c   :  { %133 = dma.hbm_to_vmem [thread:$0]  %s5298_s19, 1024, %s128_s30, [#allocation12], %s4330_s1, %s4330_s1, %s4331_s26  }
  0x4d   :  { %4321 = dma.done.wait [#allocation4], 1024  }
  0x4e   :  { %4322 = vsyncadd [#allocation4], 4294966272 }
  0x4f   :  { %4323 = dma.done.wait [#allocation6], 6144  }
  0x50   :  { %4324 = vsyncadd [#allocation6], 4294961152 }
  0x51   :  { %4325 = dma.done.wait [#allocation9], 6144  }
  0x52   :  { %4326 = vsyncadd [#allocation9], 4294961152 }
  0x53   :  { %4327 = dma.done.wait [#allocation12], 1024  }
  0x54   :  { %4328 = vsyncadd [#allocation12], 4294966272  ;;  %v5309_v1 = vmov 0   ;;  %s5330_s5 = sld [smem:[#allocation31_spill]]  ;;  %v550_v12 = vld [vmem:[#allocation3 + $0x30] sm:$0xff]  ;;  %v551_v13 = vld [vmem:[#allocation3 + $0x38] sm:$0xff]  ;;  %v159_v57 = vlaneseq }
  0x55   :  { %3992 = vset.pattern.permute.xlu1 %v5309_v1  ;;  %3991 = vset.pattern.permute.xlu0 %v5309_v1  ;;  %s5331_s19 = sld [smem:[#allocation28_spill]]  ;;  %v548_v14 = vld [vmem:[#allocation3 + $0x20] sm:$0xff]  ;;  %v549_v15 = vld [vmem:[#allocation3 + $0x28] sm:$0xff]  ;;  %vm584_vm0 = vcmask 1043456   ;;  %v704_v16 = vpack.c.bf16 %v551_v13, %v550_v12  ;;  %v546_v17 = vld [vmem:[#allocation3 + $0x10] sm:$0xff]  ;;  %vm553_vm5 = vcmask 64512  }
  0x56   :  { %v703_v20 = vpack.c.bf16 %v549_v15, %v548_v14  ;;  %v547_v21 = vld [vmem:[#allocation3 + $0x18] sm:$0xff]  ;;  %s5332_s7 = sld [smem:[#allocation33_spill]]  ;;  %v544_v24 = vld [vmem:[#allocation3] sm:$0xff]  ;;  %v545_v25 = vld [vmem:[#allocation3 + $0x8] sm:$0xff]  ;;  %v4628_v58 = vand.u32 127, %v159_v57  ;;  %vm705_vm6 = vcmask 523264  }
  0x57   :  { %3845 = vmatprep.subr.bf16.mxu1 %v704_v16  ;;  %v702_v28 = vpack.c.bf16 %v547_v21, %v546_v17  ;;  %v701_v31 = vpack.c.bf16 %v545_v25, %v544_v24  ;;  %s5333_s3 = sld [smem:[#allocation32_spill]]  ;;  %v5307_v63 = vmov 0.0  }
  0x58   :  { %3846 = vmatpush3.bf16.msra.mxu1 %v704_v16  ;;  %s5344_s0 = sld [smem:[#allocation29_spill]] }
  0x59   :  { %3847 = vmatprep.subr.bf16.mxu1 %v703_v20  ;;  %s5347_s9 = sld [smem:[#allocation34_spill]] }
  0x5a   :  { %v394_v2 = vld [vmem:[%s5330_s5] sm:$0xff]  ;;  %v395_v4 = vld [vmem:[%s5330_s5 + $0x8] sm:$0xff]  ;;  %v397_v8 = vld [vmem:[%s5330_s5 + $0x18] sm:$0xff]  ;;  %s5366_s4 = sld [smem:[#allocation30_spill]] }
  0x5b   :  { %v161_v3 = vld [vmem:[%s5331_s19] sm:$0xff]  ;;  %415 = vperm.xlu1 %3992, %v394_v2   ;;  %v162_v5 = vld [vmem:[%s5331_s19 + $0x8] sm:$0xff]  ;;  %v164_v6 = vld [vmem:[%s5331_s19 + $0x18] sm:$0xff] }
  0x5c   :  { %182 = vperm.xlu0 %3991, %v161_v3   ;;  %v163_v7 = vld [vmem:[%s5331_s19 + $0x10] sm:$0xff]  ;;  %v166_v10 = vld [vmem:[%s5331_s19 + $0x28] sm:$0xff]  ;;  %v165_v11 = vld [vmem:[%s5331_s19 + $0x20] sm:$0xff]  ;;  %3848 = vmatpush3.bf16.msra.mxu1 %v703_v20 }
  0x5d   :  { %v396_v9 = vld [vmem:[%s5330_s5 + $0x10] sm:$0xff]  ;;  %v399_v18 = vld [vmem:[%s5330_s5 + $0x28] sm:$0xff]  ;;  %v398_v19 = vld [vmem:[%s5330_s5 + $0x20] sm:$0xff]  ;;  %3849 = vmatprep.subr.bf16.mxu1 %v702_v28 }
  0x5e   :  { %v552_v22 = vld [vmem:[%s5332_s7] sm:$0xf]  ;;  %v168_v26 = vld [vmem:[%s5331_s19 + $0x38] sm:$0xff]  ;;  %v167_v27 = vld [vmem:[%s5331_s19 + $0x30] sm:$0xff] }
  0x5f   :  { %418 = vperm.xlu1 %3992, %v395_v4   ;;  %v586_v23 = vsel %vm584_vm0, %v552_v22, 0  ;;  %3975 = vmatprep.subr.msk.bf16.mxu0 %vm584_vm0, %v552_v22  ;;  %v401_v29 = vld [vmem:[%s5330_s5 + $0x38] sm:$0xff]  ;;  %v400_v30 = vld [vmem:[%s5330_s5 + $0x30] sm:$0xff]  ;;  %v170_v32 = vld [vmem:[%s5331_s19 + $0x48] sm:$0xff] }
  0x60   :  { %185 = vperm.xlu0 %3991, %v162_v5   ;;  %3824 = vmatpush3.bf16.msra.mxu0 %v586_v23  ;;  %v169_v33 = vld [vmem:[%s5331_s19 + $0x40] sm:$0xff]  ;;  %v403_v34 = vld [vmem:[%s5330_s5 + $0x48] sm:$0xff]  ;;  %v172_v36 = vld [vmem:[%s5331_s19 + $0x58] sm:$0xff] }
  0x61   :  { %892 = vmatprep.subr.bf16.mxu0 %v5309_v1  ;;  %3850 = vmatpush3.bf16.msra.mxu1 %v702_v28  ;;  %v402_v35 = vld [vmem:[%s5330_s5 + $0x40] sm:$0xff]  ;;  %v171_v37 = vld [vmem:[%s5331_s19 + $0x50] sm:$0xff]  ;;  %v405_v38 = vld [vmem:[%s5330_s5 + $0x58] sm:$0xff] }
  0x62   :  { %3851 = vmatprep.subr.bf16.mxu1 %v701_v31  ;;  %v404_v39 = vld [vmem:[%s5330_s5 + $0x50] sm:$0xff]  ;;  %v174_v40 = vld [vmem:[%s5331_s19 + $0x68] sm:$0xff]  ;;  %v173_v41 = vld [vmem:[%s5331_s19 + $0x60] sm:$0xff] }
  0x63   :  { %191 = vperm.xlu1 %3992, %v164_v6   ;;  %v407_v42 = vld [vmem:[%s5330_s5 + $0x68] sm:$0xff]  ;;  %v406_v43 = vld [vmem:[%s5330_s5 + $0x60] sm:$0xff]  ;;  %v176_v44 = vld [vmem:[%s5331_s19 + $0x78] sm:$0xff] }
  0x64   :  { %188 = vperm.xlu0 %3991, %v163_v7   ;;  %v175_v45 = vld [vmem:[%s5331_s19 + $0x70] sm:$0xff]  ;;  %v409_v46 = vld [vmem:[%s5330_s5 + $0x78] sm:$0xff]  ;;  %v178_v48 = vld [vmem:[%s5331_s19 + $0x88] sm:$0xff] }
  0x65   :  { %3852 = vmatpush3.bf16.msra.mxu1 %v701_v31  ;;  %v408_v47 = vld [vmem:[%s5330_s5 + $0x70] sm:$0xff]  ;;  %v177_v49 = vld [vmem:[%s5331_s19 + $0x80] sm:$0xff]  ;;  %v411_v50 = vld [vmem:[%s5330_s5 + $0x88] sm:$0xff] }
  0x66   :  { %v410_v51 = vld [vmem:[%s5330_s5 + $0x80] sm:$0xff]  ;;  %v180_v52 = vld [vmem:[%s5331_s19 + $0x98] sm:$0xff]  ;;  %v179_v53 = vld [vmem:[%s5331_s19 + $0x90] sm:$0xff] }
  0x67   :  { %424 = vperm.xlu1 %3992, %v397_v8   ;;  %v413_v54 = vld [vmem:[%s5330_s5 + $0x98] sm:$0xff]  ;;  %v412_v55 = vld [vmem:[%s5330_s5 + $0x90] sm:$0xff]  ;;  %v2309_v56 = vld [vmem:[%s5333_s3] sm:$0xff] }
  0x68   :  { %421 = vperm.xlu0 %3991, %v396_v9  }
  0x6b   :  { %197 = vperm.xlu1 %3992, %v166_v10  }
  0x6c   :  { %194 = vperm.xlu0 %3991, %v165_v11  }
  0x6f   :  { %430 = vperm.xlu1 %3992, %v399_v18  }
  0x70   :  { %427 = vperm.xlu0 %3991, %v398_v19  }
  0x73   :  { %203 = vperm.xlu1 %3992, %v168_v26  }
  0x74   :  { %200 = vperm.xlu0 %3991, %v167_v27  }
  0x77   :  { %436 = vperm.xlu1 %3992, %v401_v29  }
  0x78   :  { %433 = vperm.xlu0 %3991, %v400_v30  }
  0x7b   :  { %209 = vperm.xlu1 %3992, %v170_v32  }
  0x7c   :  { %206 = vperm.xlu0 %3991, %v169_v33  }
  0x7f   :  { %442 = vperm.xlu1 %3992, %v403_v34  }
  0x80   :  { %439 = vperm.xlu0 %3991, %v402_v35  }
  0x83   :  { %215 = vperm.xlu1 %3992, %v172_v36  }
  0x84   :  { %212 = vperm.xlu0 %3991, %v171_v37  }
  0x87   :  { %448 = vperm.xlu1 %3992, %v405_v38  }
  0x88   :  { %445 = vperm.xlu0 %3991, %v404_v39  }
  0x8b   :  { %221 = vperm.xlu1 %3992, %v174_v40  }
  0x8c   :  { %218 = vperm.xlu0 %3991, %v173_v41  }
  0x8f   :  { %454 = vperm.xlu1 %3992, %v407_v42  }
  0x90   :  { %451 = vperm.xlu0 %3991, %v406_v43  }
  0x93   :  { %227 = vperm.xlu1 %3992, %v176_v44  }
  0x94   :  { %224 = vperm.xlu0 %3991, %v175_v45  }
  0x97   :  { %460 = vperm.xlu1 %3992, %v409_v46  }
  0x98   :  { %457 = vperm.xlu0 %3991, %v408_v47  }
  0x9b   :  { %233 = vperm.xlu1 %3992, %v178_v48  }
  0x9c   :  { %230 = vperm.xlu0 %3991, %v177_v49  }
  0x9f   :  { %466 = vperm.xlu1 %3992, %v411_v50  }
  0xa0   :  { %463 = vperm.xlu0 %3991, %v410_v51  }
  0xa3   :  { %239 = vperm.xlu1 %3992, %v180_v52  }
  0xa4   :  { %236 = vperm.xlu0 %3991, %v179_v53  }
  0xa7   :  { %472 = vperm.xlu1 %3992, %v413_v54  }
  0xa8   :  { %469 = vperm.xlu0 %3991, %v412_v55  }
  0xac   :  { %2312 = vperm.xlu0 %3991, %v2309_v56  }
  0xd6   :  { %v416_v59 = vpop.permute.xlu1 %415 }
  0xd7   :  { %v183_v60 = vpop.permute.xlu0 %182  ;;  %vm474_vm1 = vcmp.eq.s32.totalorder %v4628_v58, %v416_v59 }
  0xd8   :  { %vm241_vm2 = vcmp.eq.s32.totalorder %v4628_v58, %v183_v60  ;;  %v3356_v0 = vsel %vm474_vm1, 1.0, %v5307_v63 }
  0xd9   :  { %v3318_v2 = vsel %vm241_vm2, 1.0, %v5307_v63 }
  0xda   :  { %v419_v61 = vpop.permute.xlu1 %418 }
  0xdb   :  { %v186_v62 = vpop.permute.xlu0 %185  ;;  %vm475_vm3 = vcmp.eq.s32.totalorder %v4628_v58, %v419_v61 }
  0xdc   :  { %vm242_vm4 = vcmp.eq.s32.totalorder %v4628_v58, %v186_v62  ;;  %v3357_v3 = vsel %vm475_vm3, 1.0, %v5307_v63 }
  0xdd   :  { %v3319_v4 = vsel %vm242_vm4, 1.0, %v5307_v63  ;;  %v4638_v5 = vpack.c.bf16 %v3357_v3, %v3356_v0 }
  0xde   :  { %v4640_v6 = vpack.c.bf16 %v3319_v4, %v3318_v2  ;;  %v192_v7 = vpop.permute.xlu1 %191 }
  0xdf   :  { %v189_v8 = vpop.permute.xlu0 %188  ;;  %vm244_vm7 = vcmp.eq.s32.totalorder %v4628_v58, %v192_v7  ;;  %3825 = vmatprep.mubr.msk.bf16.mxu0 %vm553_vm5, %v4638_v5 }
  0xe0   :  { %5334 = vst [vmem:[#allocation17_spill] sm:$0xff] %v4640_v6  ;;  %vm243_vm8 = vcmp.eq.s32.totalorder %v4628_v58, %v189_v8  ;;  %3853 = vmatprep.mubr.msk.bf16.mxu1 %vm705_vm6, %v4640_v6  ;;  %v3321_v9 = vsel %vm244_vm7, 1.0, %v5307_v63 }
  0xe1   :  { %v3320_v10 = vsel %vm243_vm8, 1.0, %v5307_v63 }
  0xe2   :  { %v4650_v11 = vpack.c.bf16 %v3321_v9, %v3320_v10  ;;  %v425_v12 = vpop.permute.xlu1 %424 }
  0xe3   :  { %v422_v13 = vpop.permute.xlu0 %421  ;;  %vm477_vm9 = vcmp.eq.s32.totalorder %v4628_v58, %v425_v12 }
  0xe4   :  { %5335 = vst [vmem:[#allocation18_spill] sm:$0xff] %v4650_v11  ;;  %vm476_vm10 = vcmp.eq.s32.totalorder %v4628_v58, %v422_v13  ;;  %3854 = vmatmul.mubr.msk.bf16.vlgmr.msra.gmra.mxu1 %vm705_vm6, %v4650_v11  ;;  %v3359_v14 = vsel %vm477_vm9, 1.0, %v5307_v63 }
  0xe5   :  { %v3358_v15 = vsel %vm476_vm10, 1.0, %v5307_v63 }
  0xe6   :  { %v4658_v16 = vpack.c.bf16 %v3359_v14, %v3358_v15  ;;  %v198_v17 = vpop.permute.xlu1 %197 }
  0xe7   :  { %v195_v18 = vpop.permute.xlu0 %194  ;;  %vm246_vm11 = vcmp.eq.s32.totalorder %v4628_v58, %v198_v17 }
  0xe8   :  { %vm245_vm12 = vcmp.eq.s32.totalorder %v4628_v58, %v195_v18  ;;  %3826 = vmatmul.mubr.msk.bf16.vlgmr.msra.gmra.mxu0 %vm553_vm5, %v4658_v16  ;;  %v3323_v19 = vsel %vm246_vm11, 1.0, %v5307_v63 }
  0xe9   :  { %v3322_v20 = vsel %vm245_vm12, 1.0, %v5307_v63 }
  0xea   :  { %v4666_v21 = vpack.c.bf16 %v3323_v19, %v3322_v20  ;;  %v431_v22 = vpop.permute.xlu1 %430 }
  0xeb   :  { %v428_v23 = vpop.permute.xlu0 %427  ;;  %vm479_vm13 = vcmp.eq.s32.totalorder %v4628_v58, %v431_v22 }
  0xec   :  { %5336 = vst [vmem:[#allocation19_spill] sm:$0xff] %v4666_v21  ;;  %vm478_vm14 = vcmp.eq.s32.totalorder %v4628_v58, %v428_v23  ;;  %3857 = vmatprep.mubr.msk.bf16.mxu1 %vm705_vm6, %v4666_v21  ;;  %v3361_v24 = vsel %vm479_vm13, 1.0, %v5307_v63 }
  0xed   :  { %v3360_v25 = vsel %vm478_vm14, 1.0, %v5307_v63 }
  0xee   :  { %v4674_v26 = vpack.c.bf16 %v3361_v24, %v3360_v25  ;;  %v204_v27 = vpop.permute.xlu1 %203 }
  0xef   :  { %v201_v28 = vpop.permute.xlu0 %200  ;;  %vm248_vm15 = vcmp.eq.s32.totalorder %v4628_v58, %v204_v27 }
  0xf0   :  { %vm247_vm1 = vcmp.eq.s32.totalorder %v4628_v58, %v201_v28  ;;  %3829 = vmatprep.mubr.msk.bf16.mxu0 %vm553_vm5, %v4674_v26  ;;  %v3325_v29 = vsel %vm248_vm15, 1.0, %v5307_v63 }
  0xf1   :  { %v3324_v30 = vsel %vm247_vm1, 1.0, %v5307_v63 }
  0xf2   :  { %v4682_v31 = vpack.c.bf16 %v3325_v29, %v3324_v30  ;;  %v437_v32 = vpop.permute.xlu1 %436 }
  0xf3   :  { %v434_v33 = vpop.permute.xlu0 %433  ;;  %vm481_vm2 = vcmp.eq.s32.totalorder %v4628_v58, %v437_v32 }
  0xf4   :  { %5337 = vst [vmem:[#allocation20_spill] sm:$0xff] %v4682_v31  ;;  %vm480_vm3 = vcmp.eq.s32.totalorder %v4628_v58, %v434_v33  ;;  %3858 = vmatmul.mubr.msk.bf16.gmra.mxu1 %vm705_vm6, %v4682_v31  ;;  %v3363_v34 = vsel %vm481_vm2, 1.0, %v5307_v63  ;;  %v5348_v31 = vmov 0  }
  0xf5   :  { %v3362_v35 = vsel %vm480_vm3, 1.0, %v5307_v63 }
  0xf6   :  { %v4690_v36 = vpack.c.bf16 %v3363_v34, %v3362_v35  ;;  %v210_v37 = vpop.permute.xlu1 %209 }
  0xf7   :  { %v207_v38 = vpop.permute.xlu0 %206  ;;  %vm250_vm4 = vcmp.eq.s32.totalorder %v4628_v58, %v210_v37 }
  0xf8   :  { %vm249_vm7 = vcmp.eq.s32.totalorder %v4628_v58, %v207_v38  ;;  %3830 = vmatmul.mubr.msk.bf16.gmra.mxu0 %vm553_vm5, %v4690_v36  ;;  %v3327_v39 = vsel %vm250_vm4, 1.0, %v5307_v63 }
  0xf9   :  { %v3326_v40 = vsel %vm249_vm7, 1.0, %v5307_v63 }
  0xfa   :  { %v4698_v41 = vpack.c.bf16 %v3327_v39, %v3326_v40  ;;  %v443_v42 = vpop.permute.xlu1 %442 }
  0xfb   :  { %v440_v43 = vpop.permute.xlu0 %439  ;;  %vm483_vm8 = vcmp.eq.s32.totalorder %v4628_v58, %v443_v42 }
  0xfc   :  { %5338 = vst [vmem:[#allocation21_spill] sm:$0xff] %v4698_v41  ;;  %vm482_vm9 = vcmp.eq.s32.totalorder %v4628_v58, %v440_v43  ;;  %3861 = vmatprep.mubr.msk.bf16.mxu1 %vm705_vm6, %v4698_v41  ;;  %v3365_v44 = vsel %vm483_vm8, 1.0, %v5307_v63 }
  0xfd   :  { %v3364_v45 = vsel %vm482_vm9, 1.0, %v5307_v63 }
  0xfe   :  { %v4706_v46 = vpack.c.bf16 %v3365_v44, %v3364_v45  ;;  %v216_v47 = vpop.permute.xlu1 %215 }
  0xff   :  { %v213_v48 = vpop.permute.xlu0 %212  ;;  %vm252_vm10 = vcmp.eq.s32.totalorder %v4628_v58, %v216_v47  ;;  %v4792_v47 = vshrl.u32 %v159_v57, 7 }
 0x100   :  { %vm251_vm11 = vcmp.eq.s32.totalorder %v4628_v58, %v213_v48  ;;  %3833 = vmatprep.mubr.msk.bf16.mxu0 %vm553_vm5, %v4706_v46  ;;  %v3329_v49 = vsel %vm252_vm10, 1.0, %v5307_v63 }
 0x101   :  { %v3328_v50 = vsel %vm251_vm11, 1.0, %v5307_v63  ;;  %v4795_v48 = vsub.s32 1, %v4792_v47 }
 0x102   :  { %v4714_v51 = vpack.c.bf16 %v3329_v49, %v3328_v50  ;;  %v449_v52 = vpop.permute.xlu1 %448  ;;  %v313_v49 = vadd.s32 8, %v4792_v47 }
 0x103   :  { %v446_v53 = vpop.permute.xlu0 %445  ;;  %vm485_vm12 = vcmp.eq.s32.totalorder %v4628_v58, %v449_v52  ;;  %v4805_v52 = vsub.s32 0, %v4792_v47 }
 0x104   :  { %5339 = vst [vmem:[#allocation22_spill] sm:$0xff] %v4714_v51  ;;  %vm484_vm13 = vcmp.eq.s32.totalorder %v4628_v58, %v446_v53  ;;  %3862 = vmatmul.mubr.msk.bf16.gmra.mxu1 %vm705_vm6, %v4714_v51  ;;  %v3367_v54 = vsel %vm485_vm12, 1.0, %v5307_v63 }
 0x105   :  { %v3366_v55 = vsel %vm484_vm13, 1.0, %v5307_v63 }
 0x106   :  { %v4722_v56 = vpack.c.bf16 %v3367_v54, %v3366_v55  ;;  %v222_v59 = vpop.permute.xlu1 %221 }
 0x107   :  { %v219_v60 = vpop.permute.xlu0 %218  ;;  %vm254_vm14 = vcmp.eq.s32.totalorder %v4628_v58, %v222_v59  ;;  %v4056_v59 = vld [vmem:[%s5347_s9 + $0x84] ss:$8 sps:$4 sm:$0xff]  }
 0x108   :  { %vm253_vm15 = vcmp.eq.s32.totalorder %v4628_v58, %v219_v60  ;;  %3834 = vmatmul.mubr.msk.bf16.gmra.mxu0 %vm553_vm5, %v4722_v56  ;;  %v3331_v61 = vsel %vm254_vm14, 1.0, %v5307_v63  ;;  %v3993_v60 = vld [vmem:[%s5347_s9 + $0x70] ss:$8 sps:$4 sm:$0xff]  }
 0x109   :  { %v3330_v62 = vsel %vm253_vm15, 1.0, %v5307_v63 }
 0x10a   :  { %v4730_v0 = vpack.c.bf16 %v3331_v61, %v3330_v62  ;;  %v455_v2 = vpop.permute.xlu1 %454  ;;  %v3995_v61 = vld [vmem:[%s5347_s9 + $0x74] ss:$8 sps:$4 sm:$0xff]   ;;  %v3998_v62 = vld [vmem:[%s5347_s9 + $0x64] ss:$8 sps:$4 sm:$0xff]  }
 0x10b   :  { %v452_v3 = vpop.permute.xlu0 %451  ;;  %vm487_vm1 = vcmp.eq.s32.totalorder %v4628_v58, %v455_v2  ;;  %1069 = vmatprep.subr.bf16.mxu1 %v3995_v61  ;;  %v3996_v2 = vld [vmem:[%s5347_s9 + $0x60] ss:$8 sps:$4 sm:$0xff]  }
 0x10c   :  { %5340 = vst [vmem:[#allocation23_spill] sm:$0xff] %v4730_v0  ;;  %vm486_vm2 = vcmp.eq.s32.totalorder %v4628_v58, %v452_v3  ;;  %3865 = vmatprep.mubr.msk.bf16.mxu1 %vm705_vm6, %v4730_v0  ;;  %v3369_v4 = vsel %vm487_vm1, 1.0, %v5307_v63  ;;  %1070 = vmatpush1.bf16.msra.mxu1 %v3993_v60  ;;  %v4001_v3 = vld [vmem:[%s5347_s9 + $0x54] ss:$8 sps:$4 sm:$0xff]  }
 0x10d   :  { %v3368_v7 = vsel %vm486_vm2, 1.0, %v5307_v63  ;;  %1071 = vmatprep.subr.bf16.mxu1 %v3998_v62 }
 0x10e   :  { %v4738_v8 = vpack.c.bf16 %v3369_v4, %v3368_v7  ;;  %v228_v9 = vpop.permute.xlu1 %227  ;;  %v3999_v4 = vld [vmem:[%s5347_s9 + $0x50] ss:$8 sps:$4 sm:$0xff]  }
 0x10f   :  { %v225_v10 = vpop.permute.xlu0 %224  ;;  %vm256_vm3 = vcmp.eq.s32.totalorder %v4628_v58, %v228_v9  ;;  %v4004_v9 = vld [vmem:[%s5347_s9 + $0x44] ss:$8 sps:$4 sm:$0xff]  }
 0x110   :  { %vm255_vm4 = vcmp.eq.s32.totalorder %v4628_v58, %v225_v10  ;;  %3837 = vmatprep.mubr.msk.bf16.mxu0 %vm553_vm5, %v4738_v8  ;;  %v3333_v12 = vsel %vm256_vm3, 1.0, %v5307_v63  ;;  %1072 = vmatpush1.bf16.msra.mxu1 %v3996_v2  ;;  %v4002_v10 = vld [vmem:[%s5347_s9 + $0x40] ss:$8 sps:$4 sm:$0xff]  }
 0x111   :  { %v3332_v13 = vsel %vm255_vm4, 1.0, %v5307_v63  ;;  %vm879_vm4 = vcmask 261120   ;;  %1073 = vmatprep.subr.bf16.mxu1 %v4001_v3 }
 0x112   :  { %v4746_v14 = vpack.c.bf16 %v3333_v12, %v3332_v13  ;;  %v461_v15 = vpop.permute.xlu1 %460 }
 0x113   :  { %v458_v17 = vpop.permute.xlu0 %457  ;;  %vm489_vm7 = vcmp.eq.s32.totalorder %v4628_v58, %v461_v15  ;;  %v4007_v15 = vld [vmem:[%s5347_s9 + $0x34] ss:$8 sps:$4 sm:$0xff]  }
 0x114   :  { %5341 = vst [vmem:[#allocation24_spill] sm:$0xff] %v4746_v14  ;;  %vm488_vm8 = vcmp.eq.s32.totalorder %v4628_v58, %v458_v17  ;;  %3866 = vmatmul.mubr.msk.bf16.gmra.mxu1 %vm705_vm6, %v4746_v14  ;;  %v3371_v18 = vsel %vm489_vm7, 1.0, %v5307_v63  ;;  %v4005_v17 = vld [vmem:[%s5347_s9 + $0x30] ss:$8 sps:$4 sm:$0xff]  }
 0x115   :  { %v3370_v19 = vsel %vm488_vm8, 1.0, %v5307_v63  ;;  %1074 = vmatpush1.bf16.msra.mxu1 %v3999_v4 }
 0x116   :  { %v4754_v20 = vpack.c.bf16 %v3371_v18, %v3370_v19  ;;  %v234_v22 = vpop.permute.xlu1 %233  ;;  %1075 = vmatprep.subr.bf16.mxu1 %v4004_v9 }
 0x117   :  { %v231_v23 = vpop.permute.xlu0 %230  ;;  %vm258_vm9 = vcmp.eq.s32.totalorder %v4628_v58, %v234_v22  ;;  %v4010_v22 = vld [vmem:[%s5347_s9 + $0x24] ss:$8 sps:$4 sm:$0xff]  }
 0x118   :  { %vm257_vm10 = vcmp.eq.s32.totalorder %v4628_v58, %v231_v23  ;;  %3838 = vmatmul.mubr.msk.bf16.gmra.mxu0 %vm553_vm5, %v4754_v20  ;;  %v3335_v24 = vsel %vm258_vm9, 1.0, %v5307_v63  ;;  %v4008_v23 = vld [vmem:[%s5347_s9 + $0x20] ss:$8 sps:$4 sm:$0xff]  }
 0x119   :  { %v3334_v25 = vsel %vm257_vm10, 1.0, %v5307_v63  ;;  %1076 = vmatpush1.bf16.msra.mxu1 %v4002_v10 }
 0x11a   :  { %v4762_v27 = vpack.c.bf16 %v3335_v24, %v3334_v25  ;;  %v467_v28 = vpop.permute.xlu1 %466  ;;  %1077 = vmatprep.subr.bf16.mxu1 %v4007_v15 }
 0x11b   :  { %v464_v29 = vpop.permute.xlu0 %463  ;;  %vm491_vm11 = vcmp.eq.s32.totalorder %v4628_v58, %v467_v28  ;;  %v4013_v28 = vld [vmem:[%s5347_s9 + $0x14] ss:$8 sps:$4 sm:$0xff]  }
 0x11c   :  { %5342 = vst [vmem:[#allocation25_spill] sm:$0xff] %v4762_v27  ;;  %vm490_vm12 = vcmp.eq.s32.totalorder %v4628_v58, %v464_v29  ;;  %3869 = vmatprep.mubr.msk.bf16.mxu1 %vm705_vm6, %v4762_v27  ;;  %v3373_v30 = vsel %vm491_vm11, 1.0, %v5307_v63 }
 0x11d   :  { %v3372_v32 = vsel %vm490_vm12, 1.0, %v5307_v63  ;;  %1078 = vmatpush1.bf16.msra.mxu1 %v4005_v17 }
 0x11e   :  { %v4770_v33 = vpack.c.bf16 %v3373_v30, %v3372_v32  ;;  %v240_v34 = vpop.permute.xlu1 %239  ;;  %1079 = vmatprep.subr.bf16.mxu1 %v4010_v22  ;;  %v4011_v30 = vld [vmem:[%s5347_s9 + $0x10] ss:$8 sps:$4 sm:$0xff]  }
 0x11f   :  { %v237_v35 = vpop.permute.xlu0 %236  ;;  %vm260_vm13 = vcmp.eq.s32.totalorder %v4628_v58, %v240_v34 }
 0x120   :  { %vm259_vm14 = vcmp.eq.s32.totalorder %v4628_v58, %v237_v35  ;;  %3841 = vmatprep.mubr.msk.bf16.mxu0 %vm553_vm5, %v4770_v33  ;;  %v3337_v37 = vsel %vm260_vm13, 1.0, %v5307_v63 }
 0x121   :  { %v3336_v38 = vsel %vm259_vm14, 1.0, %v5307_v63  ;;  %1080 = vmatpush1.bf16.msra.mxu1 %v4008_v23 }
 0x122   :  { %v4778_v39 = vpack.c.bf16 %v3337_v37, %v3336_v38  ;;  %v473_v40 = vpop.permute.xlu1 %472  ;;  %1081 = vmatprep.subr.bf16.mxu1 %v4013_v28 }
 0x123   :  { %v470_v42 = vpop.permute.xlu0 %469  ;;  %vm493_vm15 = vcmp.eq.s32.totalorder %v4628_v58, %v473_v40 }
 0x124   :  { %5343 = vst [vmem:[#allocation26_spill] sm:$0xff] %v4778_v39  ;;  %vm492_vm1 = vcmp.eq.s32.totalorder %v4628_v58, %v470_v42  ;;  %3870 = vmatmul.mubr.msk.bf16.gmra.mxu1 %vm705_vm6, %v4778_v39  ;;  %v3375_v43 = vsel %vm493_vm15, 1.0, %v5307_v63  ;;  %v320_v58 = vld [vmem:[%s5344_s0] sm:$0x3] }
 0x125   :  { %v3374_v44 = vsel %vm492_vm1, 1.0, %v5307_v63  ;;  %1101 = vmatprep.mubr.bf16.mxu1 %v5309_v1  ;;  %v4802_v50 = vrot.slane %v320_v58, %v4795_v48  ;;  %v4813_v54 = vrot.slane %v320_v58, %v4805_v52  ;;  %1082 = vmatpush1.bf16.msra.mxu1 %v4011_v30 }
 0x126   :  { %v4787_v45 = vpack.c.bf16 %v3375_v43, %v3374_v44 }
 0x127   :  { %vm330_vm2 = vcmp.eq.s32.totalorder %v4792_v47, %v4802_v50  ;;  %vm332_vm3 = vcmp.eq.s32.totalorder %v313_v49, %v4802_v50  ;;  %vm329_vm7 = vcmp.eq.s32.totalorder %v4792_v47, %v4813_v54  ;;  %vm331_vm8 = vcmp.eq.s32.totalorder %v313_v49, %v4813_v54 }
 0x128   :  { %3842 = vmatmul.mubr.msk.bf16.gmra.mxu0 %vm553_vm5, %v4787_v45  ;;  %v3339_v57 = vsel %vm330_vm2, 1.0, %v5307_v63  ;;  %v3341_v53 = vsel %vm332_vm3, 1.0, %v5307_v63  ;;  %vm4822_vm9 = vmpackc.low %vm331_vm8, %vm329_vm7 }
 0x129   :  { %v4815_v55 = vpack.c.bf16 %v3341_v53, %v3339_v57 }
 0x12b   :  { %3396 = vmatprep.mubr.msk.bf16.mxu0 %vm879_vm4, %v4815_v55 }
 0x1a4   :  { %v4844_v7 = vpop.f32.mrf.mxu1 }
 0x1a6   :  { %v4852_v12 = vpop.f32.mrf.mxu1 }
 0x1a8   :  { %v4854_v13 = vpop.f32.mrf.mxu0  ;;  %v4862_v18 = vpop.f32.mrf.mxu1 }
 0x1aa   :  { %v4864_v19 = vpop.f32.mrf.mxu0  ;;  %v4872_v24 = vpop.f32.mrf.mxu1 }
 0x1ac   :  { %v4874_v25 = vpop.f32.mrf.mxu0 }
 0x1ae   :  { %v4882_v32 = vpop.f32.mrf.mxu0 }
 0x1b4   :  { %v3859_v29 = vpop.f32.mrf.mxu1 }
 0x1b6   :  { %v786_v34 = vpop.f32.mrf.mxu1 }
 0x1b8   :  { %v3831_v35 = vpop.f32.mrf.mxu0  ;;  %v3860_v37 = vpop.f32.mrf.mxu1 }
 0x1ba   :  { %v638_v38 = vpop.f32.mrf.mxu0  ;;  %v789_v40 = vpop.f32.mrf.mxu1 }
 0x1bc   :  { %v3832_v42 = vpop.f32.mrf.mxu0 }
 0x1be   :  { %v641_v44 = vpop.f32.mrf.mxu0 }
 0x1c4   :  { %v3863_v43 = vpop.f32.mrf.mxu1 }
 0x1c6   :  { %v802_v58 = vpop.f32.mrf.mxu1 }
 0x1c8   :  { %v3835_v49 = vpop.f32.mrf.mxu0  ;;  %v3864_v57 = vpop.f32.mrf.mxu1 }
 0x1c9   :  { %v811_v51 = vadd.f32 %v3863_v43, %v3835_v49  ;;  %v787_v43 = vadd.f32 %v786_v34, %v638_v38  ;;  %v774_v34 = vadd.f32 %v4872_v24, %v4882_v32  ;;  %v314_v24 = vadd.s32 16, %v4792_v47 }
 0x1ca   :  { %v654_v53 = vpop.f32.mrf.mxu0  ;;  %v805_v60 = vpop.f32.mrf.mxu1 }
 0x1cb   :  { %vm334_vm10 = vcmp.eq.s32.totalorder %v314_v24, %v4802_v50  ;;  %vm333_vm14 = vcmp.eq.s32.totalorder %v314_v24, %v4813_v54 }
 0x1cc   :  { %v3836_v61 = vpop.f32.mrf.mxu0 }
 0x1cd   :  { %v814_v27 = vadd.f32 %v3864_v57, %v3836_v61 }
 0x1ce   :  { %v657_v2 = vpop.f32.mrf.mxu0 }
 0x1cf   :  { %v860_v21 = vmax.f32 %v814_v27, 0.0  ;;  %v806_v11 = vadd.f32 %v805_v60, %v657_v2 }
 0x1d4   :  { %v3867_v62 = vpop.f32.mrf.mxu1 }
 0x1d6   :  { %v818_v3 = vpop.f32.mrf.mxu1 }
 0x1d8   :  { %v3839_v4 = vpop.f32.mrf.mxu0  ;;  %v3868_v9 = vpop.f32.mrf.mxu1 }
 0x1d9   :  { %v827_v15 = vadd.f32 %v3867_v62, %v3839_v4  ;;  %v859_v62 = vmax.f32 %v811_v51, 0.0  ;;  %v803_v4 = vadd.f32 %v802_v58, %v654_v53 }
 0x1da   :  { %v670_v10 = vpop.f32.mrf.mxu0  ;;  %v821_v23 = vpop.f32.mrf.mxu1 }
 0x1db   :  { %v863_v30 = vmax.f32 %v827_v15, 0.0  ;;  %v819_v63 = vadd.f32 %v818_v3, %v670_v10  ;;  %v874_v3 = vpack.c.bf16 %v860_v21, %v859_v62  ;;  %v858_v10 = vmax.f32 %v806_v11, 0.0 }
 0x1dc   :  { %v3840_v17 = vpop.f32.mrf.mxu0  ;;  %v795_v15 = vadd.f32 %v3859_v29, %v3831_v35  ;;  %v857_v57 = vmax.f32 %v803_v4, 0.0  ;;  %v853_v29 = vmax.f32 %v787_v43, 0.0 }
 0x1dd   :  { %v830_v22 = vadd.f32 %v3868_v9, %v3840_v17  ;;  %v861_v41 = vmax.f32 %v819_v63, 0.0  ;;  %v798_v9 = vadd.f32 %v3860_v37, %v3832_v42  ;;  %v790_v63 = vadd.f32 %v789_v40, %v641_v44 }
 0x1de   :  { %v673_v28 = vpop.f32.mrf.mxu0  ;;  %v855_v27 = vmax.f32 %v795_v15, 0.0 }
 0x1df   :  { %v864_v1 = vmax.f32 %v830_v22, 0.0  ;;  %v822_v39 = vadd.f32 %v821_v23, %v673_v28  ;;  %v854_v11 = vmax.f32 %v790_v63, 0.0 }
 0x1e1   :  { %v876_v14 = vpack.c.bf16 %v864_v1, %v863_v30  ;;  %v862_v0 = vmax.f32 %v822_v39, 0.0  ;;  %v856_v1 = vmax.f32 %v798_v9, 0.0  ;;  %v871_v38 = vpack.c.bf16 %v854_v11, %v853_v29  ;;  %v4017_v29 = vld [vmem:[#allocation5 + $0x78] sm:$0xff]   ;;  %v4062_v11 = vld [vmem:[#allocation5 + $0xa8] sm:$0xff]  }
 0x1e2   :  { %v5349_v30 = vmov 0.0  }
 0x1e3   :  { %893 = vmatpush1.bf16.msra.mxu0 %v876_v14  ;;  %v875_v6 = vpack.c.bf16 %v862_v0, %v861_v41  ;;  %v873_v14 = vpack.c.bf16 %v858_v10, %v857_v57  ;;  %v872_v21 = vpack.c.bf16 %v856_v1, %v855_v27  ;;  %v779_v0 = vadd.f32 %v4844_v7, %v4854_v13  ;;  %v4057_v27 = vld [vmem:[#allocation5 + $0xf8] sm:$0xff]  }
 0x1e4   :  { %894 = vmatprep.subr.bf16.mxu0 %v5348_v31  ;;  %v3871_v41 = vpop.f32.mrf.mxu1  ;;  %v850_v13 = vmax.f32 %v774_v34, 0.0  ;;  %v3343_v62 = vsel %vm334_vm10, 1.0, %v5349_v30  ;;  %v317_v10 = vadd.s32 40, %v4792_v47  ;;  %v4341_v57 = vmov 1.0|1.0   ;;  %v4020_v34 = vld [vmem:[#allocation5 + $0x30] sm:$0xff]  }
 0x1e5   :  { %v851_v42 = vmax.f32 %v779_v0, 0.0  ;;  %v4014_v0 = vld [vmem:[%s5347_s9] ss:$8 sps:$4 sm:$0xff]  }
 0x1e6   :  { %v834_v35 = vpop.f32.mrf.mxu1  ;;  %vm340_vm13 = vcmp.eq.s32.totalorder %v317_v10, %v4802_v50  ;;  %vm339_vm8 = vcmp.eq.s32.totalorder %v317_v10, %v4813_v54 }
 0x1e7   :  { %895 = vmatpush1.bf16.msra.mxu0 %v875_v6  ;;  %v782_v6 = vadd.f32 %v4862_v18, %v4874_v25  ;;  %v771_v18 = vadd.f32 %v4852_v12, %v4864_v19  ;;  %v315_v12 = vadd.s32 24, %v4792_v47  ;;  %v3349_v63 = vsel %vm340_vm13, 1.0, %v5349_v30 }
 0x1e8   :  { %896 = vmatprep.subr.bf16.mxu0 %v5348_v31  ;;  %v3843_v39 = vpop.f32.mrf.mxu0  ;;  %v3872_v25 = vpop.f32.mrf.mxu1 }
 0x1e9   :  { %v852_v37 = vmax.f32 %v782_v6, 0.0  ;;  %v849_v49 = vmax.f32 %v771_v18, 0.0  ;;  %v843_v53 = vadd.f32 %v3871_v41, %v3843_v39  ;;  %vm336_vm11 = vcmp.eq.s32.totalorder %v315_v12, %v4802_v50  ;;  %v4024_v18 = vld [vmem:[#allocation5 + $0x20] sm:$0xff]  }
 0x1ea   :  { %v686_v51 = vpop.f32.mrf.mxu0  ;;  %v837_v60 = vpop.f32.mrf.mxu1  ;;  %v3345_v4 = vsel %vm336_vm11, 1.0, %v5349_v30  ;;  %vm335_vm15 = vcmp.eq.s32.totalorder %v315_v12, %v4813_v54  ;;  %v319_v39 = vadd.s32 56, %v4792_v47 }
 0x1eb   :  { %897 = vmatpush1.bf16.msra.mxu0 %v874_v3  ;;  %v870_v7 = vpack.c.bf16 %v852_v37, %v851_v42  ;;  %v869_v32 = vpack.c.bf16 %v850_v13, %v849_v49  ;;  %v867_v19 = vmax.f32 %v843_v53, 0.0  ;;  %v835_v17 = vadd.f32 %v834_v35, %v686_v51  ;;  %vm4924_vm1 = vmpackc.low %vm335_vm15, %vm333_vm14  ;;  %v4016_v51 = vld [vmem:[%s5347_s9 + $0x4] ss:$8 sps:$4 sm:$0xff]   ;;  %v4018_v35 = vld [vmem:[#allocation5 + $0x38] sm:$0xff]  }
 0x1ec   :  { %898 = vmatprep.subr.bf16.mxu0 %v5348_v31  ;;  %v3844_v40 = vpop.f32.mrf.mxu0  ;;  %v316_v3 = vadd.s32 32, %v4792_v47  ;;  %v4909_v15 = vpack.c.bf16 %v3345_v4, %v3343_v62  ;;  %vm344_vm3 = vcmp.eq.s32.totalorder %v319_v39, %v4802_v50  ;;  %1083 = vmatprep.subr.bf16.mxu1 %v4016_v51  ;;  %v4019_v37 = vld [vmem:[#allocation5 + $0x70] sm:$0xff]   ;;  %v4023_v42 = vld [vmem:[#allocation5 + $0x60] sm:$0xff]   ;;  %vm3308_vm15 = vcmask 3072  }
 0x1ed   :  { %v846_v44 = vadd.f32 %v3872_v25, %v3844_v40  ;;  %v865_v28 = vmax.f32 %v835_v17, 0.0  ;;  %v3353_v6 = vsel %vm344_vm3, 1.0, %v5349_v30  ;;  %1084 = vmatpush1.bf16.msra.mxu1 %v4014_v0  ;;  %v4022_v40 = vld [vmem:[#allocation5 + $0x28] sm:$0xff]   ;;  %v4025_v25 = vld [vmem:[#allocation5 + $0x58] sm:$0xff]  }
 0x1ee   :  { %v689_v58 = vpop.f32.mrf.mxu0  ;;  %vm338_vm12 = vcmp.eq.s32.totalorder %v316_v3, %v4802_v50  ;;  %vm337_vm7 = vcmp.eq.s32.totalorder %v316_v3, %v4813_v54 }
 0x1ef   :  { %899 = vmatpush1.bf16.msra.mxu0 %v873_v14  ;;  %v868_v61 = vmax.f32 %v846_v44, 0.0  ;;  %v838_v2 = vadd.f32 %v837_v60, %v689_v58  ;;  %v3347_v1 = vsel %vm338_vm12, 1.0, %v5349_v30  ;;  %v318_v14 = vadd.s32 48, %v4792_v47  ;;  %vm4941_vm10 = vmpackc.low %vm339_vm8, %vm337_vm7 }
 0x1f0   :  { %900 = vmatprep.subr.bf16.mxu0 %v5348_v31  ;;  %v4928_v43 = vpack.c.bf16 %v3349_v63, %v3347_v1  ;;  %vm343_vm12 = vcmp.eq.s32.totalorder %v319_v39, %v4813_v54 }
 0x1f1   :  { %v878_v22 = vpack.c.bf16 %v868_v61, %v867_v19  ;;  %v866_v23 = vmax.f32 %v838_v2, 0.0  ;;  %vm342_vm2 = vcmp.eq.s32.totalorder %v318_v14, %v4802_v50  ;;  %vm341_vm11 = vcmp.eq.s32.totalorder %v318_v14, %v4813_v54  ;;  %v3441_v54 = vld [vmem:[%s5332_s7 + $0x4] sm:$0xf] }
 0x1f2   :  { %v3351_v41 = vsel %vm342_vm2, 1.0, %v5349_v30  ;;  %vm4954_vm13 = vmpackc.low %vm343_vm12, %vm341_vm11  ;;  %3976 = vmatprep.subr.msk.bf16.mxu1 %vm584_vm0, %v3441_v54  ;;  %v1446_v53 = vsel %vm584_vm0, %v3441_v54, 0  ;;  %vm4342_vm0 = vmmov 0  }
 0x1f3   :  { %901 = vmatpush1.bf16.msra.mxu0 %v872_v21  ;;  %v877_v9 = vpack.c.bf16 %v866_v23, %v865_v28  ;;  %v4945_v50 = vpack.c.bf16 %v3353_v6, %v3351_v41  ;;  %v4059_v21 = vld [vmem:[#allocation5 + $0xf0] sm:$0xff]  }
 0x1f4   :  { %902 = vmatprep.subr.bf16.mxu0 %v5348_v31 }
 0x1f7   :  { %903 = vmatpush1.bf16.msra.mxu0 %v871_v38  ;;  %v4021_v38 = vld [vmem:[#allocation5 + $0x68] sm:$0xff]  }
 0x1f8   :  { %904 = vmatprep.subr.bf16.mxu0 %v5348_v31 }
 0x1fb   :  { %905 = vmatpush1.bf16.msra.mxu0 %v870_v7  ;;  %v4026_v7 = vld [vmem:[#allocation5 + $0x18] sm:$0xff]  }
 0x1fc   :  { %906 = vmatprep.subr.bf16.mxu0 %v5348_v31 }
 0x1ff   :  { %907 = vmatpush1.bf16.msra.mxu0 %v869_v32 }
 0x200   :  { %920 = vmatprep.subr.bf16.mxu0 %v5348_v31 }
 0x203   :  { %921 = vmatpush2.bf16.msra.mxu0 %v878_v22 }
 0x204   :  { %922 = vmatprep.subr.bf16.mxu0 %v5348_v31 }
 0x207   :  { %923 = vmatpush2.bf16.msra.mxu0 %v877_v9 }
 0x208   :  { %3651 = vmatprep.subr.bf16.mxu0 %v4017_v29 }
 0x20a   :  { %3398 = vmatmul.mubr.msk.bf16.vlgmr.msra.gmra.mxu0 %vm4822_vm9, %v4341_v57 }
 0x20b   :  { %3399 = vmatprep.mubr.msk.bf16.mxu0 %vm879_vm4, %v4909_v15  ;;  %3652 = vmatpush3.bf16.msra.mxu0 %v4018_v35 }
 0x20c   :  { %3653 = vmatprep.subr.bf16.mxu0 %v4019_v37 }
 0x20f   :  { %3654 = vmatpush3.bf16.msra.mxu0 %v4020_v34 }
 0x210   :  { %3655 = vmatprep.subr.bf16.mxu0 %v4021_v38 }
 0x212   :  { %3401 = vmatmul.mubr.msk.bf16.gmra.mxu0 %vm4924_vm1, %v4341_v57 }
 0x213   :  { %3402 = vmatprep.mubr.msk.bf16.mxu0 %vm879_vm4, %v4928_v43  ;;  %3656 = vmatpush3.bf16.msra.mxu0 %v4022_v40 }
 0x214   :  { %3657 = vmatprep.subr.bf16.mxu0 %v4023_v42 }
 0x217   :  { %3658 = vmatpush3.bf16.msra.mxu0 %v4024_v18 }
 0x218   :  { %3659 = vmatprep.subr.bf16.mxu0 %v4025_v25 }
 0x21a   :  { %3404 = vmatmul.mubr.msk.bf16.gmra.mxu0 %vm4941_vm10, %v4341_v57 }
 0x21b   :  { %3405 = vmatprep.mubr.msk.bf16.mxu0 %vm879_vm4, %v4945_v50  ;;  %3660 = vmatpush3.bf16.msra.mxu0 %v4026_v7 }
 0x222   :  { %3407 = vmatmul.mubr.msk.bf16.gmra.mxu0 %vm4954_vm13, %v4341_v57 }
 0x2ca   :  { %v926_v13 = vpop.f32.mrf.mxu0 }
 0x2cc   :  { %v928_v44 = vpop.f32.mrf.mxu0 }
 0x2ce   :  { %v929_v58 = vpop.f32.mrf.mxu0 }
 0x2cf   :  { %v957_v49 = vpack.c.bf16 %v929_v58, %v926_v13 }
 0x2d0   :  { %v931_v60 = vpop.f32.mrf.mxu0 }
 0x2d1   :  { %1102 = vmatmul.mubr.bf16.vlgmr.msra.gmra.mxu1 %v957_v49 }
 0x2d2   :  { %v934_v24 = vpop.f32.mrf.mxu0  ;;  %1111 = vmatprep.mubr.bf16.mxu1 %v5348_v31  ;;  %3874 = vmatpush3.bf16.msra.mxu1 %v1446_v53 }
 0x2d3   :  { %1708 = vmatprep.subr.bf16.mxu1 %v5348_v31 }
 0x2d4   :  { %v936_v32 = vpop.f32.mrf.mxu0 }
 0x2d6   :  { %v937_v61 = vpop.f32.mrf.mxu0 }
 0x2d7   :  { %v958_v2 = vpack.c.bf16 %v937_v61, %v934_v24 }
 0x2d8   :  { %v939_v12 = vpop.f32.mrf.mxu0 }
 0x2d9   :  { %1112 = vmatmul.mubr.bf16.gmra.mxu1 %v958_v2 }
 0x2da   :  { %v942_v19 = vpop.f32.mrf.mxu0  ;;  %1121 = vmatprep.mubr.bf16.mxu1 %v5348_v31 }
 0x2dc   :  { %v944_v17 = vpop.f32.mrf.mxu0 }
 0x2de   :  { %v945_v22 = vpop.f32.mrf.mxu0 }
 0x2df   :  { %v959_v23 = vpack.c.bf16 %v945_v22, %v942_v19 }
 0x2e0   :  { %v947_v28 = vpop.f32.mrf.mxu0 }
 0x2e1   :  { %1122 = vmatmul.mubr.bf16.gmra.mxu1 %v959_v23 }
 0x2e2   :  { %v950_v62 = vpop.f32.mrf.mxu0  ;;  %1131 = vmatprep.mubr.bf16.mxu1 %v5348_v31 }
 0x2e4   :  { %v952_v4 = vpop.f32.mrf.mxu0 }
 0x2e6   :  { %v953_v9 = vpop.f32.mrf.mxu0 }
 0x2e7   :  { %v960_v3 = vpack.c.bf16 %v953_v9, %v950_v62 }
 0x2e8   :  { %v955_v10 = vpop.f32.mrf.mxu0 }
 0x2e9   :  { %1132 = vmatmul.mubr.bf16.gmra.mxu1 %v960_v3 }
 0x2ea   :  { %3875 = vmatprep.mubr.msk.bf16.mxu1 %vm553_vm5, %v4638_v5  ;;  %v4027_v5 = vld [vmem:[#allocation5 + $0x50] sm:$0xff]  }
 0x2eb   :  { %3661 = vmatprep.subr.bf16.mxu0 %v4027_v5 }
 0x2f1   :  { %3876 = vmatmul.mubr.msk.bf16.vlgmr.msra.gmra.mxu1 %vm553_vm5, %v4658_v16  ;;  %v4028_v16 = vld [vmem:[#allocation5 + $0x10] sm:$0xff]  }
 0x2f2   :  { %3879 = vmatprep.mubr.msk.bf16.mxu1 %vm553_vm5, %v4674_v26  ;;  %3662 = vmatpush3.bf16.msra.mxu0 %v4028_v16  ;;  %v4029_v26 = vld [vmem:[#allocation5 + $0x48] sm:$0xff]  }
 0x2f3   :  { %3663 = vmatprep.subr.bf16.mxu0 %v4029_v26 }
 0x2f9   :  { %3880 = vmatmul.mubr.msk.bf16.gmra.mxu1 %vm553_vm5, %v4690_v36  ;;  %v4030_v36 = vld [vmem:[#allocation5 + $0x8] sm:$0xff]  }
 0x2fa   :  { %3883 = vmatprep.mubr.msk.bf16.mxu1 %vm553_vm5, %v4706_v46  ;;  %3664 = vmatpush3.bf16.msra.mxu0 %v4030_v36  ;;  %v4031_v46 = vld [vmem:[#allocation5 + $0x40] sm:$0xff]  }
 0x2fb   :  { %3665 = vmatprep.subr.bf16.mxu0 %v4031_v46 }
 0x301   :  { %3884 = vmatmul.mubr.msk.bf16.gmra.mxu1 %vm553_vm5, %v4722_v56  ;;  %v4032_v56 = vld [vmem:[#allocation5] sm:$0xff]  }
 0x302   :  { %3887 = vmatprep.mubr.msk.bf16.mxu1 %vm553_vm5, %v4738_v8  ;;  %3666 = vmatpush3.bf16.msra.mxu0 %v4032_v56  ;;  %v977_v8 = vld [vmem:[%s5287_s8] sm:$0x3] }
 0x309   :  { %3888 = vmatmul.mubr.msk.bf16.gmra.mxu1 %vm553_vm5, %v4754_v20 }
 0x30a   :  { %3891 = vmatprep.mubr.msk.bf16.mxu1 %vm553_vm5, %v4770_v33  ;;  %v986_v33 = vrot.slane %v977_v8, %v4795_v48 }
 0x311   :  { %3892 = vmatmul.mubr.msk.bf16.gmra.mxu1 %vm553_vm5, %v4787_v45  ;;  %v982_v45 = vrot.slane %v977_v8, %v4805_v52 }
 0x312   :  { %3462 = vmatprep.mubr.msk.bf16.mxu1 %vm879_vm4, %v4815_v55 }
 0x391   :  { %v1103_v20 = vpop.f32.mrf.mxu1 }
 0x392   :  { %v1104_v39 = vadd.f32 %v1103_v20, %v982_v45 }
 0x393   :  { %v1105_v55 = vpop.f32.mrf.mxu1 }
 0x394   :  { %v1106_v63 = vadd.f32 %v1105_v55, %v986_v33  ;;  %v1142_v35 = vmax.f32 %v1104_v39, 0.0 }
 0x395   :  { %v1107_v1 = vpop.f32.mrf.mxu1 }
 0x396   :  { %v1108_v14 = vadd.f32 %v1107_v1, %v982_v45  ;;  %v1143_v54 = vmax.f32 %v1106_v63, 0.0 }
 0x397   :  { %v1109_v41 = vpop.f32.mrf.mxu1 }
 0x398   :  { %v1110_v6 = vadd.f32 %v1109_v41, %v986_v33  ;;  %v1144_v51 = vmax.f32 %v1108_v14, 0.0 }
 0x399   :  { %v1113_v0 = vpop.f32.mrf.mxu1 }
 0x39a   :  { %v1145_v29 = vmax.f32 %v1110_v6, 0.0  ;;  %v1158_v38 = vpack.c.bf16 %v1144_v51, %v1142_v35  ;;  %v1114_v25 = vadd.f32 %v1113_v0, %v982_v45  ;;  %v5356_v6 = vld [vmem:[#allocation17_spill] sm:$0xff] }
 0x39b   :  { %v1115_v37 = vpop.f32.mrf.mxu1 }
 0x39c   :  { %v1159_v34 = vpack.c.bf16 %v1145_v29, %v1143_v54  ;;  %v1116_v42 = vadd.f32 %v1115_v37, %v986_v33  ;;  %v1146_v60 = vmax.f32 %v1114_v25, 0.0 }
 0x39d   :  { %v1117_v40 = vpop.f32.mrf.mxu1 }
 0x39e   :  { %v1118_v18 = vadd.f32 %v1117_v40, %v982_v45  ;;  %1333 = vmatprep.mubr.bf16.mxu0 %v1159_v34  ;;  %v1147_v49 = vmax.f32 %v1116_v42, 0.0 }
 0x39f   :  { %v1119_v7 = vpop.f32.mrf.mxu1  ;;  %1334 = vmatmul.mubr.bf16.vlgmr.msra.gmra.mxu0 %v1158_v38 }
 0x3a0   :  { %v1120_v13 = vadd.f32 %v1119_v7, %v986_v33  ;;  %v1148_v44 = vmax.f32 %v1118_v18, 0.0 }
 0x3a1   :  { %v1123_v58 = vpop.f32.mrf.mxu1 }
 0x3a2   :  { %v1149_v53 = vmax.f32 %v1120_v13, 0.0  ;;  %v1160_v61 = vpack.c.bf16 %v1148_v44, %v1146_v60  ;;  %v1124_v17 = vadd.f32 %v1123_v58, %v982_v45 }
 0x3a3   :  { %v1125_v24 = vpop.f32.mrf.mxu1 }
 0x3a4   :  { %v1161_v32 = vpack.c.bf16 %v1149_v53, %v1147_v49  ;;  %v1126_v12 = vadd.f32 %v1125_v24, %v986_v33  ;;  %v1150_v3 = vmax.f32 %v1124_v17, 0.0 }
 0x3a5   :  { %v1127_v2 = vpop.f32.mrf.mxu1 }
 0x3a6   :  { %v1128_v19 = vadd.f32 %v1127_v2, %v982_v45  ;;  %1341 = vmatprep.mubr.bf16.mxu0 %v1161_v32  ;;  %v1151_v4 = vmax.f32 %v1126_v12, 0.0 }
 0x3a7   :  { %v1129_v22 = vpop.f32.mrf.mxu1  ;;  %1342 = vmatmul.mubr.bf16.gmra.mxu0 %v1160_v61 }
 0x3a8   :  { %v1130_v23 = vadd.f32 %v1129_v22, %v986_v33  ;;  %v1152_v28 = vmax.f32 %v1128_v19, 0.0 }
 0x3a9   :  { %v1133_v62 = vpop.f32.mrf.mxu1 }
 0x3aa   :  { %v1153_v9 = vmax.f32 %v1130_v23, 0.0  ;;  %v1162_v16 = vpack.c.bf16 %v1152_v28, %v1150_v3  ;;  %v1134_v56 = vadd.f32 %v1133_v62, %v982_v45 }
 0x3ab   :  { %v1135_v10 = vpop.f32.mrf.mxu1 }
 0x3ac   :  { %v1163_v5 = vpack.c.bf16 %v1153_v9, %v1151_v4  ;;  %v1136_v36 = vadd.f32 %v1135_v10, %v986_v33  ;;  %v1154_v14 = vmax.f32 %v1134_v56, 0.0 }
 0x3ad   :  { %v1137_v26 = vpop.f32.mrf.mxu1 }
 0x3ae   :  { %v1138_v46 = vadd.f32 %v1137_v26, %v982_v45  ;;  %1349 = vmatprep.mubr.bf16.mxu0 %v1163_v5  ;;  %v1155_v1 = vmax.f32 %v1136_v36, 0.0 }
 0x3af   :  { %v1139_v8 = vpop.f32.mrf.mxu1  ;;  %1350 = vmatmul.mubr.bf16.gmra.mxu0 %v1162_v16 }
 0x3b0   :  { %v1140_v20 = vadd.f32 %v1139_v8, %v986_v33  ;;  %v1156_v55 = vmax.f32 %v1138_v46, 0.0  ;;  %v3424_v33 = vld [vmem:[%s5289_s10] ss:$0 sm:$0xff] }
 0x3b2   :  { %v1157_v63 = vmax.f32 %v1140_v20, 0.0  ;;  %v1164_v41 = vpack.c.bf16 %v1156_v55, %v1154_v14 }
 0x3b4   :  { %v1165_v39 = vpack.c.bf16 %v1157_v63, %v1155_v1 }
 0x3b6   :  { %1357 = vmatprep.mubr.bf16.mxu0 %v1165_v39 }
 0x3b7   :  { %1358 = vmatmul.mubr.bf16.gmra.mxu0 %v1164_v41 }
 0x3b8   :  { %3903 = vmatprep.mubr.msk.bf16.mxu0 %vm705_vm6, %v5356_v6 }
 0x45f   :  { %v3667_v51 = vpop.f32.mrf.mxu0 }
 0x461   :  { %v3668_v0 = vpop.f32.mrf.mxu0 }
 0x462   :  { %v3669_v37 = vadd.f32 %v3668_v0, %v3667_v51 }
 0x463   :  { %v3670_v54 = vpop.f32.mrf.mxu0 }
 0x464   :  { %v1336_v18 = vadd.f32 %v3669_v37, %v3424_v33 }
 0x465   :  { %v3671_v29 = vpop.f32.mrf.mxu0 }
 0x466   :  { %v3672_v35 = vadd.f32 %v3671_v29, %v3670_v54 }
 0x467   :  { %v3673_v45 = vpop.f32.mrf.mxu0 }
 0x468   :  { %v1339_v38 = vadd.f32 %v3672_v35, %v3424_v33 }
 0x469   :  { %v3674_v34 = vpop.f32.mrf.mxu0 }
 0x46a   :  { %v3675_v40 = vadd.f32 %v3674_v34, %v3673_v45  ;;  %v1366_v13 = vadd.f32 %v1339_v38, %v1336_v18 }
 0x46b   :  { %v3676_v42 = vpop.f32.mrf.mxu0 }
 0x46c   :  { %v1344_v25 = vadd.f32 %v3675_v40, %v3424_v33 }
 0x46d   :  { %v3677_v7 = vpop.f32.mrf.mxu0 }
 0x46e   :  { %v3678_v44 = vadd.f32 %v3677_v7, %v3676_v42  ;;  %v1367_v49 = vadd.f32 %v1366_v13, %v1344_v25 }
 0x46f   :  { %v3679_v58 = vpop.f32.mrf.mxu0 }
 0x470   :  { %v1347_v53 = vadd.f32 %v3678_v44, %v3424_v33 }
 0x471   :  { %v3680_v60 = vpop.f32.mrf.mxu0 }
 0x472   :  { %v1368_v24 = vadd.f32 %v1367_v49, %v1347_v53  ;;  %v3681_v23 = vadd.f32 %v3680_v60, %v3679_v58 }
 0x473   :  { %v3682_v32 = vpop.f32.mrf.mxu0 }
 0x474   :  { %v1369_v61 = vrot.slane %v1368_v24, 4  ;;  %v1352_v5 = vadd.f32 %v3681_v23, %v3424_v33 }
 0x475   :  { %v3683_v2 = vpop.f32.mrf.mxu0 }
 0x476   :  { %v1370_v12 = vadd.f32 %v1369_v61, %v1368_v24  ;;  %v3684_v19 = vadd.f32 %v3683_v2, %v3682_v32 }
 0x477   :  { %v3685_v17 = vpop.f32.mrf.mxu0 }
 0x478   :  { %v1371_v22 = vrot.slane %v1370_v12, 2  ;;  %v1355_v9 = vadd.f32 %v3684_v19, %v3424_v33 }
 0x479   :  { %v3686_v28 = vpop.f32.mrf.mxu0 }
 0x47a   :  { %v1372_v62 = vadd.f32 %v1371_v22, %v1370_v12  ;;  %v3687_v4 = vadd.f32 %v3686_v28, %v3685_v17  ;;  %v1395_v56 = vadd.f32 %v1355_v9, %v1352_v5 }
 0x47b   :  { %v3688_v3 = vpop.f32.mrf.mxu0 }
 0x47c   :  { %v1373_v10 = vrot.slane %v1372_v62, 1  ;;  %v1360_v16 = vadd.f32 %v3687_v4, %v3424_v33 }
 0x47d   :  { %v3689_v26 = vpop.f32.mrf.mxu0 }
 0x47e   :  { %v1374_v36 = vadd.f32 %v1373_v10, %v1372_v62  ;;  %v3690_v46 = vadd.f32 %v3689_v26, %v3688_v3  ;;  %v1396_v55 = vadd.f32 %v1395_v56, %v1360_v16 }
 0x480   :  { %v1376_v8 = vmul.f32 0.03125, %v1374_v36  ;;  %v1363_v20 = vadd.f32 %v3690_v46, %v3424_v33 }
 0x482   :  { %v1377_v1 = vsub.f32 %v1336_v18, %v1376_v8  ;;  %v5008_v63 = vsub.f32 %v1339_v38, %v1376_v8  ;;  %v1379_v14 = vsub.f32 %v1344_v25, %v1376_v8  ;;  %v1397_v39 = vadd.f32 %v1396_v55, %v1363_v20 }
 0x483   :  { %v1380_v41 = vsub.f32 %v1347_v53, %v1376_v8 }
 0x484   :  { %v1381_v6 = vmul.f32 %v1377_v1, %v1377_v1  ;;  %v1382_v51 = vmul.f32 %v5008_v63, %v5008_v63  ;;  %v1398_v0 = vrot.slane %v1397_v39, 4  ;;  %v1383_v54 = vmul.f32 %v1379_v14, %v1379_v14 }
 0x485   :  { %v1384_v45 = vmul.f32 %v1380_v41, %v1380_v41 }
 0x486   :  { %v1385_v29 = vadd.f32 %v1382_v51, %v1381_v6  ;;  %v1399_v35 = vadd.f32 %v1398_v0, %v1397_v39 }
 0x488   :  { %v1386_v37 = vadd.f32 %v1385_v29, %v1383_v54  ;;  %v1400_v34 = vrot.slane %v1399_v35, 2 }
 0x48a   :  { %v1387_v40 = vadd.f32 %v1386_v37, %v1384_v45  ;;  %v1401_v33 = vadd.f32 %v1400_v34, %v1399_v35 }
 0x48c   :  { %v1388_v42 = vrot.slane %v1387_v40, 4  ;;  %v1402_v18 = vrot.slane %v1401_v33, 1 }
 0x48e   :  { %v1403_v38 = vadd.f32 %v1402_v18, %v1401_v33  ;;  %v1389_v7 = vadd.f32 %v1388_v42, %v1387_v40 }
 0x490   :  { %v1404_v25 = vmul.f32 0.03125, %v1403_v38  ;;  %v1390_v49 = vrot.slane %v1389_v7, 2 }
 0x492   :  { %v1405_v13 = vsub.f32 %v1352_v5, %v1404_v25  ;;  %v1406_v44 = vsub.f32 %v1355_v9, %v1404_v25  ;;  %v1407_v58 = vsub.f32 %v1360_v16, %v1404_v25  ;;  %v1408_v53 = vsub.f32 %v1363_v20, %v1404_v25  ;;  %v5359_v25 = vld [vmem:[#allocation20_spill] sm:$0xff] }
 0x493   :  { %v1391_v2 = vadd.f32 %v1390_v49, %v1389_v7  ;;  %v5364_v49 = vld [vmem:[#allocation25_spill] sm:$0xff] }
 0x494   :  { %v1409_v60 = vmul.f32 %v1405_v13, %v1405_v13  ;;  %v1410_v24 = vmul.f32 %v1406_v44, %v1406_v44  ;;  %v1411_v32 = vmul.f32 %v1407_v58, %v1407_v58  ;;  %v1412_v12 = vmul.f32 %v1408_v53, %v1408_v53 }
 0x495   :  { %v1392_v22 = vrot.slane %v1391_v2, 1 }
 0x496   :  { %v1413_v61 = vadd.f32 %v1410_v24, %v1409_v60  ;;  %v5032_v60 = vpop.f32.mrf.mxu1  ;;  %v4033_v24 = vld [vmem:[%s5347_s9 + $0xf0] ss:$8 sps:$4 sm:$0xff]  }
 0x497   :  { %v1393_v62 = vadd.f32 %v1392_v22, %v1391_v2  ;;  %v4036_v2 = vld [vmem:[%s5347_s9 + $0xe0] ss:$8 sps:$4 sm:$0xff]  }
 0x498   :  { %v1414_v19 = vadd.f32 %v1413_v61, %v1411_v32  ;;  %v4035_v32 = vld [vmem:[%s5347_s9 + $0xf4] ss:$8 sps:$4 sm:$0xff]   ;;  %v4038_v61 = vld [vmem:[%s5347_s9 + $0xe4] ss:$8 sps:$4 sm:$0xff]  }
 0x499   :  { %v1394_v10 = vmul.f32 0.03125, %v1393_v62 }
 0x49a   :  { %v1415_v17 = vadd.f32 %v1414_v19, %v1412_v12  ;;  %v5046_v12 = vpop.f32.mrf.mxu1  ;;  %v4041_v19 = vld [vmem:[%s5347_s9 + $0xd4] ss:$8 sps:$4 sm:$0xff]  }
 0x49b   :  { %v1423_v16 = vadd.f32 1e-05, %v1394_v10 }
 0x49c   :  { %v1416_v23 = vrot.slane %v1415_v17, 4  ;;  %v5054_v22 = vpop.f32.mrf.mxu1 }
 0x49d   :  { %4193 = vrsqrt.f32 %v1423_v16 }
 0x49e   :  { %v1417_v28 = vadd.f32 %v1416_v23, %v1415_v17  ;;  %v4039_v17 = vld [vmem:[%s5347_s9 + $0xd0] ss:$8 sps:$4 sm:$0xff]   ;;  %v4044_v23 = vld [vmem:[%s5347_s9 + $0xc4] ss:$8 sps:$4 sm:$0xff]   ;;  %v5062_v62 = vpop.f32.mrf.mxu1 }
 0x4a0   :  { %v1418_v4 = vrot.slane %v1417_v28, 2  ;;  %v3881_v10 = vpop.f32.mrf.mxu1 }
 0x4a2   :  { %v1419_v3 = vadd.f32 %v1418_v4, %v1417_v28  ;;  %v4042_v28 = vld [vmem:[%s5347_s9 + $0xc0] ss:$8 sps:$4 sm:$0xff]   ;;  %v4047_v4 = vld [vmem:[%s5347_s9 + $0xb4] ss:$8 sps:$4 sm:$0xff]   ;;  %v5076_v16 = vpop.f32.mrf.mxu1 }
 0x4a4   :  { %v1420_v5 = vrot.slane %v1419_v3, 1 }
 0x4a6   :  { %v1421_v9 = vadd.f32 %v1420_v5, %v1419_v3  ;;  %v4045_v3 = vld [vmem:[%s5347_s9 + $0xb0] ss:$8 sps:$4 sm:$0xff]   ;;  %v4050_v5 = vld [vmem:[%s5347_s9 + $0xa4] ss:$8 sps:$4 sm:$0xff]  }
 0x4a8   :  { %v1422_v26 = vmul.f32 0.03125, %v1421_v9  ;;  %v4048_v9 = vld [vmem:[%s5347_s9 + $0xa0] ss:$8 sps:$4 sm:$0xff]  }
 0x4aa   :  { %v1429_v36 = vadd.f32 1e-05, %v1422_v26  ;;  %v4194_v46 = vpop.eup %4193  ;;  %v4053_v26 = vld [vmem:[%s5347_s9 + $0x94] ss:$8 sps:$4 sm:$0xff]  }
 0x4ab   :  { %v1427_v6 = vmul.f32 %v4194_v46, %v1379_v14  ;;  %v1428_v51 = vmul.f32 %v4194_v46, %v1380_v41  ;;  %v1425_v37 = vmul.f32 %v4194_v46, %v1377_v1  ;;  %v1426_v42 = vmul.f32 %v4194_v46, %v5008_v63  ;;  %v5357_v41 = vld [vmem:[#allocation18_spill] sm:$0xff]  ;;  %v5358_v1 = vld [vmem:[#allocation19_spill] sm:$0xff]  ;;  %v5360_v63 = vld [vmem:[#allocation21_spill] sm:$0xff]  ;;  %v3882_v46 = vpop.f32.mrf.mxu1 }
 0x4ac   :  { %4195 = vrsqrt.f32 %v1429_v36  ;;  %v4051_v36 = vld [vmem:[%s5347_s9 + $0x90] ss:$8 sps:$4 sm:$0xff]  }
 0x4ad   :  { %v1437_v40 = vmax.f32 %v1427_v6, 0.0  ;;  %v1438_v33 = vmax.f32 %v1428_v51, 0.0  ;;  %v1435_v38 = vmax.f32 %v1425_v37, 0.0  ;;  %v1436_v7 = vmax.f32 %v1426_v42, 0.0 }
 0x4af   :  { %v1562_v18 = vpack.c.bf16 %v1438_v33, %v1437_v40  ;;  %v1561_v14 = vpack.c.bf16 %v1436_v7, %v1435_v38 }
 0x4b9   :  { %v4196_v56 = vpop.eup %4195 }
 0x4ba   :  { %v1433_v8 = vmul.f32 %v4196_v56, %v1407_v58  ;;  %v1434_v20 = vmul.f32 %v4196_v56, %v1408_v53  ;;  %v1431_v55 = vmul.f32 %v4196_v56, %v1405_v13  ;;  %v1432_v39 = vmul.f32 %v4196_v56, %v1406_v44  ;;  %v5361_v13 = vld [vmem:[#allocation22_spill] sm:$0xff]  ;;  %v5362_v44 = vld [vmem:[#allocation23_spill] sm:$0xff]  ;;  %v5363_v58 = vld [vmem:[#allocation24_spill] sm:$0xff]  ;;  %v1501_v56 = vpop.f32.mrf.mxu1 }
 0x4bb   :  { %v5365_v53 = vld [vmem:[#allocation26_spill] sm:$0xff] }
 0x4bc   :  { %v1441_v0 = vmax.f32 %v1433_v8, 0.0  ;;  %v1442_v54 = vmax.f32 %v1434_v20, 0.0  ;;  %v1439_v29 = vmax.f32 %v1431_v55, 0.0  ;;  %v1440_v35 = vmax.f32 %v1432_v39, 0.0  ;;  %v3885_v20 = vpop.f32.mrf.mxu1 }
 0x4be   :  { %v1564_v45 = vpack.c.bf16 %v1442_v54, %v1441_v0  ;;  %v1563_v34 = vpack.c.bf16 %v1440_v35, %v1439_v29  ;;  %v1514_v6 = vpop.f32.mrf.mxu1 }
 0x4c0   :  { %3895 = vmatprep.subr.bf16.mxu0 %v1564_v45  ;;  %v3886_v54 = vpop.f32.mrf.mxu1 }
 0x4c1   :  { %3896 = vmatpush3.bf16.msra.mxu0 %v1564_v45 }
 0x4c2   :  { %3897 = vmatprep.subr.bf16.mxu0 %v1563_v34  ;;  %v1517_v45 = vpop.f32.mrf.mxu1 }
 0x4c4   :  { %v3889_v40 = vpop.f32.mrf.mxu1 }
 0x4c5   :  { %3898 = vmatpush3.bf16.msra.mxu0 %v1563_v34 }
 0x4c6   :  { %3899 = vmatprep.subr.bf16.mxu0 %v1562_v18 }
 0x4c9   :  { %3900 = vmatpush3.bf16.msra.mxu0 %v1562_v18  ;;  %v1530_v18 = vpop.f32.mrf.mxu1 }
 0x4ca   :  { %3901 = vmatprep.subr.bf16.mxu0 %v1561_v14 }
 0x4cd   :  { %3902 = vmatpush3.bf16.msra.mxu0 %v1561_v14  ;;  %v3890_v14 = vpop.f32.mrf.mxu1 }
 0x4ce   :  { %1887 = vmatprep.subr.bf16.mxu0 %v4035_v32 }
 0x4d0   :  { %3904 = vmatmul.mubr.msk.bf16.vlgmr.msra.gmra.mxu0 %vm705_vm6, %v5357_v41 }
 0x4d1   :  { %3907 = vmatprep.mubr.msk.bf16.mxu0 %vm705_vm6, %v5358_v1  ;;  %1888 = vmatpush1.bf16.msra.mxu0 %v4033_v24 }
 0x4d2   :  { %1889 = vmatprep.subr.bf16.mxu0 %v4038_v61 }
 0x4d5   :  { %1890 = vmatpush1.bf16.msra.mxu0 %v4036_v2 }
 0x4d6   :  { %1891 = vmatprep.subr.bf16.mxu0 %v4041_v19 }
 0x4d8   :  { %3908 = vmatmul.mubr.msk.bf16.gmra.mxu0 %vm705_vm6, %v5359_v25 }
 0x4d9   :  { %3911 = vmatprep.mubr.msk.bf16.mxu0 %vm705_vm6, %v5360_v63  ;;  %1892 = vmatpush1.bf16.msra.mxu0 %v4039_v17 }
 0x4da   :  { %1893 = vmatprep.subr.bf16.mxu0 %v4044_v23 }
 0x4dd   :  { %1894 = vmatpush1.bf16.msra.mxu0 %v4042_v28 }
 0x4de   :  { %1895 = vmatprep.subr.bf16.mxu0 %v4047_v4 }
 0x4e0   :  { %3912 = vmatmul.mubr.msk.bf16.gmra.mxu0 %vm705_vm6, %v5361_v13  ;;  %v1533_v13 = vpop.f32.mrf.mxu1 }
 0x4e1   :  { %3915 = vmatprep.mubr.msk.bf16.mxu0 %vm705_vm6, %v5362_v44  ;;  %1896 = vmatpush1.bf16.msra.mxu0 %v4045_v3 }
 0x4e2   :  { %1897 = vmatprep.subr.bf16.mxu0 %v4050_v5 }
 0x4e5   :  { %1898 = vmatpush1.bf16.msra.mxu0 %v4048_v9 }
 0x4e6   :  { %1899 = vmatprep.subr.bf16.mxu0 %v4053_v26 }
 0x4e8   :  { %3916 = vmatmul.mubr.msk.bf16.gmra.mxu0 %vm705_vm6, %v5363_v58 }
 0x4e9   :  { %3919 = vmatprep.mubr.msk.bf16.mxu0 %vm705_vm6, %v5364_v49  ;;  %1900 = vmatpush1.bf16.msra.mxu0 %v4051_v36 }
 0x4ea   :  { %1901 = vmatprep.subr.bf16.mxu0 %v4056_v59 }
 0x4f0   :  { %3920 = vmatmul.mubr.msk.bf16.gmra.mxu0 %vm705_vm6, %v5365_v53 }
 0x4f1   :  { %1919 = vmatprep.mubr.bf16.mxu0 %v5348_v31 }
 0x590   :  { %v5084_v8 = vpop.f32.mrf.mxu0 }
 0x592   :  { %v5086_v55 = vpop.f32.mrf.mxu0 }
 0x594   :  { %v3906_v39 = vpop.f32.mrf.mxu0 }
 0x596   :  { %v5088_v51 = vpop.f32.mrf.mxu0 }
 0x598   :  { %v3909_v0 = vpop.f32.mrf.mxu0 }
 0x59a   :  { %v1615_v29 = vpop.f32.mrf.mxu0 }
 0x59c   :  { %v3910_v35 = vpop.f32.mrf.mxu0 }
 0x59d   :  { %v1627_v9 = vadd.f32 %v3910_v35, %v3882_v46  ;;  %v1611_v46 = vadd.f32 %v3906_v39, %v5054_v22  ;;  %v1600_v22 = vadd.f32 %v5086_v55, %v5046_v12 }
 0x59e   :  { %v1618_v37 = vpop.f32.mrf.mxu0 }
 0x5a0   :  { %v3913_v34 = vpop.f32.mrf.mxu0 }
 0x5a1   :  { %v1640_v19 = vadd.f32 %v3913_v34, %v3885_v20  ;;  %v1685_v20 = vmax.f32 %v1627_v9, 0.0  ;;  %v1619_v34 = vadd.f32 %v1618_v37, %v1501_v56  ;;  %v1681_v37 = vmax.f32 %v1611_v46, 0.0 }
 0x5a2   :  { %v1631_v33 = vpop.f32.mrf.mxu0 }
 0x5a3   :  { %v1688_v3 = vmax.f32 %v1640_v19, 0.0  ;;  %v1632_v5 = vadd.f32 %v1631_v33, %v1514_v6  ;;  %v3893_v6 = vpop.f32.mrf.mxu1  ;;  %v1683_v33 = vmax.f32 %v1619_v34, 0.0  ;;  %v4065_v19 = vld [vmem:[#allocation5 + $0xd8] sm:$0xff]  }
 0x5a4   :  { %v3914_v42 = vpop.f32.mrf.mxu0 }
 0x5a5   :  { %v1643_v32 = vadd.f32 %v3914_v42, %v3886_v54  ;;  %v1686_v54 = vmax.f32 %v1632_v5, 0.0  ;;  %v1546_v56 = vpop.f32.mrf.mxu1 }
 0x5a6   :  { %v1634_v38 = vpop.f32.mrf.mxu0 }
 0x5a7   :  { %v1689_v23 = vmax.f32 %v1643_v32, 0.0  ;;  %v1635_v28 = vadd.f32 %v1634_v38, %v1517_v45  ;;  %v1616_v45 = vadd.f32 %v1615_v29, %v5076_v16  ;;  %v1603_v16 = vadd.f32 %v5088_v51, %v5062_v62  ;;  %v3894_v39 = vpop.f32.mrf.mxu1 }
 0x5a8   :  { %v3917_v7 = vpop.f32.mrf.mxu0 }
 0x5a9   :  { %v1656_v1 = vadd.f32 %v3917_v7, %v3889_v40  ;;  %v1703_v26 = vpack.c.bf16 %v1689_v23, %v1688_v3  ;;  %v1687_v36 = vmax.f32 %v1635_v28, 0.0  ;;  %v1624_v40 = vadd.f32 %v3909_v0, %v3881_v10 }
 0x5aa   :  { %v1647_v41 = vpop.f32.mrf.mxu0  ;;  %v1608_v0 = vadd.f32 %v5084_v8, %v5032_v60  ;;  %v1682_v38 = vmax.f32 %v1616_v45, 0.0  ;;  %v1679_v8 = vmax.f32 %v1603_v16, 0.0  ;;  %v4072_v16 = vld [vmem:[#allocation5 + $0x80] sm:$0xff]  }
 0x5ab   :  { %v1692_v58 = vmax.f32 %v1656_v1, 0.0  ;;  %v1648_v49 = vadd.f32 %v1647_v41, %v1530_v18  ;;  %v1702_v42 = vpack.c.bf16 %v1687_v36, %v1686_v54  ;;  %v1684_v7 = vmax.f32 %v1624_v40, 0.0 }
 0x5ac   :  { %v3918_v25 = vpop.f32.mrf.mxu0  ;;  %v1700_v29 = vpack.c.bf16 %v1683_v33, %v1682_v38  ;;  %v1680_v41 = vmax.f32 %v1608_v0, 0.0  ;;  %v4068_v0 = vld [vmem:[#allocation5 + $0x90] sm:$0xff]   ;;  %v4069_v38 = vld [vmem:[#allocation5 + $0xc8] sm:$0xff]  }
 0x5ad   :  { %v1659_v63 = vadd.f32 %v3918_v25, %v3890_v14  ;;  %v1690_v17 = vmax.f32 %v1648_v49, 0.0  ;;  %v1701_v35 = vpack.c.bf16 %v1685_v20, %v1684_v7 }
 0x5ae   :  { %v1650_v44 = vpop.f32.mrf.mxu0  ;;  %v1699_v60 = vpack.c.bf16 %v1681_v37, %v1680_v41  ;;  %v4071_v37 = vld [vmem:[#allocation5 + $0xc0] sm:$0xff]  }
 0x5af   :  { %v1693_v53 = vmax.f32 %v1659_v63, 0.0  ;;  %v1651_v24 = vadd.f32 %v1650_v44, %v1533_v13  ;;  %v1678_v63 = vmax.f32 %v1600_v22, 0.0  ;;  %v1549_v44 = vpop.f32.mrf.mxu1 }
 0x5b0   :  { %v3921_v18 = vpop.f32.mrf.mxu0 }
 0x5b1   :  { %v1705_v61 = vpack.c.bf16 %v1693_v53, %v1692_v58  ;;  %v1691_v2 = vmax.f32 %v1651_v24, 0.0  ;;  %v1672_v13 = vadd.f32 %v3921_v18, %v3893_v6  ;;  %v1698_v62 = vpack.c.bf16 %v1679_v8, %v1678_v63 }
 0x5b2   :  { %v1663_v10 = vpop.f32.mrf.mxu0 }
 0x5b3   :  { %1709 = vmatpush1.bf16.msra.mxu1 %v1705_v61  ;;  %v1704_v4 = vpack.c.bf16 %v1691_v2, %v1690_v17  ;;  %v1696_v49 = vmax.f32 %v1672_v13, 0.0  ;;  %v1664_v53 = vadd.f32 %v1663_v10, %v1546_v56  ;;  %v4063_v61 = vld [vmem:[#allocation5 + $0xe0] sm:$0xff]   ;;  %v4066_v17 = vld [vmem:[#allocation5 + $0x98] sm:$0xff]   ;;  %v4067_v10 = vld [vmem:[#allocation5 + $0xd0] sm:$0xff]  }
 0x5b4   :  { %1710 = vmatprep.subr.bf16.mxu1 %v5348_v31  ;;  %v3922_v14 = vpop.f32.mrf.mxu0  ;;  %v4064_v2 = vld [vmem:[#allocation5 + $0xa0] sm:$0xff]   ;;  %v4070_v56 = vld [vmem:[#allocation5 + $0x88] sm:$0xff]  }
 0x5b5   :  { %v1675_v1 = vadd.f32 %v3922_v14, %v3894_v39  ;;  %v1694_v24 = vmax.f32 %v1664_v53, 0.0 }
 0x5b6   :  { %v1666_v25 = vpop.f32.mrf.mxu0 }
 0x5b7   :  { %1711 = vmatpush1.bf16.msra.mxu1 %v1704_v4  ;;  %v1697_v51 = vmax.f32 %v1675_v1, 0.0  ;;  %v1667_v58 = vadd.f32 %v1666_v25, %v1549_v44 }
 0x5b8   :  { %1712 = vmatprep.subr.bf16.mxu1 %v5348_v31 }
 0x5b9   :  { %v1707_v12 = vpack.c.bf16 %v1697_v51, %v1696_v49  ;;  %v1695_v55 = vmax.f32 %v1667_v58, 0.0 }
 0x5bb   :  { %1713 = vmatpush1.bf16.msra.mxu1 %v1703_v26  ;;  %v1706_v32 = vpack.c.bf16 %v1695_v55, %v1694_v24 }
 0x5bc   :  { %1714 = vmatprep.subr.bf16.mxu1 %v5348_v31 }
 0x5bf   :  { %1715 = vmatpush1.bf16.msra.mxu1 %v1702_v42 }
 0x5c0   :  { %1716 = vmatprep.subr.bf16.mxu1 %v5348_v31 }
 0x5c3   :  { %1717 = vmatpush1.bf16.msra.mxu1 %v1701_v35 }
 0x5c4   :  { %1718 = vmatprep.subr.bf16.mxu1 %v5348_v31 }
 0x5c7   :  { %1719 = vmatpush1.bf16.msra.mxu1 %v1700_v29  ;;  %v3490_v29 = vld [vmem:[%s5287_s8 + $0x2] sm:$0x3] }
 0x5c8   :  { %1720 = vmatprep.subr.bf16.mxu1 %v5348_v31  ;;  %v1804_v41 = vrot.slane %v3490_v29, %v4795_v48  ;;  %v1800_v22 = vrot.slane %v3490_v29, %v4805_v52  ;;  %v4073_v29 = vld [vmem:[%s5290_s11 + $0x70] ss:$8 sps:$4 sm:$0xff]  }
 0x5cb   :  { %1721 = vmatpush1.bf16.msra.mxu1 %v1699_v60 }
 0x5cc   :  { %1722 = vmatprep.subr.bf16.mxu1 %v5348_v31 }
 0x5cf   :  { %1723 = vmatpush1.bf16.msra.mxu1 %v1698_v62 }
 0x5d0   :  { %1736 = vmatprep.subr.bf16.mxu1 %v5348_v31 }
 0x5d3   :  { %1737 = vmatpush2.bf16.msra.mxu1 %v1707_v12 }
 0x5d4   :  { %1738 = vmatprep.subr.bf16.mxu1 %v5348_v31 }
 0x5d7   :  { %1739 = vmatpush2.bf16.msra.mxu1 %v1706_v32 }
 0x5d8   :  { %3716 = vmatprep.subr.bf16.mxu1 %v4057_v27 }
 0x5da   :  { %3464 = vmatmul.mubr.msk.bf16.vlgmr.msra.gmra.mxu1 %vm4822_vm9, %v4341_v57 }
 0x5db   :  { %3465 = vmatprep.mubr.msk.bf16.mxu1 %vm879_vm4, %v4909_v15  ;;  %v4054_v15 = vld [vmem:[%s5347_s9 + $0x80] ss:$8 sps:$4 sm:$0xff]  }
 0x5dc   :  { %1902 = vmatpush1.bf16.msra.mxu0 %v4054_v15 }
 0x5dd   :  { %3923 = vmatprep.subr.bf16.mxu0 %v5349_v30 }
 0x5e2   :  { %3467 = vmatmul.mubr.msk.bf16.gmra.mxu1 %vm4924_vm1, %v4341_v57 }
 0x5e3   :  { %3468 = vmatprep.mubr.msk.bf16.mxu1 %vm879_vm4, %v4928_v43  ;;  %v4058_v43 = vld [vmem:[#allocation5 + $0xb8] sm:$0xff]  }
 0x5e4   :  { %3717 = vmatpush3.bf16.msra.mxu1 %v4058_v43 }
 0x5e5   :  { %3718 = vmatprep.subr.bf16.mxu1 %v4059_v21 }
 0x5ea   :  { %3470 = vmatmul.mubr.msk.bf16.gmra.mxu1 %vm4941_vm10, %v4341_v57 }
 0x5eb   :  { %3471 = vmatprep.mubr.msk.bf16.mxu1 %vm879_vm4, %v4945_v50  ;;  %v4060_v50 = vld [vmem:[#allocation5 + $0xb0] sm:$0xff]  }
 0x5ec   :  { %3719 = vmatpush3.bf16.msra.mxu1 %v4060_v50 }
 0x5f2   :  { %3473 = vmatmul.mubr.msk.bf16.gmra.mxu1 %vm4954_vm13, %v4341_v57  ;;  %v4061_v57 = vld [vmem:[#allocation5 + $0xe8] sm:$0xff]  }
 0x5f3   :  { %3720 = vmatprep.subr.bf16.mxu1 %v4061_v57 }
 0x5f4   :  { %3721 = vmatpush3.bf16.msra.mxu1 %v4062_v11 }
 0x5f5   :  { %3722 = vmatprep.subr.bf16.mxu1 %v4063_v61 }
 0x5f8   :  { %3723 = vmatpush3.bf16.msra.mxu1 %v4064_v2 }
 0x5f9   :  { %3724 = vmatprep.subr.bf16.mxu1 %v4065_v19 }
 0x5fc   :  { %3725 = vmatpush3.bf16.msra.mxu1 %v4066_v17 }
 0x5fd   :  { %3726 = vmatprep.subr.bf16.mxu1 %v4067_v10 }
 0x600   :  { %3727 = vmatpush3.bf16.msra.mxu1 %v4068_v0 }
 0x601   :  { %3728 = vmatprep.subr.bf16.mxu1 %v4069_v38 }
 0x604   :  { %3729 = vmatpush3.bf16.msra.mxu1 %v4070_v56 }
 0x605   :  { %3730 = vmatprep.subr.bf16.mxu1 %v4071_v37 }
 0x608   :  { %3731 = vmatpush3.bf16.msra.mxu1 %v4072_v16 }
 0x69a   :  { %v1742_v23 = vpop.f32.mrf.mxu1 }
 0x69c   :  { %v1744_v28 = vpop.f32.mrf.mxu1 }
 0x69e   :  { %v1745_v4 = vpop.f32.mrf.mxu1 }
 0x69f   :  { %v1773_v3 = vpack.c.bf16 %v1745_v4, %v1742_v23 }
 0x6a0   :  { %v1747_v5 = vpop.f32.mrf.mxu1 }
 0x6a1   :  { %1920 = vmatmul.mubr.bf16.vlgmr.msra.gmra.mxu0 %v1773_v3 }
 0x6a2   :  { %v1750_v9 = vpop.f32.mrf.mxu1  ;;  %1929 = vmatprep.mubr.bf16.mxu0 %v5348_v31 }
 0x6a4   :  { %v1752_v26 = vpop.f32.mrf.mxu1 }
 0x6a6   :  { %v1753_v36 = vpop.f32.mrf.mxu1 }
 0x6a7   :  { %v1774_v40 = vpack.c.bf16 %v1753_v36, %v1750_v9 }
 0x6a8   :  { %v1755_v54 = vpop.f32.mrf.mxu1 }
 0x6a9   :  { %1930 = vmatmul.mubr.bf16.gmra.mxu0 %v1774_v40 }
 0x6aa   :  { %v1758_v20 = vpop.f32.mrf.mxu1  ;;  %1939 = vmatprep.mubr.bf16.mxu0 %v5348_v31 }
 0x6ac   :  { %v1760_v34 = vpop.f32.mrf.mxu1 }
 0x6ae   :  { %v1761_v42 = vpop.f32.mrf.mxu1 }
 0x6af   :  { %v1775_v18 = vpack.c.bf16 %v1761_v42, %v1758_v20 }
 0x6b0   :  { %v1763_v7 = vpop.f32.mrf.mxu1 }
 0x6b1   :  { %1940 = vmatmul.mubr.bf16.gmra.mxu0 %v1775_v18 }
 0x6b2   :  { %v1766_v45 = vpop.f32.mrf.mxu1  ;;  %1949 = vmatprep.mubr.bf16.mxu0 %v5348_v31 }
 0x6b4   :  { %v1768_v6 = vpop.f32.mrf.mxu1 }
 0x6b6   :  { %v1769_v46 = vpop.f32.mrf.mxu1 }
 0x6b7   :  { %v1776_v35 = vpack.c.bf16 %v1769_v46, %v1766_v45 }
 0x6b8   :  { %v1771_v33 = vpop.f32.mrf.mxu1 }
 0x6b9   :  { %1950 = vmatmul.mubr.bf16.gmra.mxu0 %v1776_v35 }
 0x6ba   :  { %3931 = vmatprep.mubr.msk.bf16.mxu0 %vm4342_vm0, %v5349_v30 }
 0x761   :  { %v1921_v14 = vpop.f32.mrf.mxu0 }
 0x762   :  { %v1922_v25 = vadd.f32 %v1921_v14, %v1800_v22  ;;  %v4075_v14 = vld [vmem:[%s5290_s11 + $0x74] ss:$8 sps:$4 sm:$0xff]  }
 0x763   :  { %v1923_v39 = vpop.f32.mrf.mxu0  ;;  %2425 = vmatprep.subr.bf16.mxu1 %v4075_v14 }
 0x764   :  { %v1924_v8 = vadd.f32 %v1923_v39, %v1804_v41  ;;  %v1960_v49 = vmax.f32 %v1922_v25, 0.0  ;;  %v4079_v39 = vld [vmem:[%s5290_s11 + $0x50] ss:$8 sps:$4 sm:$0xff]  }
 0x765   :  { %v1925_v60 = vpop.f32.mrf.mxu0 }
 0x766   :  { %v1926_v1 = vadd.f32 %v1925_v60, %v1800_v22  ;;  %v1961_v51 = vmax.f32 %v1924_v8, 0.0  ;;  %v4084_v60 = vld [vmem:[%s5290_s11 + $0x44] ss:$8 sps:$4 sm:$0xff]   ;;  %v4082_v8 = vld [vmem:[%s5290_s11 + $0x40] ss:$8 sps:$4 sm:$0xff]  }
 0x767   :  { %v1927_v63 = vpop.f32.mrf.mxu0 }
 0x768   :  { %v1928_v13 = vadd.f32 %v1927_v63, %v1804_v41  ;;  %v1962_v44 = vmax.f32 %v1926_v1, 0.0  ;;  %v4087_v1 = vld [vmem:[%s5290_s11 + $0x34] ss:$8 sps:$4 sm:$0xff]   ;;  %v4085_v63 = vld [vmem:[%s5290_s11 + $0x30] ss:$8 sps:$4 sm:$0xff]  }
 0x769   :  { %v1931_v62 = vpop.f32.mrf.mxu0 }
 0x76a   :  { %v1963_v58 = vmax.f32 %v1928_v13, 0.0  ;;  %v1976_v55 = vpack.c.bf16 %v1962_v44, %v1960_v49  ;;  %v1932_v15 = vadd.f32 %v1931_v62, %v1800_v22  ;;  %v4090_v13 = vld [vmem:[%s5290_s11 + $0x24] ss:$8 sps:$4 sm:$0xff]  }
 0x76b   :  { %v1933_v53 = vpop.f32.mrf.mxu0 }
 0x76c   :  { %v1977_v12 = vpack.c.bf16 %v1963_v58, %v1961_v51  ;;  %v1934_v32 = vadd.f32 %v1933_v53, %v1804_v41  ;;  %v1964_v61 = vmax.f32 %v1932_v15, 0.0  ;;  %v4088_v51 = vld [vmem:[%s5290_s11 + $0x20] ss:$8 sps:$4 sm:$0xff]   ;;  %v4093_v58 = vld [vmem:[%s5290_s11 + $0x14] ss:$8 sps:$4 sm:$0xff]  }
 0x76d   :  { %v1935_v24 = vpop.f32.mrf.mxu0 }
 0x76e   :  { %v1936_v59 = vadd.f32 %v1935_v24, %v1800_v22  ;;  %2153 = vmatprep.mubr.bf16.mxu1 %v1977_v12  ;;  %v1965_v57 = vmax.f32 %v1934_v32, 0.0  ;;  %v3508_v32 = vld [vmem:[%s5289_s10 + $0x1] ss:$0 sm:$0xff] }
 0x76f   :  { %v1937_v27 = vpop.f32.mrf.mxu0  ;;  %2154 = vmatmul.mubr.bf16.vlgmr.msra.gmra.mxu1 %v1976_v55  ;;  %v4091_v55 = vld [vmem:[%s5290_s11 + $0x10] ss:$8 sps:$4 sm:$0xff]  }
 0x770   :  { %v1938_v43 = vadd.f32 %v1937_v27, %v1804_v41  ;;  %v1966_v21 = vmax.f32 %v1936_v59, 0.0  ;;  %2426 = vmatpush1.bf16.msra.mxu1 %v4073_v29 }
 0x771   :  { %v1941_v50 = vpop.f32.mrf.mxu0 }
 0x772   :  { %v1967_v11 = vmax.f32 %v1938_v43, 0.0  ;;  %v1978_v17 = vpack.c.bf16 %v1966_v21, %v1964_v61  ;;  %v1942_v3 = vadd.f32 %v1941_v50, %v1800_v22 }
 0x773   :  { %v1943_v2 = vpop.f32.mrf.mxu0 }
 0x774   :  { %v1979_v19 = vpack.c.bf16 %v1967_v11, %v1965_v57  ;;  %v1944_v28 = vadd.f32 %v1943_v2, %v1804_v41  ;;  %v1968_v20 = vmax.f32 %v1942_v3, 0.0 }
 0x775   :  { %v1945_v23 = vpop.f32.mrf.mxu0 }
 0x776   :  { %v1946_v4 = vadd.f32 %v1945_v23, %v1800_v22  ;;  %2161 = vmatprep.mubr.bf16.mxu1 %v1979_v19  ;;  %v1969_v40 = vmax.f32 %v1944_v28, 0.0 }
 0x777   :  { %v1947_v5 = vpop.f32.mrf.mxu0  ;;  %2162 = vmatmul.mubr.bf16.gmra.mxu1 %v1978_v17 }
 0x778   :  { %v1948_v9 = vadd.f32 %v1947_v5, %v1804_v41  ;;  %v1970_v26 = vmax.f32 %v1946_v4, 0.0 }
 0x779   :  { %v1951_v36 = vpop.f32.mrf.mxu0 }
 0x77a   :  { %v1971_v54 = vmax.f32 %v1948_v9, 0.0  ;;  %v1980_v18 = vpack.c.bf16 %v1970_v26, %v1968_v20  ;;  %v1952_v46 = vadd.f32 %v1951_v36, %v1800_v22 }
 0x77b   :  { %v1953_v34 = vpop.f32.mrf.mxu0 }
 0x77c   :  { %v1981_v42 = vpack.c.bf16 %v1971_v54, %v1969_v40  ;;  %v1954_v45 = vadd.f32 %v1953_v34, %v1804_v41  ;;  %v1972_v56 = vmax.f32 %v1952_v46, 0.0 }
 0x77d   :  { %v1955_v7 = vpop.f32.mrf.mxu0 }
 0x77e   :  { %v1956_v6 = vadd.f32 %v1955_v7, %v1800_v22  ;;  %2169 = vmatprep.mubr.bf16.mxu1 %v1981_v42  ;;  %v1973_v0 = vmax.f32 %v1954_v45, 0.0  ;;  %v4081_v22 = vld [vmem:[%s5290_s11 + $0x54] ss:$8 sps:$4 sm:$0xff]  }
 0x77f   :  { %v1957_v35 = vpop.f32.mrf.mxu0  ;;  %2170 = vmatmul.mubr.bf16.gmra.mxu1 %v1980_v18 }
 0x780   :  { %v1958_v33 = vadd.f32 %v1957_v35, %v1804_v41  ;;  %v1974_v10 = vmax.f32 %v1956_v6, 0.0  ;;  %v4078_v41 = vld [vmem:[%s5290_s11 + $0x64] ss:$8 sps:$4 sm:$0xff]  }
 0x781   :  { %2427 = vmatprep.subr.bf16.mxu1 %v4078_v41 }
 0x782   :  { %v1975_v38 = vmax.f32 %v1958_v33, 0.0  ;;  %v1982_v16 = vpack.c.bf16 %v1974_v10, %v1972_v56 }
 0x784   :  { %v1983_v37 = vpack.c.bf16 %v1975_v38, %v1973_v0 }
 0x786   :  { %2177 = vmatprep.mubr.bf16.mxu1 %v1983_v37 }
 0x787   :  { %2178 = vmatmul.mubr.bf16.gmra.mxu1 %v1982_v16 }
 0x788   :  { %2457 = vmatprep.mubr.bf16.mxu1 %v5348_v31  ;;  %v4076_v31 = vld [vmem:[%s5290_s11 + $0x60] ss:$8 sps:$4 sm:$0xff]  }
 0x789   :  { %2428 = vmatpush1.bf16.msra.mxu1 %v4076_v31 }
 0x78a   :  { %2429 = vmatprep.subr.bf16.mxu1 %v4081_v22 }
 0x78d   :  { %2430 = vmatpush1.bf16.msra.mxu1 %v4079_v39 }
 0x78e   :  { %2431 = vmatprep.subr.bf16.mxu1 %v4084_v60 }
 0x791   :  { %2432 = vmatpush1.bf16.msra.mxu1 %v4082_v8 }
 0x792   :  { %2433 = vmatprep.subr.bf16.mxu1 %v4087_v1 }
 0x795   :  { %2434 = vmatpush1.bf16.msra.mxu1 %v4085_v63 }
 0x796   :  { %2435 = vmatprep.subr.bf16.mxu1 %v4090_v13 }
 0x799   :  { %2436 = vmatpush1.bf16.msra.mxu1 %v4088_v51 }
 0x79a   :  { %2437 = vmatprep.subr.bf16.mxu1 %v4093_v58 }
 0x79d   :  { %2438 = vmatpush1.bf16.msra.mxu1 %v4091_v55 }
 0x82f   :  { %v3732_v25 = vpop.f32.mrf.mxu1 }
 0x831   :  { %v3733_v44 = vpop.f32.mrf.mxu1 }
 0x832   :  { %v3734_v24 = vadd.f32 %v3733_v44, %v3732_v25 }
 0x833   :  { %v3735_v62 = vpop.f32.mrf.mxu1 }
 0x834   :  { %v2156_v21 = vadd.f32 %v3734_v24, %v3508_v32 }
 0x835   :  { %v3736_v49 = vpop.f32.mrf.mxu1 }
 0x836   :  { %v3737_v53 = vadd.f32 %v3736_v49, %v3735_v62 }
 0x837   :  { %v3738_v12 = vpop.f32.mrf.mxu1 }
 0x838   :  { %v2159_v15 = vadd.f32 %v3737_v53, %v3508_v32 }
 0x839   :  { %v3739_v59 = vpop.f32.mrf.mxu1 }
 0x83a   :  { %v3740_v27 = vadd.f32 %v3739_v59, %v3738_v12  ;;  %v2186_v11 = vadd.f32 %v2159_v15, %v2156_v21 }
 0x83b   :  { %v3741_v43 = vpop.f32.mrf.mxu1 }
 0x83c   :  { %v2164_v50 = vadd.f32 %v3740_v27, %v3508_v32 }
 0x83d   :  { %v3742_v57 = vpop.f32.mrf.mxu1 }
 0x83e   :  { %v3743_v61 = vadd.f32 %v3742_v57, %v3741_v43  ;;  %v2187_v19 = vadd.f32 %v2186_v11, %v2164_v50 }
 0x83f   :  { %v3744_v2 = vpop.f32.mrf.mxu1 }
 0x840   :  { %v2167_v17 = vadd.f32 %v3743_v61, %v3508_v32 }
 0x841   :  { %v3745_v23 = vpop.f32.mrf.mxu1 }
 0x842   :  { %v2188_v28 = vadd.f32 %v2187_v19, %v2167_v17  ;;  %v3746_v54 = vadd.f32 %v3745_v23, %v3744_v2 }
 0x843   :  { %v3747_v4 = vpop.f32.mrf.mxu1 }
 0x844   :  { %v2189_v3 = vrot.slane %v2188_v28, 4  ;;  %v2172_v6 = vadd.f32 %v3746_v54, %v3508_v32 }
 0x845   :  { %v3748_v5 = vpop.f32.mrf.mxu1 }
 0x846   :  { %v2190_v9 = vadd.f32 %v2189_v3, %v2188_v28  ;;  %v3749_v26 = vadd.f32 %v3748_v5, %v3747_v4 }
 0x847   :  { %v3750_v36 = vpop.f32.mrf.mxu1 }
 0x848   :  { %v2191_v40 = vrot.slane %v2190_v9, 2  ;;  %v2175_v18 = vadd.f32 %v3749_v26, %v3508_v32 }
 0x849   :  { %v3751_v20 = vpop.f32.mrf.mxu1 }
 0x84a   :  { %v2192_v34 = vadd.f32 %v2191_v40, %v2190_v9  ;;  %v3752_v42 = vadd.f32 %v3751_v20, %v3750_v36  ;;  %v2214_v0 = vadd.f32 %v2175_v18, %v2172_v6 }
 0x84b   :  { %v3753_v7 = vpop.f32.mrf.mxu1 }
 0x84c   :  { %v2193_v45 = vrot.slane %v2192_v34, 1  ;;  %v2180_v46 = vadd.f32 %v3752_v42, %v3508_v32 }
 0x84d   :  { %v3754_v35 = vpop.f32.mrf.mxu1 }
 0x84e   :  { %v2194_v33 = vadd.f32 %v2193_v45, %v2192_v34  ;;  %v3755_v10 = vadd.f32 %v3754_v35, %v3753_v7  ;;  %v2215_v37 = vadd.f32 %v2214_v0, %v2180_v46 }
 0x850   :  { %v2195_v38 = vmul.f32 0.03125, %v2194_v33  ;;  %v2183_v56 = vadd.f32 %v3755_v10, %v3508_v32 }
 0x852   :  { %v5188_v16 = vsub.f32 %v2156_v21, %v2195_v38  ;;  %v5190_v29 = vsub.f32 %v2159_v15, %v2195_v38  ;;  %v2198_v14 = vsub.f32 %v2164_v50, %v2195_v38  ;;  %v2216_v41 = vadd.f32 %v2215_v37, %v2183_v56 }
 0x853   :  { %v2199_v31 = vsub.f32 %v2167_v17, %v2195_v38 }
 0x854   :  { %v2200_v22 = vmul.f32 %v5188_v16, %v5188_v16  ;;  %v2201_v39 = vmul.f32 %v5190_v29, %v5190_v29  ;;  %v2217_v60 = vrot.slane %v2216_v41, 4  ;;  %v2202_v8 = vmul.f32 %v2198_v14, %v2198_v14 }
 0x855   :  { %v2203_v63 = vmul.f32 %v2199_v31, %v2199_v31 }
 0x856   :  { %v2204_v1 = vadd.f32 %v2201_v39, %v2200_v22  ;;  %v2218_v25 = vadd.f32 %v2217_v60, %v2216_v41 }
 0x858   :  { %v2205_v13 = vadd.f32 %v2204_v1, %v2202_v8  ;;  %v2219_v44 = vrot.slane %v2218_v25, 2  ;;  %v3354_v8 = vld [vmem:[%s5366_s4] ss:$0 sm:$0xff] }
 0x859   :  { %vm390_vm5 = vcmp.eq.s32.totalorder %v4792_v47, %v3354_v8  ;;  %v4094_v47 = vld [vmem:[%s5290_s11] ss:$8 sps:$4 sm:$0xff]  }
 0x85a   :  { %v2206_v62 = vadd.f32 %v2205_v13, %v2203_v63  ;;  %v2220_v51 = vadd.f32 %v2219_v44, %v2218_v25  ;;  %v4097_v13 = vld [vmem:[#allocation7 + $0x78] sm:$0xff]  }
 0x85b   :  { %v4098_v44 = vld [vmem:[#allocation7 + $0x38] sm:$0xff]  }
 0x85c   :  { %v2221_v58 = vrot.slane %v2220_v51, 1  ;;  %v2207_v49 = vrot.slane %v2206_v62, 4 }
 0x85e   :  { %v2222_v53 = vadd.f32 %v2221_v58, %v2220_v51  ;;  %v2208_v55 = vadd.f32 %v2207_v49, %v2206_v62  ;;  %v4099_v62 = vld [vmem:[#allocation7 + $0x70] sm:$0xff]   ;;  %v4101_v58 = vld [vmem:[#allocation7 + $0x68] sm:$0xff]  }
 0x85f   :  { %v4100_v51 = vld [vmem:[#allocation7 + $0x30] sm:$0xff]   ;;  %v4102_v49 = vld [vmem:[#allocation7 + $0x28] sm:$0xff]  }
 0x860   :  { %v2223_v12 = vmul.f32 0.03125, %v2222_v53  ;;  %v2209_v21 = vrot.slane %v2208_v55, 2  ;;  %v4103_v53 = vld [vmem:[#allocation7 + $0x60] sm:$0xff]  }
 0x862   :  { %v2224_v24 = vsub.f32 %v2172_v6, %v2223_v12  ;;  %v2225_v32 = vsub.f32 %v2175_v18, %v2223_v12  ;;  %v2226_v59 = vsub.f32 %v2180_v46, %v2223_v12  ;;  %v2227_v15 = vsub.f32 %v2183_v56, %v2223_v12  ;;  %v4104_v12 = vld [vmem:[#allocation7 + $0x20] sm:$0xff]  }
 0x863   :  { %v2210_v2 = vadd.f32 %v2209_v21, %v2208_v55  ;;  %v4105_v55 = vld [vmem:[#allocation7 + $0x58] sm:$0xff]  }
 0x864   :  { %v2228_v27 = vmul.f32 %v2224_v24, %v2224_v24  ;;  %v2229_v43 = vmul.f32 %v2225_v32, %v2225_v32  ;;  %v2230_v50 = vmul.f32 %v2226_v59, %v2226_v59  ;;  %v2231_v11 = vmul.f32 %v2227_v15, %v2227_v15 }
 0x865   :  { %v2211_v23 = vrot.slane %v2210_v2, 1 }
 0x866   :  { %v2232_v57 = vadd.f32 %v2229_v43, %v2228_v27 }
 0x867   :  { %v2212_v3 = vadd.f32 %v2211_v23, %v2210_v2  ;;  %v4110_v2 = vld [vmem:[#allocation7 + $0x8] sm:$0xff]   ;;  %v4113_v23 = vld [vmem:[#allocation8 + $0x70] ss:$8 sps:$4 sm:$0xff]  }
 0x868   :  { %v2233_v61 = vadd.f32 %v2232_v57, %v2230_v50 }
 0x869   :  { %v2213_v26 = vmul.f32 0.03125, %v2212_v3  ;;  %v4116_v3 = vld [vmem:[#allocation8 + $0x60] ss:$8 sps:$4 sm:$0xff]  }
 0x86a   :  { %v2234_v19 = vadd.f32 %v2233_v61, %v2231_v11  ;;  %v4109_v61 = vld [vmem:[#allocation7 + $0x48] sm:$0xff]  }
 0x86b   :  { %v2242_v54 = vadd.f32 1e-05, %v2213_v26  ;;  %v4124_v26 = vld [vmem:[#allocation8 + $0x44] ss:$8 sps:$4 sm:$0xff]  }
 0x86c   :  { %v2235_v17 = vrot.slane %v2234_v19, 4 }
 0x86e   :  { %v2236_v28 = vadd.f32 %v2235_v17, %v2234_v19  ;;  %v4111_v19 = vld [vmem:[#allocation7 + $0x40] sm:$0xff]  }
 0x86f   :  { %v4112_v17 = vld [vmem:[#allocation7] sm:$0xff]  }
 0x870   :  { %v2237_v4 = vrot.slane %v2236_v28, 2 }
 0x872   :  { %v2238_v5 = vadd.f32 %v2237_v4, %v2236_v28  ;;  %v4115_v28 = vld [vmem:[#allocation8 + $0x74] ss:$8 sps:$4 sm:$0xff]   ;;  %v4118_v4 = vld [vmem:[#allocation8 + $0x64] ss:$8 sps:$4 sm:$0xff]  }
 0x874   :  { %v2239_v9 = vrot.slane %v2238_v5, 1 }
 0x876   :  { %v2240_v36 = vadd.f32 %v2239_v9, %v2238_v5  ;;  %v4121_v5 = vld [vmem:[#allocation8 + $0x54] ss:$8 sps:$4 sm:$0xff]   ;;  %v4119_v9 = vld [vmem:[#allocation8 + $0x50] ss:$8 sps:$4 sm:$0xff]  }
 0x878   :  { %v2241_v40 = vmul.f32 0.03125, %v2240_v36  ;;  %v4122_v36 = vld [vmem:[#allocation8 + $0x40] ss:$8 sps:$4 sm:$0xff]  }
 0x87a   :  { %v2248_v20 = vadd.f32 1e-05, %v2241_v40  ;;  %v4127_v40 = vld [vmem:[#allocation8 + $0x34] ss:$8 sps:$4 sm:$0xff]  }
 0x87c   :  { %4197 = vrsqrt.f32 %v2248_v20  ;;  %v4130_v20 = vld [vmem:[#allocation8 + $0x24] ss:$8 sps:$4 sm:$0xff]  }
 0x87d   :  { %4199 = vrsqrt.f32 %v2242_v54  ;;  %v4125_v54 = vld [vmem:[#allocation8 + $0x30] ss:$8 sps:$4 sm:$0xff]  }
 0x889   :  { %v4198_v34 = vpop.eup %4197 }
 0x88a   :  { %v4200_v42 = vpop.eup %4199  ;;  %v2253_v18 = vmul.f32 %v4198_v34, %v2227_v15  ;;  %v2252_v7 = vmul.f32 %v4198_v34, %v2226_v59  ;;  %v2250_v45 = vmul.f32 %v4198_v34, %v2224_v24  ;;  %v2251_v6 = vmul.f32 %v4198_v34, %v2225_v32  ;;  %v4106_v24 = vld [vmem:[#allocation7 + $0x18] sm:$0xff]   ;;  %v4107_v32 = vld [vmem:[#allocation7 + $0x50] sm:$0xff]   ;;  %v2313_v15 = vpop.permute.xlu0 %2312  ;;  %v4128_v34 = vld [vmem:[#allocation8 + $0x20] ss:$8 sps:$4 sm:$0xff]  }
 0x88b   :  { %v2247_v33 = vmul.f32 %v4200_v42, %v2199_v31  ;;  %v2246_v56 = vmul.f32 %v4200_v42, %v2198_v14  ;;  %v2244_v37 = vmul.f32 %v4200_v42, %v5188_v16  ;;  %v2245_v60 = vmul.f32 %v4200_v42, %v5190_v29  ;;  %v4096_v29 = vld [vmem:[%s5290_s11 + $0x4] ss:$8 sps:$4 sm:$0xff]   ;;  %v4108_v59 = vld [vmem:[#allocation7 + $0x10] sm:$0xff]  }
 0x88c   :  { %v2261_v46 = vmax.f32 %v2253_v18, 0.0  ;;  %v2260_v35 = vmax.f32 %v2252_v7, 0.0  ;;  %v2258_v0 = vmax.f32 %v2250_v45, 0.0  ;;  %v2259_v38 = vmax.f32 %v2251_v6, 0.0  ;;  %2439 = vmatprep.subr.bf16.mxu1 %v4096_v29  ;;  %v4133_v42 = vld [vmem:[#allocation8 + $0x14] ss:$8 sps:$4 sm:$0xff]  }
 0x88d   :  { %v2257_v41 = vmax.f32 %v2247_v33, 0.0  ;;  %v2256_v39 = vmax.f32 %v2246_v56, 0.0  ;;  %v2254_v31 = vmax.f32 %v2244_v37, 0.0  ;;  %v2255_v1 = vmax.f32 %v2245_v60, 0.0  ;;  %2440 = vmatpush1.bf16.msra.mxu1 %v4094_v47  ;;  %v4131_v18 = vld [vmem:[#allocation8 + $0x10] ss:$8 sps:$4 sm:$0xff]  }
 0x88e   :  { %v2265_v10 = vpack.c.bf16 %v2261_v46, %v2260_v35  ;;  %v2264_v22 = vpack.c.bf16 %v2259_v38, %v2258_v0  ;;  %v3355_v16 = vsel %vm390_vm5, 1.0, %v5349_v30  ;;  %2854 = vmatprep.subr.bf16.mxu1 %v4115_v28  ;;  %v4136_v7 = vld [vmem:[#allocation8 + $0x4] ss:$8 sps:$4 sm:$0xff]   ;;  %v4134_v45 = vld [vmem:[#allocation8] ss:$8 sps:$4 sm:$0xff]  }
 0x88f   :  { %v2263_v14 = vpack.c.bf16 %v2257_v41, %v2256_v39  ;;  %v2262_v25 = vpack.c.bf16 %v2255_v1, %v2254_v31  ;;  %v393_v63 = vpack.c.bf16 %v3355_v16, %v3355_v16  ;;  %v4139_v6 = vld [vmem:[#allocation8 + $0xf4] ss:$8 sps:$4 sm:$0xff]   ;;  %v4137_v46 = vld [vmem:[#allocation8 + $0xf0] ss:$8 sps:$4 sm:$0xff]   ;;  %v4142_v35 = vld [vmem:[#allocation8 + $0xe4] ss:$8 sps:$4 sm:$0xff]  }
 0x890   :  { %3924 = vmatpush3.bf16.msra.mxu0 %v2265_v10  ;;  %v4140_v33 = vld [vmem:[#allocation8 + $0xe0] ss:$8 sps:$4 sm:$0xff]   ;;  %v4145_v10 = vld [vmem:[#allocation8 + $0xd4] ss:$8 sps:$4 sm:$0xff]   ;;  %v4143_v0 = vld [vmem:[#allocation8 + $0xd0] ss:$8 sps:$4 sm:$0xff]  }
 0x891   :  { %3925 = vmatprep.subr.bf16.mxu0 %v5349_v30  ;;  %v4148_v38 = vld [vmem:[#allocation8 + $0xc4] ss:$8 sps:$4 sm:$0xff]   ;;  %v4146_v56 = vld [vmem:[#allocation8 + $0xc0] ss:$8 sps:$4 sm:$0xff]   ;;  %v4151_v37 = vld [vmem:[#allocation8 + $0xb4] ss:$8 sps:$4 sm:$0xff]  }
 0x892   :  { %v4149_v41 = vld [vmem:[#allocation8 + $0xb0] ss:$8 sps:$4 sm:$0xff]  }
 0x894   :  { %3926 = vmatpush3.bf16.msra.mxu0 %v2264_v22  ;;  %v2333_v22 = vld [vmem:[%s5291_s12] sm:$0x3] }
 0x895   :  { %3927 = vmatprep.subr.bf16.mxu0 %v5349_v30  ;;  %v2338_v39 = vrot.slane %v2333_v22, %v4805_v52  ;;  %v2342_v60 = vrot.slane %v2333_v22, %v4795_v48  ;;  %v4180_v22 = vld [vmem:[#allocation11 + $0x20] sm:$0xff]  }
 0x898   :  { %3928 = vmatpush3.bf16.msra.mxu0 %v2263_v14 }
 0x899   :  { %3929 = vmatprep.subr.bf16.mxu0 %v5349_v30 }
 0x89c   :  { %3930 = vmatpush3.bf16.msra.mxu0 %v2262_v25 }
 0x89d   :  { %3761 = vmatprep.subr.bf16.mxu0 %v4097_v13 }
 0x89f   :  { %3932 = vmatmul.mubr.msk.bf16.vlgmr.msra.gmra.mxu0 %vm705_vm6, %v393_v63 }
 0x8a0   :  { %3762 = vmatpush3.bf16.msra.mxu0 %v4098_v44  ;;  %v4154_v44 = vld [vmem:[#allocation8 + $0xa4] ss:$8 sps:$4 sm:$0xff]  }
 0x8a1   :  { %3763 = vmatprep.subr.bf16.mxu0 %v4099_v62  ;;  %v4152_v62 = vld [vmem:[#allocation8 + $0xa0] ss:$8 sps:$4 sm:$0xff]  }
 0x8a4   :  { %3764 = vmatpush3.bf16.msra.mxu0 %v4100_v51  ;;  %v4157_v51 = vld [vmem:[#allocation8 + $0x94] ss:$8 sps:$4 sm:$0xff]  }
 0x8a5   :  { %3765 = vmatprep.subr.bf16.mxu0 %v4101_v58  ;;  %v4155_v58 = vld [vmem:[#allocation8 + $0x90] ss:$8 sps:$4 sm:$0xff]  }
 0x8a8   :  { %3766 = vmatpush3.bf16.msra.mxu0 %v4102_v49  ;;  %v4160_v49 = vld [vmem:[#allocation8 + $0x84] ss:$8 sps:$4 sm:$0xff]  }
 0x8a9   :  { %3767 = vmatprep.subr.bf16.mxu0 %v4103_v53  ;;  %v4158_v53 = vld [vmem:[#allocation8 + $0x80] ss:$8 sps:$4 sm:$0xff]  }
 0x8ac   :  { %3768 = vmatpush3.bf16.msra.mxu0 %v4104_v12  ;;  %v4161_v12 = vld [vmem:[#allocation10 + $0x78] sm:$0xff]  }
 0x8ad   :  { %3769 = vmatprep.subr.bf16.mxu0 %v4105_v55  ;;  %v4162_v55 = vld [vmem:[#allocation10 + $0x38] sm:$0xff]  }
 0x8b0   :  { %3770 = vmatpush3.bf16.msra.mxu0 %v4106_v24  ;;  %v4163_v24 = vld [vmem:[#allocation10 + $0x70] sm:$0xff]  }
 0x8b1   :  { %3771 = vmatprep.subr.bf16.mxu0 %v4107_v32  ;;  %v4164_v32 = vld [vmem:[#allocation10 + $0x30] sm:$0xff]  }
 0x8b4   :  { %3772 = vmatpush3.bf16.msra.mxu0 %v4108_v59  ;;  %v4165_v59 = vld [vmem:[#allocation10 + $0x68] sm:$0xff]  }
 0x8b5   :  { %3773 = vmatprep.subr.bf16.mxu0 %v4109_v61  ;;  %v3542_v61 = vld [vmem:[%s5293_s14] ss:$0 sm:$0xff] }
 0x8b8   :  { %3774 = vmatpush3.bf16.msra.mxu0 %v4110_v2 }
 0x8b9   :  { %3775 = vmatprep.subr.bf16.mxu0 %v4111_v19 }
 0x8bc   :  { %3776 = vmatpush3.bf16.msra.mxu0 %v4112_v17 }
 0x8bd   :  { %3783 = vmatprep.subr.bf16.mxu0 %v4161_v12 }
 0x95f   :  { %v2303_v27 = vpop.f32.mrf.mxu0 }
 0x960   :  { %v2315_v43 = vmul.f32 %v2313_v15, %v2303_v27  ;;  %v4166_v15 = vld [vmem:[#allocation10 + $0x28] sm:$0xff]   ;;  %v4167_v27 = vld [vmem:[#allocation10 + $0x60] sm:$0xff]  }
 0x961   :  { %v3933_v21 = vpop.f32.mrf.mxu0 }
 0x962   :  { %v2316_v50 = vpack.c.bf16 %v2315_v43, %v2315_v43  ;;  %v4168_v43 = vld [vmem:[#allocation10 + $0x20] sm:$0xff]   ;;  %v4169_v21 = vld [vmem:[#allocation10 + $0x58] sm:$0xff]  }
 0x963   :  { %v2306_v57 = vpop.f32.mrf.mxu0 }
 0x964   :  { %2458 = vmatmul.mubr.bf16.vlgmr.msra.gmra.mxu1 %v2316_v50  ;;  %v4170_v50 = vld [vmem:[#allocation10 + $0x18] sm:$0xff]   ;;  %v4171_v57 = vld [vmem:[#allocation10 + $0x50] sm:$0xff]  }
 0x965   :  { %v3934_v11 = vpop.f32.mrf.mxu0  ;;  %2855 = vmatpush1.bf16.msra.mxu1 %v4113_v23 }
 0x966   :  { %2856 = vmatprep.subr.bf16.mxu1 %v4118_v4 }
 0x969   :  { %2857 = vmatpush1.bf16.msra.mxu1 %v4116_v3 }
 0x96a   :  { %2858 = vmatprep.subr.bf16.mxu1 %v4121_v5 }
 0x96d   :  { %2859 = vmatpush1.bf16.msra.mxu1 %v4119_v9  ;;  %v4172_v9 = vld [vmem:[#allocation10 + $0x10] sm:$0xff]  }
 0x96e   :  { %2860 = vmatprep.subr.bf16.mxu1 %v4124_v26  ;;  %v4173_v26 = vld [vmem:[#allocation10 + $0x48] sm:$0xff]  }
 0x971   :  { %2861 = vmatpush1.bf16.msra.mxu1 %v4122_v36  ;;  %v4174_v36 = vld [vmem:[#allocation10 + $0x8] sm:$0xff]  }
 0x972   :  { %2862 = vmatprep.subr.bf16.mxu1 %v4127_v40  ;;  %v4175_v40 = vld [vmem:[#allocation10 + $0x40] sm:$0xff]  }
 0x975   :  { %2863 = vmatpush1.bf16.msra.mxu1 %v4125_v54  ;;  %v4176_v54 = vld [vmem:[#allocation10] sm:$0xff]  }
 0x976   :  { %2864 = vmatprep.subr.bf16.mxu1 %v4130_v20  ;;  %v2682_v20 = vld [vmem:[%s5295_s16] sm:$0x3] }
 0x979   :  { %2865 = vmatpush1.bf16.msra.mxu1 %v4128_v34  ;;  %v2687_v34 = vrot.slane %v2682_v20, %v4805_v52  ;;  %v4178_v52 = vld [vmem:[#allocation11 + $0x30] sm:$0xff]  }
 0x97a   :  { %2866 = vmatprep.subr.bf16.mxu1 %v4133_v42  ;;  %v2691_v42 = vrot.slane %v2682_v20, %v4795_v48  ;;  %v4179_v48 = vld [vmem:[#allocation11 + $0x28] sm:$0xff]  }
 0x97d   :  { %2867 = vmatpush1.bf16.msra.mxu1 %v4131_v18 }
 0x97e   :  { %2868 = vmatprep.subr.bf16.mxu1 %v4136_v7 }
 0x981   :  { %2869 = vmatpush1.bf16.msra.mxu1 %v4134_v45 }
 0x982   :  { %2870 = vmatprep.subr.bf16.mxu1 %v4139_v6 }
 0x985   :  { %2871 = vmatpush2.bf16.msra.mxu1 %v4137_v46 }
 0x986   :  { %2872 = vmatprep.subr.bf16.mxu1 %v4142_v35 }
 0x989   :  { %2873 = vmatpush2.bf16.msra.mxu1 %v4140_v33 }
 0x98a   :  { %2874 = vmatprep.subr.bf16.mxu1 %v4145_v10 }
 0x98d   :  { %2875 = vmatpush2.bf16.msra.mxu1 %v4143_v0 }
 0x98e   :  { %2876 = vmatprep.subr.bf16.mxu1 %v4148_v38 }
 0x991   :  { %2877 = vmatpush2.bf16.msra.mxu1 %v4146_v56 }
 0x992   :  { %2878 = vmatprep.subr.bf16.mxu1 %v4151_v37  ;;  %v4177_v37 = vld [vmem:[#allocation11 + $0x38] sm:$0xff]  }
 0x995   :  { %2879 = vmatpush2.bf16.msra.mxu1 %v4149_v41 }
 0x996   :  { %2880 = vmatprep.subr.bf16.mxu1 %v4154_v44 }
 0x999   :  { %2881 = vmatpush2.bf16.msra.mxu1 %v4152_v62 }
 0x99a   :  { %2882 = vmatprep.subr.bf16.mxu1 %v4157_v51 }
 0x99d   :  { %2883 = vmatpush2.bf16.msra.mxu1 %v4155_v58 }
 0x99e   :  { %2884 = vmatprep.subr.bf16.mxu1 %v4160_v49 }
 0x9a1   :  { %2885 = vmatpush2.bf16.msra.mxu1 %v4158_v53 }
 0x9a2   :  { %3955 = vmatprep.subr.bf16.mxu1 %v5349_v30 }
 0xa24   :  { %v2459_v8 = vpop.f32.mrf.mxu1 }
 0xa25   :  { %v2460_v14 = vadd.f32 %v2459_v8, %v2338_v39  ;;  %v4181_v39 = vld [vmem:[#allocation11 + $0x18] sm:$0xff]   ;;  %v4183_v8 = vld [vmem:[#allocation11 + $0x8] sm:$0xff]  }
 0xa26   :  { %v2461_v31 = vpop.f32.mrf.mxu1 }
 0xa27   :  { %v2462_v1 = vadd.f32 %v2461_v31, %v2342_v60  ;;  %v2466_v16 = vmax.f32 %v2460_v14, 0.0  ;;  %v4182_v60 = vld [vmem:[#allocation11 + $0x10] sm:$0xff]   ;;  %v4184_v14 = vld [vmem:[#allocation11] sm:$0xff]  }
 0xa28   :  { %v2463_v25 = vpop.f32.mrf.mxu1  ;;  %v4185_v31 = vld [vmem:[%s5300_s21 + $0x38] sm:$0xff]  }
 0xa29   :  { %v2467_v63 = vmax.f32 %v2462_v1, 0.0  ;;  %v2468_v13 = vpack.c.bf16 %v2466_v16, %v2466_v16  ;;  %v4186_v1 = vld [vmem:[%s5300_s21 + $0x30] sm:$0xff]   ;;  %v4187_v16 = vld [vmem:[%s5300_s21 + $0x28] sm:$0xff]   ;;  %v4188_v25 = vld [vmem:[%s5300_s21 + $0x20] sm:$0xff]  }
 0xa2a   :  { %v2464_v29 = vpop.f32.mrf.mxu1 }
 0xa2b   :  { %v2469_v47 = vpack.c.bf16 %v2467_v63, %v2467_v63  ;;  %v4189_v63 = vld [vmem:[%s5300_s21 + $0x18] sm:$0xff]   ;;  %v4190_v29 = vld [vmem:[%s5300_s21 + $0x10] sm:$0xff]  }
 0xa2d   :  { %2637 = vmatprep.mubr.bf16.mxu0 %v2469_v47 }
 0xa2e   :  { %2638 = vmatmul.mubr.bf16.vlgmr.msra.gmra.mxu0 %v2468_v13  ;;  %v3591_v13 = vld [vmem:[%s5297_s18] ss:$0 sm:$0xff] }
 0xa2f   :  { %3784 = vmatpush3.bf16.msra.mxu0 %v4162_v55 }
 0xa30   :  { %3785 = vmatprep.subr.bf16.mxu0 %v4163_v24  ;;  %v4191_v24 = vld [vmem:[%s5300_s21 + $0x8] sm:$0xff]  }
 0xa33   :  { %3786 = vmatpush3.bf16.msra.mxu0 %v4164_v32  ;;  %v4192_v32 = vld [vmem:[%s5300_s21] sm:$0xff]  }
 0xa34   :  { %3787 = vmatprep.subr.bf16.mxu0 %v4165_v59  ;;  %v3608_v59 = vld [vmem:[%s5299_s20] ss:$0 sm:$0xff] }
 0xa37   :  { %3788 = vmatpush3.bf16.msra.mxu0 %v4166_v15 }
 0xa38   :  { %3789 = vmatprep.subr.bf16.mxu0 %v4167_v27 }
 0xa3b   :  { %3790 = vmatpush3.bf16.msra.mxu0 %v4168_v43 }
 0xa3c   :  { %3791 = vmatprep.subr.bf16.mxu0 %v4169_v21 }
 0xa3f   :  { %3792 = vmatpush3.bf16.msra.mxu0 %v4170_v50 }
 0xa40   :  { %3793 = vmatprep.subr.bf16.mxu0 %v4171_v57 }
 0xa43   :  { %3794 = vmatpush3.bf16.msra.mxu0 %v4172_v9 }
 0xa44   :  { %3795 = vmatprep.subr.bf16.mxu0 %v4173_v26 }
 0xa47   :  { %3796 = vmatpush3.bf16.msra.mxu0 %v4174_v36 }
 0xa48   :  { %3797 = vmatprep.subr.bf16.mxu0 %v4175_v40 }
 0xa4b   :  { %3798 = vmatpush3.bf16.msra.mxu0 %v4176_v54 }
 0xa4c   :  { %3935 = vmatprep.subr.bf16.mxu0 %v5349_v30 }
 0xaee   :  { %v3777_v11 = vpop.f32.mrf.mxu0 }
 0xaf0   :  { %v3778_v2 = vpop.f32.mrf.mxu0 }
 0xaf1   :  { %v3779_v19 = vadd.f32 %v3778_v2, %v3777_v11 }
 0xaf2   :  { %v3780_v17 = vpop.f32.mrf.mxu0 }
 0xaf3   :  { %v2640_v23 = vadd.f32 %v3779_v19, %v3542_v61 }
 0xaf4   :  { %v3781_v28 = vpop.f32.mrf.mxu0 }
 0xaf5   :  { %v2646_v4 = vrot.slane %v2640_v23, 4  ;;  %v2648_v5 = vpack.c.bf16 %v2640_v23, %v2640_v23 }
 0xaf7   :  { %v2649_v3 = vpack.c.bf16 %v2646_v4, %v2646_v4 }
 0xaf9   :  { %2886 = vmatprep.mubr.bf16.mxu1 %v2649_v3 }
 0xafa   :  { %2887 = vmatmul.mubr.bf16.vlgmr.msra.gmra.mxu1 %v2648_v5 }
 0xafb   :  { %3971 = vmatprep.mubr.msk.bf16.mxu1 %vm4342_vm0, %v5349_v30  ;;  %3956 = vmatpush3.bf16.msra.mxu1 %v4185_v31 }
 0xafc   :  { %3957 = vmatprep.subr.bf16.mxu1 %v5349_v30 }
 0xaff   :  { %3958 = vmatpush3.bf16.msra.mxu1 %v4186_v1 }
 0xb00   :  { %3959 = vmatprep.subr.bf16.mxu1 %v5349_v30 }
 0xb03   :  { %3960 = vmatpush3.bf16.msra.mxu1 %v4187_v16 }
 0xb04   :  { %3961 = vmatprep.subr.bf16.mxu1 %v5349_v30 }
 0xb07   :  { %3962 = vmatpush3.bf16.msra.mxu1 %v4188_v25 }
 0xb08   :  { %3963 = vmatprep.subr.bf16.mxu1 %v5349_v30 }
 0xb0b   :  { %3964 = vmatpush3.bf16.msra.mxu1 %v4189_v63 }
 0xb0c   :  { %3965 = vmatprep.subr.bf16.mxu1 %v5349_v30 }
 0xb0f   :  { %3966 = vmatpush3.bf16.msra.mxu1 %v4190_v29 }
 0xb10   :  { %3967 = vmatprep.subr.bf16.mxu1 %v5349_v30 }
 0xb13   :  { %3968 = vmatpush3.bf16.msra.mxu1 %v4191_v24 }
 0xb14   :  { %3969 = vmatprep.subr.bf16.mxu1 %v5349_v30 }
 0xb17   :  { %3970 = vmatpush3.bf16.msra.mxu1 %v4192_v32 }
 0xbba   :  { %v2888_v18 = vpop.f32.mrf.mxu1 }
 0xbbb   :  { %v2889_v7 = vadd.f32 %v2888_v18, %v2687_v34 }
 0xbbc   :  { %v2890_v45 = vpop.f32.mrf.mxu1 }
 0xbbd   :  { %vm2895_vm6 = vcmp.gt.f32.partialorder %v2889_v7, 0.0  ;;  %v2897_v6 = vmul.f32 0.01, %v2889_v7  ;;  %v2891_v46 = vadd.f32 %v2890_v45, %v2691_v42 }
 0xbbe   :  { %v2892_v35 = vpop.f32.mrf.mxu1 }
 0xbbf   :  { %vm2896_vm4 = vcmp.gt.f32.partialorder %v2891_v46, 0.0  ;;  %v2898_v33 = vmul.f32 0.01, %v2891_v46  ;;  %v2899_v10 = vsel %vm2895_vm6, %v2889_v7, %v2897_v6 }
 0xbc0   :  { %v2893_v0 = vpop.f32.mrf.mxu1  ;;  %v2901_v41 = vpack.c.bf16 %v2899_v10, %v2899_v10 }
 0xbc1   :  { %v2900_v38 = vsel %vm2896_vm4, %v2891_v46, %v2898_v33 }
 0xbc2   :  { %v2902_v56 = vpack.c.bf16 %v2900_v38, %v2900_v38 }
 0xbc4   :  { %3070 = vmatprep.mubr.bf16.mxu0 %v2902_v56 }
 0xbc5   :  { %3071 = vmatmul.mubr.bf16.vlgmr.msra.gmra.mxu0 %v2901_v41 }
 0xbc6   :  { %3936 = vmatpush3.bf16.msra.mxu0 %v4177_v37  ;;  %3951 = vmatprep.mubr.msk.bf16.mxu0 %vm4342_vm0, %v5349_v30 }
 0xbc7   :  { %3937 = vmatprep.subr.bf16.mxu0 %v5349_v30 }
 0xbca   :  { %3938 = vmatpush3.bf16.msra.mxu0 %v4178_v52 }
 0xbcb   :  { %3939 = vmatprep.subr.bf16.mxu0 %v5349_v30 }
 0xbce   :  { %3940 = vmatpush3.bf16.msra.mxu0 %v4179_v48 }
 0xbcf   :  { %3941 = vmatprep.subr.bf16.mxu0 %v5349_v30 }
 0xbd2   :  { %3942 = vmatpush3.bf16.msra.mxu0 %v4180_v22 }
 0xbd3   :  { %3943 = vmatprep.subr.bf16.mxu0 %v5349_v30 }
 0xbd6   :  { %3944 = vmatpush3.bf16.msra.mxu0 %v4181_v39 }
 0xbd7   :  { %3945 = vmatprep.subr.bf16.mxu0 %v5349_v30 }
 0xbda   :  { %3946 = vmatpush3.bf16.msra.mxu0 %v4182_v60 }
 0xbdb   :  { %3947 = vmatprep.subr.bf16.mxu0 %v5349_v30 }
 0xbde   :  { %3948 = vmatpush3.bf16.msra.mxu0 %v4183_v8 }
 0xbdf   :  { %3949 = vmatprep.subr.bf16.mxu0 %v5349_v30  ;;  %v3617_v30 = vld [vmem:[#allocation2] ss:$0 sm:$0xff] }
 0xbe2   :  { %3950 = vmatpush3.bf16.msra.mxu0 %v4184_v14 }
 0xc85   :  { %v3799_v47 = vpop.f32.mrf.mxu0 }
 0xc87   :  { %v3800_v44 = vpop.f32.mrf.mxu0 }
 0xc88   :  { %v3801_v62 = vadd.f32 %v3800_v44, %v3799_v47 }
 0xc89   :  { %v3802_v51 = vpop.f32.mrf.mxu0 }
 0xc8a   :  { %v3073_v58 = vadd.f32 %v3801_v62, %v3591_v13 }
 0xc8b   :  { %v3803_v49 = vpop.f32.mrf.mxu0 }
 0xc8c   :  { %vm3078_vm9 = vcmp.gt.f32.partialorder %v3073_v58, 0.0  ;;  %v3079_v53 = vmul.f32 0.01, %v3073_v58 }
 0xc8e   :  { %v3080_v12 = vsel %vm3078_vm9, %v3073_v58, %v3079_v53 }
 0xc8f   :  { %v3081_v55 = vpack.c.bf16 %v3080_v12, %v3080_v12 }
 0xc91   :  { %3952 = vmatmul.mubr.bf16.vlgmr.msra.gmra.mxu0 %v3081_v55 }
 0xd51   :  { %v3187_v15 = vpop.f32.mrf.mxu0 }
 0xd52   :  { %v3188_v27 = vadd.f32 %v3608_v59, %v3187_v15 }
 0xd53   :  { %v3953_v43 = vpop.f32.mrf.mxu0 }
 0xd54   :  { %vm3193_vm14 = vcmp.gt.f32.partialorder %v3188_v27, 0.0  ;;  %v3194_v21 = vmul.f32 0.01, %v3188_v27 }
 0xd55   :  { %v3190_v50 = vpop.f32.mrf.mxu0 }
 0xd56   :  { %v3195_v57 = vsel %vm3193_vm14, %v3188_v27, %v3194_v21 }
 0xd57   :  { %v3196_v11 = vpack.c.bf16 %v3195_v57, %v3195_v57  ;;  %v3954_v61 = vpop.f32.mrf.mxu0 }
 0xd59   :  { %3972 = vmatmul.mubr.bf16.vlgmr.msra.gmra.mxu1 %v3196_v11 }
 0xe19   :  { %v3302_v2 = vpop.f32.mrf.mxu1 }
 0xe1a   :  { %v3303_v19 = vadd.f32 %v3617_v30, %v3302_v2 }
 0xe1b   :  { %v3973_v17 = vpop.f32.mrf.mxu1 }
 0xe1c   :  { %3309 = vst.msk [vmem:[%s5302_s23] sm:$0xf] %vm3308_vm15, %v3303_v19 }
 0xe1d   :  { %v3305_v23 = vpop.f32.mrf.mxu1 }
 0xe1f   :  { %v3974_v28 = vpop.f32.mrf.mxu1 }
 0xe20   :  { %3314 = vsyncpa [#allocation4], 1 }
 0xe21   :  { %3315 = vsyncpa [#allocation6], 1 }
 0xe22   :  { %3316 = vsyncpa [#allocation9], 1 }
 0xe23   :  { %3317 = vsyncpa [#allocation12], 1 }

</bundles_post_ra>
